<compile_context>
chip_gen: v7x
topology: tpu7x:2x2x1
jax: 0.10.0
libtpu: 0.0.40
codegen_flags: <defaults>
</compile_context>

<pallas_src>
import jax
import jax.numpy as jnp
from jax.experimental import pallas as pl
from jax.experimental.pallas import tpu as pltpu

_BN_EPS = 1e-5      # nn.BatchNorm3d default
_L2_EPS = 1e-12     # F.normalize default


# ---------------------------------------------------------------------------
# Fused kernel: conv1x1 -> BN(train stats) -> ReLU -> conv1x1 -> L2 normalize.
# ---------------------------------------------------------------------------
def _projection_head_kernel(x_ref, w1_ref, p1_ref, w2_ref, b2_ref, o_ref, h_ref):
    n_batch, _, s = x_ref.shape          # (N, C_in, S)  S = D*H*W (lanes)
    c_mid = w1_ref.shape[0]

    b1 = p1_ref[:, 0:1]                  # (c_mid, 1) bias
    g1 = p1_ref[:, 1:2]                  # gamma
    be1 = p1_ref[:, 2:3]                 # beta

    w1 = w1_ref[...]                     # bf16 (c_mid, c_in)

    # ---- conv1 (1x1x1) + one-pass BatchNorm statistics (sum / sumsq) --------
    ssum = jnp.zeros((c_mid, 1), jnp.float32)
    ssq = jnp.zeros((c_mid, 1), jnp.float32)
    for n in range(n_batch):                                   # static, unrolled
        xn = x_ref[n].astype(jnp.bfloat16)                     # (c_in, s)
        hn = jnp.dot(w1, xn, preferred_element_type=jnp.float32) + b1
        ssum = ssum + jnp.sum(hn, axis=1, keepdims=True)
        ssq = ssq + jnp.sum(hn * hn, axis=1, keepdims=True)
        h_ref[n] = hn

    inv_cnt = 1.0 / float(n_batch * s)
    mean = ssum * inv_cnt
    var = jnp.maximum(ssq * inv_cnt - mean * mean, 0.0)        # biased variance
    scale = g1 * jax.lax.rsqrt(var + _BN_EPS)
    shift = be1 - mean * scale

    # ---- BN affine + ReLU -> conv2 (1x1x1) -> L2 normalize over channels ----
    w2 = w2_ref[...]                     # bf16 (c_out, c_mid)
    b2 = b2_ref[...]                     # f32  (c_out, 1)
    for n in range(n_batch):
        a = jnp.maximum(h_ref[n] * scale + shift, 0.0).astype(jnp.bfloat16)
        y = jnp.dot(w2, a, preferred_element_type=jnp.float32) + b2    # (c_out, s)
        norm = jnp.sqrt(jnp.sum(y * y, axis=0, keepdims=True))         # (1, s)
        o_ref[n] = y / jnp.maximum(norm, _L2_EPS)


def projection_head_forward(params, x):
    """Pallas implementation of ProjectionHead.forward (convmlp branch), NCDHW in/out."""
    n, c_in, d, h, w = x.shape
    s = d * h * w
    c_mid = params['w1'].shape[0]
    c_out = params['w2'].shape[0]

    # Free reshapes only -- channel stays the contraction axis, spatial flattens onto lanes.
    x3 = x.reshape(n, c_in, s)
    w1b = params['w1'].reshape(c_mid, c_in).astype(jnp.bfloat16)
    w2b = params['w2'].reshape(c_out, c_mid).astype(jnp.bfloat16)
    p1 = jnp.stack([params['b1'], params['g1'], params['beta1']], axis=1)   # (c_mid, 3)
    b2 = params['b2'].reshape(c_out, 1)

    flops = 2 * n * s * (c_in * c_mid + c_mid * c_out)
    bytes_accessed = (4 * x3.size + 4 * n * c_out * s
                      + 2 * (w1b.size + w2b.size) + 4 * (p1.size + b2.size))

    # TODO(synk): at realistic UXNet sizes, tile the spatial axis with a grid (partial
    # sum/sumsq -> combine for BN) so the kernel fits v7x's 64 MiB VMEM and shards across
    # its 2 TensorCores via dimension_semantics=("parallel", ...).
    out3 = pl.pallas_call(
        _projection_head_kernel,
        out_shape=jax.ShapeDtypeStruct((n, c_out, s), jnp.float32),
        in_specs=[pl.BlockSpec(memory_space=pltpu.MemorySpace.VMEM)] * 5,
        out_specs=pl.BlockSpec(memory_space=pltpu.MemorySpace.VMEM),
        scratch_shapes=[pltpu.VMEM((n, c_mid, s), jnp.float32)],
        compiler_params=pltpu.CompilerParams(vmem_limit_bytes=32 * 1024 * 1024),
        cost_estimate=pl.CostEstimate(flops=flops,
                                      transcendentals=n * s + c_mid,
                                      bytes_accessed=bytes_accessed),
    )(x3, w1b, p1, w2b, b2)
    return out3.reshape(n, c_out, d, h, w)


# ---------------------------------------------------------------------------
# Parameters (deterministic synthetic init, PyTorch-shaped conv weights).
# ---------------------------------------------------------------------------
def init_projection_head_params(key, dim_in, proj_dim):
    ks = jax.random.split(key, 6)
    sc = 1.0 / jnp.sqrt(jnp.float32(dim_in))
    return dict(
        w1=sc * jax.random.normal(ks[0], (dim_in, dim_in, 1, 1, 1), jnp.float32),
        b1=0.1 * jax.random.normal(ks[1], (dim_in,), jnp.float32),
        g1=1.0 + 0.1 * jax.random.normal(ks[2], (dim_in,), jnp.float32),
        beta1=0.1 * jax.random.normal(ks[3], (dim_in,), jnp.float32),
        w2=sc * jax.random.normal(ks[4], (proj_dim, dim_in, 1, 1, 1), jnp.float32),
        b2=0.1 * jax.random.normal(ks[5], (proj_dim,), jnp.float32),
    )


# ---------------------------------------------------------------------------
# Pure-JAX reference (independent formulation via lax.conv, all f32).
# ---------------------------------------------------------------------------
def projection_head_reference(params, x):
    def conv1x1(v, wgt, b):
        y = jax.lax.conv_general_dilated(
            v, wgt, window_strides=(1, 1, 1), padding='VALID',
            dimension_numbers=('NCDHW', 'OIDHW', 'NCDHW'))
        return y + b.reshape(1, -1, 1, 1, 1)

    h = conv1x1(x, params['w1'], params['b1'])
    mean = jnp.mean(h, axis=(0, 2, 3, 4), keepdims=True)
    var = jnp.mean(jnp.square(h - mean), axis=(0, 2, 3, 4), keepdims=True)
    h = ((h - mean) / jnp.sqrt(var + _BN_EPS) * params['g1'].reshape(1, -1, 1, 1, 1)
         + params['beta1'].reshape(1, -1, 1, 1, 1))
    h = jnp.maximum(h, 0.0)
    y = conv1x1(h, params['w2'], params['b2'])
    norm = jnp.sqrt(jnp.sum(y * y, axis=1, keepdims=True))
    return y / jnp.maximum(norm, _L2_EPS)


if __name__ == "__main__":
    key = jax.random.PRNGKey(0)
    k_param, k_x = jax.random.split(key)

    dim_in, proj_dim = 32, 256           # proj_dim=256 is the PyTorch default
    N, D, H, W = 2, 8, 8, 8              # S = D*H*W = 512 -> lane-dense slabs

    params = init_projection_head_params(k_param, dim_in, proj_dim)
    x = jax.random.normal(k_x, (N, dim_in, D, H, W), jnp.float32)

    out = jax.jit(projection_head_forward)(params, x)
    jax.block_until_ready(out)

    ref = projection_head_reference(params, x)
    assert out.shape == (N, proj_dim, D, H, W), out.shape
    err = float(jnp.max(jnp.abs(out - ref)))
    # Outputs are L2-normalized (|y| <= 1); 5e-3 abs tolerance covers bf16 MXU-operand
    # rounding (accumulation is f32, reference is pure f32).
    if err > 5e-3:
        raise AssertionError(f"mismatch vs reference: max abs err {err}")
    print("KERNEL_OK")
</pallas_src>

<mosaic_0001>
module attributes {stable_mosaic.version = 11 : i64} {
  func.func @_projection_head_kernel(%arg0: memref<2x32x512xf32, #tpu.memory_space<vmem>>, %arg1: memref<32x32xbf16, #tpu.memory_space<vmem>>, %arg2: memref<32x3xf32, #tpu.memory_space<vmem>>, %arg3: memref<256x32xbf16, #tpu.memory_space<vmem>>, %arg4: memref<256x1xf32, #tpu.memory_space<vmem>>, %arg5: memref<2x256x512xf32, #tpu.memory_space<vmem>>, %arg6: memref<2x32x512xf32, #tpu.memory_space<vmem>>) attributes {dimension_semantics = [], scalar_prefetch = 0 : i64, scratch_operands = 1 : i64, tpu.core_type = #tpu.core_type<tc>} {
    %c0 = arith.constant 0 : index
    %c0_0 = arith.constant 0 : index
    %0 = vector.load %arg2[%c0, %c0_0] : memref<32x3xf32, #tpu.memory_space<vmem>>, vector<32x1xf32>
    %c0_1 = arith.constant 0 : index
    %c1 = arith.constant 1 : index
    %1 = vector.load %arg2[%c0_1, %c1] : memref<32x3xf32, #tpu.memory_space<vmem>>, vector<32x1xf32>
    %c0_2 = arith.constant 0 : index
    %c2 = arith.constant 2 : index
    %2 = vector.load %arg2[%c0_2, %c2] : memref<32x3xf32, #tpu.memory_space<vmem>>, vector<32x1xf32>
    %c0_3 = arith.constant 0 : index
    %c0_4 = arith.constant 0 : index
    %3 = vector.load %arg1[%c0_3, %c0_4] : memref<32x32xbf16, #tpu.memory_space<vmem>>, vector<32x32xbf16>
    %cst = arith.constant 0.000000e+00 : f32
    %4 = vector.broadcast %cst : f32 to vector<32x1xf32>
    %cst_5 = arith.constant 0.000000e+00 : f32
    %5 = vector.broadcast %cst_5 : f32 to vector<32x1xf32>
    %c0_6 = arith.constant 0 : index
    %c0_7 = arith.constant 0 : index
    %c0_8 = arith.constant 0 : index
    %6 = vector.load %arg0[%c0_6, %c0_7, %c0_8] : memref<2x32x512xf32, #tpu.memory_space<vmem>>, vector<1x32x512xf32>
    %7 = vector.shape_cast %6 : vector<1x32x512xf32> to vector<32x512xf32>
    %8 = arith.truncf %7 : vector<32x512xf32> to vector<32x512xbf16>
    %cst_9 = arith.constant dense<0.000000e+00> : vector<32x512xf32>
    %9 = tpu.matmul %3, %8, %cst_9 {dimension_numbers = #tpu.dot_dimension_numbers<[1], [0], [0], [1], [0, 0, 1, 1], [], []>} : vector<32x32xbf16>, vector<32x512xbf16>, vector<32x512xf32> -> vector<32x512xf32>
    %10 = vector.broadcast %0 : vector<32x1xf32> to vector<32x512xf32>
    %11 = arith.addf %9, %10 : vector<32x512xf32>
    %cst_10 = arith.constant dense<0.000000e+00> : vector<32xf32>
    %12 = vector.multi_reduction <add>, %11, %cst_10 [1] : vector<32x512xf32> to vector<32xf32>
    %13 = vector.shape_cast %12 : vector<32xf32> to vector<32x1xf32>
    %14 = arith.addf %4, %13 : vector<32x1xf32>
    %15 = arith.mulf %11, %11 : vector<32x512xf32>
    %cst_11 = arith.constant dense<0.000000e+00> : vector<32xf32>
    %16 = vector.multi_reduction <add>, %15, %cst_11 [1] : vector<32x512xf32> to vector<32xf32>
    %17 = vector.shape_cast %16 : vector<32xf32> to vector<32x1xf32>
    %18 = arith.addf %5, %17 : vector<32x1xf32>
    %c0_12 = arith.constant 0 : index
    %c0_13 = arith.constant 0 : index
    %c0_14 = arith.constant 0 : index
    %19 = vector.load %arg6[%c0_12, %c0_13, %c0_14] : memref<2x32x512xf32, #tpu.memory_space<vmem>>, vector<1x32x512xf32>
    %20 = vector.shape_cast %19 : vector<1x32x512xf32> to vector<32x512xf32>
    %21 = vector.shape_cast %11 : vector<32x512xf32> to vector<1x32x512xf32>
    tpu.vector_store %arg6[%c0_12, %c0_13, %c0_14], %21 {strides = array<i32>} : memref<2x32x512xf32, #tpu.memory_space<vmem>>, vector<1x32x512xf32>,
    %c1_15 = arith.constant 1 : index
    %c0_16 = arith.constant 0 : index
    %c0_17 = arith.constant 0 : index
    %22 = vector.load %arg0[%c1_15, %c0_16, %c0_17] : memref<2x32x512xf32, #tpu.memory_space<vmem>>, vector<1x32x512xf32>
    %23 = vector.shape_cast %22 : vector<1x32x512xf32> to vector<32x512xf32>
    %24 = arith.truncf %23 : vector<32x512xf32> to vector<32x512xbf16>
    %cst_18 = arith.constant dense<0.000000e+00> : vector<32x512xf32>
    %25 = tpu.matmul %3, %24, %cst_18 {dimension_numbers = #tpu.dot_dimension_numbers<[1], [0], [0], [1], [0, 0, 1, 1], [], []>} : vector<32x32xbf16>, vector<32x512xbf16>, vector<32x512xf32> -> vector<32x512xf32>
    %26 = vector.broadcast %0 : vector<32x1xf32> to vector<32x512xf32>
    %27 = arith.addf %25, %26 : vector<32x512xf32>
    %cst_19 = arith.constant dense<0.000000e+00> : vector<32xf32>
    %28 = vector.multi_reduction <add>, %27, %cst_19 [1] : vector<32x512xf32> to vector<32xf32>
    %29 = vector.shape_cast %28 : vector<32xf32> to vector<32x1xf32>
    %30 = arith.addf %14, %29 : vector<32x1xf32>
    %31 = arith.mulf %27, %27 : vector<32x512xf32>
    %cst_20 = arith.constant dense<0.000000e+00> : vector<32xf32>
    %32 = vector.multi_reduction <add>, %31, %cst_20 [1] : vector<32x512xf32> to vector<32xf32>
    %33 = vector.shape_cast %32 : vector<32xf32> to vector<32x1xf32>
    %34 = arith.addf %18, %33 : vector<32x1xf32>
    %c1_21 = arith.constant 1 : index
    %c0_22 = arith.constant 0 : index
    %c0_23 = arith.constant 0 : index
    %35 = vector.load %arg6[%c1_21, %c0_22, %c0_23] : memref<2x32x512xf32, #tpu.memory_space<vmem>>, vector<1x32x512xf32>
    %36 = vector.shape_cast %35 : vector<1x32x512xf32> to vector<32x512xf32>
    %37 = vector.shape_cast %27 : vector<32x512xf32> to vector<1x32x512xf32>
    tpu.vector_store %arg6[%c1_21, %c0_22, %c0_23], %37 {strides = array<i32>} : memref<2x32x512xf32, #tpu.memory_space<vmem>>, vector<1x32x512xf32>,
    %cst_24 = arith.constant 9.765625E-4 : f32
    %38 = vector.broadcast %cst_24 : f32 to vector<32x1xf32>
    %39 = arith.mulf %30, %38 : vector<32x1xf32>
    %cst_25 = arith.constant 9.765625E-4 : f32
    %40 = vector.broadcast %cst_25 : f32 to vector<32x1xf32>
    %41 = arith.mulf %34, %40 : vector<32x1xf32>
    %42 = arith.mulf %39, %39 : vector<32x1xf32>
    %43 = arith.subf %41, %42 : vector<32x1xf32>
    %cst_26 = arith.constant 0.000000e+00 : f32
    %44 = vector.broadcast %cst_26 : f32 to vector<32x1xf32>
    %45 = arith.maximumf %43, %44 : vector<32x1xf32>
    %cst_27 = arith.constant 9.99999974E-6 : f32
    %46 = vector.broadcast %cst_27 : f32 to vector<32x1xf32>
    %47 = arith.addf %45, %46 : vector<32x1xf32>
    %48 = math.rsqrt %47 : vector<32x1xf32>
    %49 = arith.mulf %1, %48 : vector<32x1xf32>
    %50 = arith.mulf %39, %49 : vector<32x1xf32>
    %51 = arith.subf %2, %50 : vector<32x1xf32>
    %c0_28 = arith.constant 0 : index
    %c0_29 = arith.constant 0 : index
    %52 = vector.load %arg3[%c0_28, %c0_29] : memref<256x32xbf16, #tpu.memory_space<vmem>>, vector<256x32xbf16>
    %c0_30 = arith.constant 0 : index
    %c0_31 = arith.constant 0 : index
    %53 = vector.load %arg4[%c0_30, %c0_31] : memref<256x1xf32, #tpu.memory_space<vmem>>, vector<256x1xf32>
    %c0_32 = arith.constant 0 : index
    %c0_33 = arith.constant 0 : index
    %c0_34 = arith.constant 0 : index
    %54 = vector.load %arg6[%c0_32, %c0_33, %c0_34] : memref<2x32x512xf32, #tpu.memory_space<vmem>>, vector<1x32x512xf32>
    %55 = vector.shape_cast %54 : vector<1x32x512xf32> to vector<32x512xf32>
    %56 = vector.broadcast %49 : vector<32x1xf32> to vector<32x512xf32>
    %57 = arith.mulf %55, %56 : vector<32x512xf32>
    %58 = vector.broadcast %51 : vector<32x1xf32> to vector<32x512xf32>
    %59 = arith.addf %57, %58 : vector<32x512xf32>
    %cst_35 = arith.constant 0.000000e+00 : f32
    %60 = vector.broadcast %cst_35 : f32 to vector<32x512xf32>
    %61 = arith.maximumf %59, %60 : vector<32x512xf32>
    %62 = arith.truncf %61 : vector<32x512xf32> to vector<32x512xbf16>
    %cst_36 = arith.constant dense<0.000000e+00> : vector<256x512xf32>
    %63 = tpu.matmul %52, %62, %cst_36 {dimension_numbers = #tpu.dot_dimension_numbers<[1], [0], [0], [1], [0, 0, 1, 1], [], []>} : vector<256x32xbf16>, vector<32x512xbf16>, vector<256x512xf32> -> vector<256x512xf32>
    %64 = vector.broadcast %53 : vector<256x1xf32> to vector<256x512xf32>
    %65 = arith.addf %63, %64 : vector<256x512xf32>
    %66 = arith.mulf %65, %65 : vector<256x512xf32>
    %cst_37 = arith.constant dense<0.000000e+00> : vector<512xf32>
    %67 = vector.multi_reduction <add>, %66, %cst_37 [0] : vector<256x512xf32> to vector<512xf32>
    %68 = vector.shape_cast %67 : vector<512xf32> to vector<1x512xf32>
    %69 = math.sqrt %68 : vector<1x512xf32>
    %cst_38 = arith.constant 9.99999996E-13 : f32
    %70 = vector.broadcast %cst_38 : f32 to vector<1x512xf32>
    %71 = arith.maximumf %69, %70 : vector<1x512xf32>
    %72 = vector.broadcast %71 : vector<1x512xf32> to vector<256x512xf32>
    %73 = arith.divf %65, %72 : vector<256x512xf32>
    %c0_39 = arith.constant 0 : index
    %c0_40 = arith.constant 0 : index
    %c0_41 = arith.constant 0 : index
    %74 = vector.load %arg5[%c0_39, %c0_40, %c0_41] : memref<2x256x512xf32, #tpu.memory_space<vmem>>, vector<1x256x512xf32>
    %75 = vector.shape_cast %74 : vector<1x256x512xf32> to vector<256x512xf32>
    %76 = vector.shape_cast %73 : vector<256x512xf32> to vector<1x256x512xf32>
    tpu.vector_store %arg5[%c0_39, %c0_40, %c0_41], %76 {strides = array<i32>} : memref<2x256x512xf32, #tpu.memory_space<vmem>>, vector<1x256x512xf32>,
    %c1_42 = arith.constant 1 : index
    %c0_43 = arith.constant 0 : index
    %c0_44 = arith.constant 0 : index
    %77 = vector.load %arg6[%c1_42, %c0_43, %c0_44] : memref<2x32x512xf32, #tpu.memory_space<vmem>>, vector<1x32x512xf32>
    %78 = vector.shape_cast %77 : vector<1x32x512xf32> to vector<32x512xf32>
    %79 = vector.broadcast %49 : vector<32x1xf32> to vector<32x512xf32>
    %80 = arith.mulf %78, %79 : vector<32x512xf32>
    %81 = vector.broadcast %51 : vector<32x1xf32> to vector<32x512xf32>
    %82 = arith.addf %80, %81 : vector<32x512xf32>
    %cst_45 = arith.constant 0.000000e+00 : f32
    %83 = vector.broadcast %cst_45 : f32 to vector<32x512xf32>
    %84 = arith.maximumf %82, %83 : vector<32x512xf32>
    %85 = arith.truncf %84 : vector<32x512xf32> to vector<32x512xbf16>
    %cst_46 = arith.constant dense<0.000000e+00> : vector<256x512xf32>
    %86 = tpu.matmul %52, %85, %cst_46 {dimension_numbers = #tpu.dot_dimension_numbers<[1], [0], [0], [1], [0, 0, 1, 1], [], []>} : vector<256x32xbf16>, vector<32x512xbf16>, vector<256x512xf32> -> vector<256x512xf32>
    %87 = vector.broadcast %53 : vector<256x1xf32> to vector<256x512xf32>
    %88 = arith.addf %86, %87 : vector<256x512xf32>
    %89 = arith.mulf %88, %88 : vector<256x512xf32>
    %cst_47 = arith.constant dense<0.000000e+00> : vector<512xf32>
    %90 = vector.multi_reduction <add>, %89, %cst_47 [0] : vector<256x512xf32> to vector<512xf32>
    %91 = vector.shape_cast %90 : vector<512xf32> to vector<1x512xf32>
    %92 = math.sqrt %91 : vector<1x512xf32>
    %cst_48 = arith.constant 9.99999996E-13 : f32
    %93 = vector.broadcast %cst_48 : f32 to vector<1x512xf32>
    %94 = arith.maximumf %92, %93 : vector<1x512xf32>
    %95 = vector.broadcast %94 : vector<1x512xf32> to vector<256x512xf32>
    %96 = arith.divf %88, %95 : vector<256x512xf32>
    %c1_49 = arith.constant 1 : index
    %c0_50 = arith.constant 0 : index
    %c0_51 = arith.constant 0 : index
    %97 = vector.load %arg5[%c1_49, %c0_50, %c0_51] : memref<2x256x512xf32, #tpu.memory_space<vmem>>, vector<1x256x512xf32>
    %98 = vector.shape_cast %97 : vector<1x256x512xf32> to vector<256x512xf32>
    %99 = vector.shape_cast %96 : vector<256x512xf32> to vector<1x256x512xf32>
    tpu.vector_store %arg5[%c1_49, %c0_50, %c0_51], %99 {strides = array<i32>} : memref<2x256x512xf32, #tpu.memory_space<vmem>>, vector<1x256x512xf32>,
    return
  }
}

</mosaic_0001>

<bundles_post_ra>
// kernel: projection_head_forward.1
= control target key start
LH: loop header
LB: loop body
LE: loop exit
PB: predicated region body
PF: predicated region fallthrough
CT: control target
= control target key end

     0   :  { %v7097_v3 = vmov 0   ;;  %vm83_vm0 = vcmask 261120   ;;  %s7091_s0 = inlined_call_operand.vmem [shape: f32[2,32,512], index: 0, kind: input, shape index: {}]   ;;  %s7092_s1 = inlined_call_operand.vmem [shape: bf16[32,32], index: 1, kind: input, shape index: {}]   ;;  %s7093_s2 = inlined_call_operand.vmem [shape: f32[32,3], index: 2, kind: input, shape index: {}]   ;;  %s7094_s3 = inlined_call_operand.vmem [shape: bf16[256,32], index: 3, kind: input, shape index: {}]   ;;  %s7095_s4 = inlined_call_operand.vmem [shape: f32[256,1], index: 4, kind: input, shape index: {}]   ;;  %s7096_s5 = inlined_call_operand.vmem [shape: f32[2,256,512], index: 5, kind: output, shape index: {}]  }
   0x1   :  { %v30_v0 = vld [vmem:[%s7091_s0 + $0x8] sm:$0xff]  ;;  %v32_v2 = vld [vmem:[%s7091_s0 + $0x18] sm:$0xff]  ;;  %122 = vmatprep.mubr.bf16.mxu0 %v7097_v3  ;;  %175 = vmatprep.mubr.bf16.mxu1 %v7097_v3  ;;  %v29_v6 = vld [vmem:[%s7091_s0] sm:$0xff] }
   0x2   :  { %v34_v1 = vld [vmem:[%s7091_s0 + $0x28] sm:$0xff]  ;;  %v36_v5 = vld [vmem:[%s7091_s0 + $0x38] sm:$0xff]  ;;  %v33_v7 = vld [vmem:[%s7091_s0 + $0x20] sm:$0xff]  ;;  %3231 = vset.pattern.permute.xlu0 %v7097_v3  ;;  %3232 = vset.pattern.permute.xlu1 %v7097_v3 }
   0x3   :  { %v46_v4 = vpack.c.bf16 %v34_v1, %v30_v0  ;;  %v48_v8 = vpack.c.bf16 %v36_v5, %v32_v2  ;;  %v45_v9 = vpack.c.bf16 %v33_v7, %v29_v6  ;;  %v31_v10 = vld [vmem:[%s7091_s0 + $0x10] sm:$0xff]  ;;  %v38_v12 = vld [vmem:[%s7091_s0 + $0x48] sm:$0xff]  ;;  %v40_v15 = vld [vmem:[%s7091_s0 + $0x58] sm:$0xff] }
   0x4   :  { %v35_v11 = vld [vmem:[%s7091_s0 + $0x30] sm:$0xff]  ;;  %v42_v14 = vld [vmem:[%s7091_s0 + $0x68] sm:$0xff]  ;;  %v44_v16 = vld [vmem:[%s7091_s0 + $0x78] sm:$0xff] }
   0x5   :  { %90 = vmatprep.subr.bf16.mxu0 %v46_v4  ;;  %v47_v13 = vpack.c.bf16 %v35_v11, %v31_v10  ;;  %143 = vmatprep.subr.bf16.mxu1 %v48_v8  ;;  %v50_v17 = vpack.c.bf16 %v42_v14, %v38_v12  ;;  %v52_v18 = vpack.c.bf16 %v44_v16, %v40_v15  ;;  %v37_v19 = vld [vmem:[%s7091_s0 + $0x40] sm:$0xff]  ;;  %v39_v21 = vld [vmem:[%s7091_s0 + $0x50] sm:$0xff]  ;;  %v3000_v26 = vld [vmem:[%s7091_s0 + $0x88] sm:$0xff] }
   0x6   :  { %91 = vmatpush1.bf16.msra.mxu0 %v45_v9  ;;  %v41_v20 = vld [vmem:[%s7091_s0 + $0x60] sm:$0xff]  ;;  %v43_v23 = vld [vmem:[%s7091_s0 + $0x70] sm:$0xff]  ;;  %v3004_v27 = vld [vmem:[%s7091_s0 + $0xa8] sm:$0xff] }
   0x7   :  { %144 = vmatpush1.bf16.msra.mxu1 %v47_v13  ;;  %v49_v22 = vpack.c.bf16 %v41_v20, %v37_v19  ;;  %92 = vmatprep.subr.bf16.mxu0 %v50_v17  ;;  %v51_v24 = vpack.c.bf16 %v43_v23, %v39_v21  ;;  %v3239_v25 = vld [vmem:[%s7092_s1] sm:$0xff]   ;;  %v294_v28 = vpack.c.bf16 %v3004_v27, %v3000_v26  ;;  %v3002_v31 = vld [vmem:[%s7091_s0 + $0x98] sm:$0xff]  ;;  %v3001_v34 = vld [vmem:[%s7091_s0 + $0x90] sm:$0xff] }
   0x8   :  { %145 = vmatprep.subr.bf16.mxu1 %v52_v18  ;;  %v2999_v29 = vld [vmem:[%s7091_s0 + $0x80] sm:$0xff]  ;;  %v3006_v33 = vld [vmem:[%s7091_s0 + $0xb8] sm:$0xff]  ;;  %v3005_v35 = vld [vmem:[%s7091_s0 + $0xb0] sm:$0xff] }
   0x9   :  { %v3003_v30 = vld [vmem:[%s7091_s0 + $0xa0] sm:$0xff]  ;;  %v296_v36 = vpack.c.bf16 %v3006_v33, %v3002_v31  ;;  %v3008_v37 = vld [vmem:[%s7091_s0 + $0xc8] sm:$0xff]  ;;  %v3010_v39 = vld [vmem:[%s7091_s0 + $0xd8] sm:$0xff]  ;;  %v295_v40 = vpack.c.bf16 %v3005_v35, %v3001_v34 }
   0xa   :  { %93 = vmatpush1.bf16.msra.mxu0 %v49_v22  ;;  %v293_v32 = vpack.c.bf16 %v3003_v30, %v2999_v29  ;;  %v3012_v38 = vld [vmem:[%s7091_s0 + $0xe8] sm:$0xff]  ;;  %v3014_v42 = vld [vmem:[%s7091_s0 + $0xf8] sm:$0xff]  ;;  %v3007_v43 = vld [vmem:[%s7091_s0 + $0xc0] sm:$0xff] }
   0xb   :  { %146 = vmatpush1.bf16.msra.mxu1 %v51_v24  ;;  %301 = vmatprep.subr.bf16.mxu0 %v294_v28  ;;  %v298_v41 = vpack.c.bf16 %v3012_v38, %v3008_v37  ;;  %v3011_v44 = vld [vmem:[%s7091_s0 + $0xe0] sm:$0xff]  ;;  %v300_v45 = vpack.c.bf16 %v3014_v42, %v3010_v39  ;;  %v3009_v46 = vld [vmem:[%s7091_s0 + $0xd0] sm:$0xff]  ;;  %v3240_v51 = vld [vmem:[%s7092_s1 + $0x8] sm:$0xff]   ;;  %s3299_s1 = smov 1  }
   0xc   :  { %v3013_v47 = vld [vmem:[%s7091_s0 + $0xf0] sm:$0xff]  ;;  %v3440_v48 = vld [vmem:[%s7093_s2] sm:$0xff]  ;;  %v297_v49 = vpack.c.bf16 %v3011_v44, %v3007_v43  ;;  %354 = vmatprep.subr.bf16.mxu1 %v296_v36  ;;  %v3456_v53 = vld [vmem:[%s7093_s2 + $0x8] sm:$0xff] }
   0xd   :  { %2995 = vmatmul.mubr.msk.bf16.vlgmr.msra.gmra.mrb[0].mxu0 %vm83_vm0, %v3239_v25  ;;  %v3446_v50 = vld [vmem:[%s7093_s2 + $0x10] sm:$0xff]  ;;  %v299_v52 = vpack.c.bf16 %v3013_v47, %v3009_v46  ;;  %55 = vperm.xlu0 %3231, %v3440_v48   ;;  %v3462_v54 = vld [vmem:[%s7093_s2 + $0x18] sm:$0xff] }
   0xe   :  { %2997 = vmatmul.mubr.msk.bf16.vlgmr.msra.gmra.mrb[0].mxu1 %vm83_vm0, %v3239_v25  ;;  %132 = vmatprep.mubr.bf16.mxu0 %v7097_v3 }
   0xf   :  { %185 = vmatprep.mubr.bf16.mxu1 %v7097_v3  ;;  %302 = vmatpush1.bf16.msra.mxu0 %v293_v32 }
  0x10   :  { %303 = vmatprep.subr.bf16.mxu0 %v298_v41  ;;  %355 = vmatpush1.bf16.msra.mxu1 %v295_v40 }
  0x11   :  { %356 = vmatprep.subr.bf16.mxu1 %v300_v45  ;;  %65 = vperm.xlu1 %3232, %v3446_v50  }
  0x12   :  { %60 = vperm.xlu0 %3231, %v3456_v53  }
  0x13   :  { %304 = vmatpush1.bf16.msra.mxu0 %v297_v49 }
  0x14   :  { %357 = vmatpush1.bf16.msra.mxu1 %v299_v52 }
  0x15   :  { %2996 = vmatmul.mubr.msk.bf16.gmra.mrb[4].mxu0 %vm83_vm0, %v3240_v51  ;;  %70 = vperm.xlu1 %3232, %v3462_v54  }
  0x16   :  { %2998 = vmatmul.mubr.msk.bf16.gmra.mrb[4].mxu1 %vm83_vm0, %v3240_v51  ;;  %333 = vmatprep.mubr.bf16.mxu0 %v7097_v3 }
  0x17   :  { %386 = vmatprep.mubr.bf16.mxu1 %v7097_v3 }
  0x1d   :  { %3015 = vmatmul.mubr.msk.bf16.vlgmr.msra.gmra.mrb[8].mxu0 %vm83_vm0, %v3239_v25 }
  0x1e   :  { %3017 = vmatmul.mubr.msk.bf16.vlgmr.msra.gmra.mrb[8].mxu1 %vm83_vm0, %v3239_v25  ;;  %343 = vmatprep.mubr.bf16.mxu0 %v7097_v3 }
  0x1f   :  { %396 = vmatprep.mubr.bf16.mxu1 %v7097_v3 }
  0x25   :  { %3016 = vmatmul.mubr.msk.bf16.gmra.mrb[12].mxu0 %vm83_vm0, %v3240_v51 }
  0x26   :  { %3018 = vmatmul.mubr.msk.bf16.gmra.mrb[12].mxu1 %vm83_vm0, %v3240_v51  ;;  %1040 = vmatprep.mubr.bf16.mxu0 %v7097_v3 }
  0x27   :  { %1233 = vmatprep.mubr.bf16.mxu1 %v7097_v3 }
  0x8c   :  { %v3477_v55 = vpop.permute.xlu0 %55 }
  0x90   :  { %v3479_v56 = vpop.permute.xlu1 %65 }
  0x91   :  { %v3481_v58 = vpop.permute.xlu0 %60 }
  0x94   :  { %v3519_v19 = vpop.permute.xlu1 %70 }
  0xe0   :  { %v124_v57 = vpop.f32.mrb[0].mxu0 }
  0xe1   :  { %v3484_v59 = vadd.f32 %v124_v57, %v3477_v55  ;;  %v177_v60 = vpop.f32.mrb[0].mxu1  ;;  %v126_v61 = vpop.f32.mrb[1].mxu0 }
  0xe2   :  { %v3487_v62 = vadd.f32 %v126_v61, %v3477_v55  ;;  %v179_v63 = vpop.f32.mrb[1].mxu1  ;;  %v128_v0 = vpop.f32.mrb[2].mxu0  ;;  %v3495_v6 = vadd.f32 %v177_v60, %v3477_v55 }
  0xe3   :  { %v220_v1 = vmul.f32 %v3484_v59, %v3484_v59  ;;  %v3492_v2 = vadd.f32 %v128_v0, %v3481_v58  ;;  %v181_v4 = vpop.f32.mrb[2].mxu1  ;;  %v130_v5 = vpop.f32.mrb[3].mxu0  ;;  %v3507_v12 = vadd.f32 %v179_v63, %v3477_v55 }
  0xe4   :  { %v196_v7 = vadd.f32 %v3487_v62, %v3484_v59  ;;  %v221_v8 = vmul.f32 %v3487_v62, %v3487_v62  ;;  %v183_v9 = vpop.f32.mrb[3].mxu1  ;;  %v3504_v11 = vadd.f32 %v130_v5, %v3481_v58  ;;  %v3511_v15 = vadd.f32 %v181_v4, %v3481_v58 }
  0xe5   :  { %v224_v10 = vmul.f32 %v3492_v2, %v3492_v2  ;;  %v222_v18 = vmul.f32 %v3495_v6, %v3495_v6  ;;  %v3523_v22 = vadd.f32 %v183_v9, %v3481_v58  ;;  %v223_v42 = vmul.f32 %v3507_v12, %v3507_v12 }
  0xe6   :  { %v197_v13 = vadd.f32 %v196_v7, %v3495_v6  ;;  %v236_v14 = vadd.f32 %v221_v8, %v220_v1  ;;  %v201_v16 = vadd.f32 %v3504_v11, %v3492_v2  ;;  %v225_v17 = vmul.f32 %v3504_v11, %v3504_v11 }
  0xe7   :  { %v226_v32 = vmul.f32 %v3511_v15, %v3511_v15  ;;  %v227_v44 = vmul.f32 %v3523_v22, %v3523_v22 }
  0xe8   :  { %v134_v20 = vpop.f32.mrb[4].mxu0  ;;  %v198_v21 = vadd.f32 %v197_v13, %v3507_v12  ;;  %v202_v26 = vadd.f32 %v201_v16, %v3511_v15  ;;  %v241_v27 = vadd.f32 %v225_v17, %v224_v10  ;;  %v237_v31 = vadd.f32 %v236_v14, %v222_v18 }
  0xe9   :  { %v3526_v23 = vadd.f32 %v134_v20, %v3479_v56  ;;  %v187_v24 = vpop.f32.mrb[4].mxu1  ;;  %v136_v25 = vpop.f32.mrb[5].mxu0 }
  0xea   :  { %v3530_v28 = vadd.f32 %v136_v25, %v3479_v56  ;;  %v189_v29 = vpop.f32.mrb[5].mxu1  ;;  %v138_v30 = vpop.f32.mrb[6].mxu0  ;;  %199 = vadd.xlane.f32.xlu0 %v198_v21  ;;  %v203_v37 = vadd.f32 %v202_v26, %v3523_v22  ;;  %v3541_v38 = vadd.f32 %v187_v24, %v3479_v56  ;;  %v242_v45 = vadd.f32 %v241_v27, %v226_v32 }
  0xeb   :  { %v228_v33 = vmul.f32 %v3526_v23, %v3526_v23  ;;  %v3537_v34 = vadd.f32 %v138_v30, %v3519_v19  ;;  %v191_v35 = vpop.f32.mrb[6].mxu1  ;;  %v140_v36 = vpop.f32.mrb[7].mxu0  ;;  %v238_v49 = vadd.f32 %v237_v31, %v223_v42  ;;  %v3567_v0 = vadd.f32 %v189_v29, %v3479_v56 }
  0xec   :  { %v206_v39 = vadd.f32 %v3530_v28, %v3526_v23  ;;  %v229_v40 = vmul.f32 %v3530_v28, %v3530_v28  ;;  %v193_v41 = vpop.f32.mrb[7].mxu1  ;;  %v3550_v43 = vadd.f32 %v140_v36, %v3519_v19  ;;  %204 = vadd.xlane.f32.xlu1 %v203_v37  ;;  %v3557_v47 = vadd.f32 %v191_v35, %v3519_v19 }
  0xed   :  { %v232_v46 = vmul.f32 %v3537_v34, %v3537_v34  ;;  %v243_v60 = vadd.f32 %v242_v45, %v227_v44  ;;  %v230_v63 = vmul.f32 %v3541_v38, %v3541_v38  ;;  %v3570_v4 = vadd.f32 %v193_v41, %v3519_v19 }
  0xee   :  { %v207_v51 = vadd.f32 %v206_v39, %v3541_v38  ;;  %v211_v52 = vadd.f32 %v3550_v43, %v3537_v34  ;;  %v233_v57 = vmul.f32 %v3550_v43, %v3550_v43  ;;  %v246_v61 = vadd.f32 %v229_v40, %v228_v33 }
  0xef   :  { %244 = vadd.xlane.f32.xlu0 %v243_v60  ;;  %v234_v29 = vmul.f32 %v3557_v47, %v3557_v47  ;;  %v231_v36 = vmul.f32 %v3567_v0, %v3567_v0  ;;  %v235_v39 = vmul.f32 %v3570_v4, %v3570_v4 }
  0xf0   :  { %v335_v1 = vpop.f32.mrb[8].mxu0  ;;  %239 = vadd.xlane.f32.xlu1 %v238_v49  ;;  %v212_v9 = vadd.f32 %v211_v52, %v3557_v47  ;;  %v208_v17 = vadd.f32 %v207_v51, %v3567_v0  ;;  %v251_v18 = vadd.f32 %v233_v57, %v232_v46  ;;  %v247_v27 = vadd.f32 %v246_v61, %v230_v63 }
  0xf1   :  { %v3573_v5 = vadd.f32 %v335_v1, %v3477_v55  ;;  %v388_v7 = vpop.f32.mrb[8].mxu1  ;;  %v337_v8 = vpop.f32.mrb[9].mxu0 }
  0xf2   :  { %v3577_v10 = vadd.f32 %v388_v7, %v3477_v55  ;;  %v3580_v13 = vadd.f32 %v337_v8, %v3477_v55  ;;  %v390_v14 = vpop.f32.mrb[9].mxu1  ;;  %v339_v16 = vpop.f32.mrb[10].mxu0  ;;  %v213_v26 = vadd.f32 %v212_v9, %v3570_v4  ;;  %v252_v40 = vadd.f32 %v251_v18, %v234_v29 }
  0xf3   :  { %v431_v20 = vmul.f32 %v3573_v5, %v3573_v5  ;;  %v3586_v21 = vadd.f32 %v339_v16, %v3481_v58  ;;  %v392_v24 = vpop.f32.mrb[10].mxu1  ;;  %v341_v25 = vpop.f32.mrb[11].mxu0  ;;  %v3596_v32 = vadd.f32 %v390_v14, %v3477_v55  ;;  %v248_v45 = vadd.f32 %v247_v27, %v231_v36 }
  0xf4   :  { %v407_v30 = vadd.f32 %v3580_v13, %v3573_v5  ;;  %v432_v31 = vmul.f32 %v3580_v13, %v3580_v13  ;;  %v394_v33 = vpop.f32.mrb[11].mxu1  ;;  %v3599_v35 = vadd.f32 %v341_v25, %v3481_v58  ;;  %209 = vadd.xlane.f32.xlu1 %v208_v17  ;;  %214 = vadd.xlane.f32.xlu0 %v213_v26 }
  0xf5   :  { %v433_v37 = vmul.f32 %v3577_v10, %v3577_v10  ;;  %v435_v55 = vmul.f32 %v3586_v21, %v3586_v21  ;;  %v253_v49 = vadd.f32 %v252_v40, %v235_v39  ;;  %v434_v51 = vmul.f32 %v3596_v32, %v3596_v32 }
  0xf6   :  { %v447_v41 = vadd.f32 %v432_v31, %v431_v20  ;;  %v412_v42 = vadd.f32 %v3599_v35, %v3586_v21  ;;  %v436_v44 = vmul.f32 %v3599_v35, %v3599_v35  ;;  %v408_v57 = vadd.f32 %v407_v30, %v3577_v10 }
  0xf7   :  { %v3617_v60 = vadd.f32 %v392_v24, %v3481_v58 }
  0xf8   :  { %v345_v46 = vpop.f32.mrb[12].mxu0  ;;  %v448_v52 = vadd.f32 %v447_v41, %v433_v37  ;;  %249 = vadd.xlane.f32.xlu1 %v248_v45  ;;  %254 = vadd.xlane.f32.xlu0 %v253_v49  ;;  %v452_v26 = vadd.f32 %v436_v44, %v435_v55  ;;  %v409_v31 = vadd.f32 %v408_v57, %v3596_v32 }
  0xf9   :  { %v3620_v61 = vadd.f32 %v345_v46, %v3479_v56  ;;  %v398_v63 = vpop.f32.mrb[12].mxu1  ;;  %v347_v1 = vpop.f32.mrb[13].mxu0  ;;  %v413_v25 = vadd.f32 %v412_v42, %v3617_v60  ;;  %v437_v36 = vmul.f32 %v3617_v60, %v3617_v60  ;;  %v3642_v37 = vadd.f32 %v394_v33, %v3481_v58 }
  0xfa   :  { %v3623_v7 = vadd.f32 %v398_v63, %v3479_v56  ;;  %v3626_v8 = vadd.f32 %v347_v1, %v3479_v56  ;;  %v400_v9 = vpop.f32.mrb[13].mxu1  ;;  %v349_v14 = vpop.f32.mrb[14].mxu0  ;;  %v449_v16 = vadd.f32 %v448_v52, %v434_v51 }
  0xfb   :  { %v439_v17 = vmul.f32 %v3620_v61, %v3620_v61  ;;  %v3631_v18 = vadd.f32 %v349_v14, %v3519_v19  ;;  %v402_v20 = vpop.f32.mrb[14].mxu1  ;;  %v351_v24 = vpop.f32.mrb[15].mxu0  ;;  %v3650_v41 = vadd.f32 %v400_v9, %v3479_v56  ;;  %v414_v58 = vadd.f32 %v413_v25, %v3642_v37 }
  0xfc   :  { %v417_v27 = vadd.f32 %v3626_v8, %v3620_v61  ;;  %v440_v29 = vmul.f32 %v3626_v8, %v3626_v8  ;;  %v404_v30 = vpop.f32.mrb[15].mxu1  ;;  %v3645_v39 = vadd.f32 %v351_v24, %v3519_v19  ;;  %450 = vadd.xlane.f32.xlu1 %v449_v16  ;;  %v441_v40 = vmul.f32 %v3623_v7, %v3623_v7 }
  0xfd   :  { %7340 = vst [vmem:[#allocation3_spill] sm:$0xff] %v3631_v18  ;;  %410 = vadd.xlane.f32.xlu0 %v409_v31  ;;  %v443_v44 = vmul.f32 %v3631_v18, %v3631_v18  ;;  %v453_v33 = vadd.f32 %v452_v26, %v437_v36  ;;  %v3662_v51 = vadd.f32 %v402_v20, %v3519_v19 }
  0xfe   :  { %v418_v55 = vadd.f32 %v417_v27, %v3623_v7  ;;  %v457_v42 = vadd.f32 %v440_v29, %v439_v17  ;;  %v422_v45 = vadd.f32 %v3645_v39, %v3631_v18  ;;  %v444_v46 = vmul.f32 %v3645_v39, %v3645_v39 }
  0xff   :  { %7341 = vst [vmem:[#allocation4_spill] sm:$0xff] %v3662_v51  ;;  %v438_v52 = vmul.f32 %v3642_v37, %v3642_v37  ;;  %v442_v57 = vmul.f32 %v3650_v41, %v3650_v41  ;;  %v445_v16 = vmul.f32 %v3662_v51, %v3662_v51  ;;  %v3672_v17 = vadd.f32 %v404_v30, %v3519_v19 }
 0x100   :  { %v419_v49 = vadd.f32 %v418_v55, %v3650_v41  ;;  %v458_v56 = vadd.f32 %v457_v42, %v441_v40  ;;  %v423_v9 = vadd.f32 %v422_v45, %v3662_v51  ;;  %v462_v14 = vadd.f32 %v444_v46, %v443_v44 }
 0x101   :  { %415 = vadd.xlane.f32.xlu0 %v414_v58  ;;  %v454_v63 = vadd.f32 %v453_v33, %v438_v52  ;;  %v446_v25 = vmul.f32 %v3672_v17, %v3672_v17  ;;  %v3298_v27 = vmov 1  }
 0x102   :  { %420 = vadd.xlane.f32.xlu1 %v419_v49  ;;  %v459_v1 = vadd.f32 %v458_v56, %v442_v57  ;;  %v424_v20 = vadd.f32 %v423_v9, %v3672_v17  ;;  %v463_v24 = vadd.f32 %v462_v14, %v445_v16  ;;  %3233 = vset.pattern.permute.xlu0 %v3298_v27 }
 0x103   :  { %3234 = vset.pattern.permute.xlu1 %v3298_v27 }
 0x104   :  { %v464_v26 = vadd.f32 %v463_v24, %v446_v25 }
 0x105   :  { %455 = vadd.xlane.f32.xlu0 %v454_v63 }
 0x106   :  { %460 = vadd.xlane.f32.xlu1 %v459_v1 }
 0x109   :  { %425 = vadd.xlane.f32.xlu0 %v424_v20 }
 0x10d   :  { %465 = vadd.xlane.f32.xlu0 %v464_v26 }
 0x177   :  { %v200_v29 = vpop.xlane.xlu0 %199 }
 0x179   :  { %v205_v31 = vpop.xlane.xlu1 %204 }
 0x17c   :  { %v245_v36 = vpop.xlane.xlu0 %244 }
 0x17d   :  { %v240_v40 = vpop.xlane.xlu1 %239 }
 0x181   :  { %v210_v19 = vpop.xlane.xlu1 %209  ;;  %v215_v30 = vpop.xlane.xlu0 %214 }
 0x185   :  { %v250_v55 = vpop.xlane.xlu1 %249  ;;  %v255_v42 = vpop.xlane.xlu0 %254 }
 0x189   :  { %v451_v44 = vpop.xlane.xlu1 %450 }
 0x18a   :  { %v411_v58 = vpop.xlane.xlu0 %410  ;;  %v467_v33 = vadd.f32 %v451_v44, %v240_v40 }
 0x18b   :  { %v427_v45 = vadd.f32 %v411_v58, %v200_v29 }
 0x18c   :  { %v492_v52 = vmul.f32 0.0009765625, %v467_v33 }
 0x18d   :  { %v488_v46 = vmul.f32 0.0009765625, %v427_v45 }
 0x18e   :  { %v416_v49 = vpop.xlane.xlu0 %415 }
 0x18f   :  { %v421_v56 = vpop.xlane.xlu1 %420  ;;  %v496_v57 = vmul.f32 %v488_v46, %v488_v46  ;;  %v428_v63 = vadd.f32 %v416_v49, %v205_v31 }
 0x190   :  { %v429_v1 = vadd.f32 %v421_v56, %v210_v19 }
 0x191   :  { %v500_v9 = vsub.f32 %v492_v52, %v496_v57  ;;  %v489_v14 = vmul.f32 0.0009765625, %v428_v63 }
 0x192   :  { %v490_v16 = vmul.f32 0.0009765625, %v429_v1  ;;  %v456_v20 = vpop.xlane.xlu0 %455 }
 0x193   :  { %v461_v24 = vpop.xlane.xlu1 %460  ;;  %v504_v25 = vmax.f32 %v500_v9, 0.0  ;;  %v468_v26 = vadd.f32 %v456_v20, %v245_v36  ;;  %v497_v51 = vmul.f32 %v489_v14, %v489_v14 }
 0x194   :  { %v469_v27 = vadd.f32 %v461_v24, %v250_v55  ;;  %v498_v40 = vmul.f32 %v490_v16, %v490_v16 }
 0x195   :  { %v508_v3 = vadd.f32 1e-05, %v504_v25  ;;  %v493_v18 = vmul.f32 0.0009765625, %v468_v26 }
 0x196   :  { %v494_v29 = vmul.f32 0.0009765625, %v469_v27  ;;  %v426_v44 = vpop.xlane.xlu0 %425 }
 0x197   :  { %3257 = vrsqrt.f32 %v508_v3  ;;  %v501_v58 = vsub.f32 %v493_v18, %v497_v51  ;;  %v430_v33 = vadd.f32 %v426_v44, %v215_v30 }
 0x198   :  { %v502_v45 = vsub.f32 %v494_v29, %v498_v40 }
 0x199   :  { %v505_v31 = vmax.f32 %v501_v58, 0.0  ;;  %v491_v19 = vmul.f32 0.0009765625, %v430_v33 }
 0x19a   :  { %v506_v49 = vmax.f32 %v502_v45, 0.0  ;;  %v466_v56 = vpop.xlane.xlu0 %465 }
 0x19b   :  { %v509_v52 = vadd.f32 1e-05, %v505_v31  ;;  %v470_v57 = vadd.f32 %v466_v56, %v255_v42  ;;  %v499_v36 = vmul.f32 %v491_v19, %v491_v19  ;;  %v7342_v56 = vmov 0  }
 0x19c   :  { %v510_v63 = vadd.f32 1e-05, %v506_v49 }
 0x19d   :  { %3259 = vrsqrt.f32 %v509_v52  ;;  %v495_v55 = vmul.f32 0.0009765625, %v470_v57 }
 0x19e   :  { %3261 = vrsqrt.f32 %v510_v63  ;;  %v580_v63 = vld [vmem:[%s7095_s4 + $0x20] sm:$0xff] }
 0x19f   :  { %v503_v1 = vsub.f32 %v495_v55, %v499_v36  ;;  %v581_v36 = vld [vmem:[%s7095_s4 + $0x28] sm:$0xff] }
 0x1a1   :  { %v3258_v9 = vpop.eup %3257  ;;  %v507_v20 = vmax.f32 %v503_v1, 0.0 }
 0x1a2   :  { %v516_v24 = vmul.f32 %v3258_v9, %v3440_v48 }
 0x1a3   :  { %v511_v3 = vadd.f32 1e-05, %v507_v20 }
 0x1a4   :  { %v520_v18 = vmul.f32 %v516_v24, %v488_v46  ;;  %v3300_v46 = vmov 2  }
 0x1a5   :  { %3263 = vrsqrt.f32 %v511_v3 }
 0x1a6   :  { %528 = vrot.lane.b32.xlu1 %v520_v18, %s3299_s1 }
 0x1a7   :  { %v3260_v51 = vpop.eup %3259 }
 0x1a8   :  { %v3262_v30 = vpop.eup %3261  ;;  %v517_v25 = vmul.f32 %v3260_v51, %v3456_v53 }
 0x1a9   :  { %v518_v42 = vmul.f32 %v3262_v30, %v3446_v50 }
 0x1aa   :  { %v521_v26 = vmul.f32 %v517_v25, %v489_v14 }
 0x1ab   :  { %v522_v27 = vmul.f32 %v518_v42, %v490_v16 }
 0x1ac   :  { %530 = vrot.lane.b32.xlu0 %v521_v26, %s3299_s1 }
 0x1ad   :  { %532 = vrot.lane.b32.xlu1 %v522_v27, %s3299_s1 }
 0x1af   :  { %v3264_v40 = vpop.eup %3263 }
 0x1b0   :  { %626 = vperm.xlu0 %3233, %v516_v24   ;;  %v519_v29 = vmul.f32 %v3264_v40, %v3462_v54 }
 0x1b2   :  { %v523_v44 = vmul.f32 %v519_v29, %v491_v19 }
 0x1b4   :  { %534 = vrot.lane.b32.xlu1 %v523_v44, %s3299_s1  ;;  %3236 = vset.pattern.permute.xlu0 %v3300_v46 }
 0x1b8   :  { %631 = vperm.xlu1 %3234, %v517_v25  }
 0x1bc   :  { %636 = vperm.xlu1 %3234, %v518_v42  }
 0x1c0   :  { %641 = vperm.xlu1 %3234, %v519_v29  }
 0x1c4   :  { %3235 = vset.pattern.permute.xlu1 %v3300_v46  ;;  %v7343_v46 = vld [vmem:[#allocation3_spill] sm:$0xff] }
 0x218   :  { %v529_v58 = vpop.permute.xlu1 %528 }
 0x219   :  { %v540_v33 = vsub.f32 %v3440_v48, %v529_v58  ;;  %v577_v48 = vld [vmem:[%s7095_s4 + $0x8] sm:$0xff] }
 0x21b   :  { %662 = vperm.xlu1 %3235, %v540_v33   ;;  %v7344_v33 = vld [vmem:[#allocation4_spill] sm:$0xff] }
 0x21e   :  { %v531_v14 = vpop.permute.xlu0 %530 }
 0x21f   :  { %v541_v16 = vsub.f32 %v3456_v53, %v531_v14  ;;  %v533_v45 = vpop.permute.xlu1 %532  ;;  %v576_v53 = vld [vmem:[%s7095_s4] sm:$0xff] }
 0x220   :  { %v542_v31 = vsub.f32 %v3446_v50, %v533_v45  ;;  %v578_v50 = vld [vmem:[%s7095_s4 + $0x10] sm:$0xff] }
 0x221   :  { %667 = vperm.xlu0 %3236, %v541_v16  }
 0x225   :  { %672 = vperm.xlu0 %3236, %v542_v31  }
 0x226   :  { %v535_v19 = vpop.permute.xlu1 %534 }
 0x227   :  { %v543_v49 = vsub.f32 %v3462_v54, %v535_v19  ;;  %v579_v54 = vld [vmem:[%s7095_s4 + $0x18] sm:$0xff] }
 0x229   :  { %677 = vperm.xlu1 %3235, %v543_v49   ;;  %3237 = vset.pattern.permute.xlu0 %v7342_v56 }
 0x22a   :  { %722 = vperm.xlu0 %3237, %v576_v53  }
 0x22d   :  { %3238 = vset.pattern.permute.xlu1 %v7342_v56 }
 0x22e   :  { %727 = vperm.xlu1 %3238, %v577_v48   ;;  %737 = vperm.xlu0 %3237, %v579_v54  }
 0x22f   :  { %v627_v55 = vpop.permute.xlu0 %626 }
 0x230   :  { %v645_v9 = vmul.f32 %v627_v55, %v3487_v62  ;;  %v647_v20 = vmul.f32 %v627_v55, %v3507_v12  ;;  %v644_v24 = vmul.f32 %v627_v55, %v3484_v59  ;;  %v646_v3 = vmul.f32 %v627_v55, %v3495_v6 }
 0x231   :  { %v1979_v18 = vmul.f32 %v627_v55, %v3580_v13  ;;  %v1981_v30 = vmul.f32 %v627_v55, %v3596_v32  ;;  %v3713_v25 = vmul.f32 %v627_v55, %v3573_v5  ;;  %v3716_v42 = vmul.f32 %v627_v55, %v3577_v10 }
 0x232   :  { %732 = vperm.xlu1 %3238, %v578_v50   ;;  %747 = vperm.xlu0 %3237, %v581_v36   ;;  %v585_v50 = vld [vmem:[%s7095_s4 + $0x48] sm:$0xff] }
 0x236   :  { %742 = vperm.xlu1 %3238, %v580_v63  }
 0x237   :  { %v632_v52 = vpop.permute.xlu1 %631 }
 0x238   :  { %v649_v51 = vmul.f32 %v632_v52, %v3504_v11  ;;  %v651_v62 = vmul.f32 %v632_v52, %v3523_v22  ;;  %v648_v12 = vmul.f32 %v632_v52, %v3492_v2  ;;  %v650_v59 = vmul.f32 %v632_v52, %v3511_v15  ;;  %v582_v22 = vld [vmem:[%s7095_s4 + $0x30] sm:$0xff]  ;;  %v583_v2 = vld [vmem:[%s7095_s4 + $0x38] sm:$0xff] }
 0x239   :  { %v1983_v6 = vmul.f32 %v632_v52, %v3599_v35  ;;  %v1985_v13 = vmul.f32 %v632_v52, %v3642_v37  ;;  %v1982_v5 = vmul.f32 %v632_v52, %v3586_v21  ;;  %v3728_v32 = vmul.f32 %v632_v52, %v3617_v60  ;;  %757 = vperm.xlu0 %3237, %v583_v2  }
 0x23a   :  { %752 = vperm.xlu1 %3238, %v582_v22  }
 0x23b   :  { %v637_v57 = vpop.permute.xlu1 %636 }
 0x23c   :  { %v653_v11 = vmul.f32 %v637_v57, %v3530_v28  ;;  %v655_v15 = vmul.f32 %v637_v57, %v3567_v0  ;;  %v652_v10 = vmul.f32 %v637_v57, %v3526_v23  ;;  %v654_v28 = vmul.f32 %v637_v57, %v3541_v38 }
 0x23d   :  { %v3740_v35 = vmul.f32 %v637_v57, %v3626_v8  ;;  %v3744_v60 = vmul.f32 %v637_v57, %v3650_v41  ;;  %v3747_v37 = vmul.f32 %v637_v57, %v3620_v61  ;;  %v3750_v27 = vmul.f32 %v637_v57, %v3623_v7  ;;  %767 = vperm.xlu0 %3237, %v585_v50  }
 0x23f   :  { %v642_v1 = vpop.permute.xlu1 %641 }
 0x240   :  { %v657_v21 = vmul.f32 %v642_v1, %v3550_v43  ;;  %v659_v43 = vmul.f32 %v642_v1, %v3570_v4  ;;  %v656_v41 = vmul.f32 %v642_v1, %v3537_v34  ;;  %v658_v40 = vmul.f32 %v642_v1, %v3557_v47 }
 0x241   :  { %v1991_v61 = vmul.f32 %v642_v1, %v3645_v39  ;;  %v1993_v44 = vmul.f32 %v642_v1, %v3672_v17  ;;  %v3765_v58 = vmul.f32 %v642_v1, %v7343_v46  ;;  %v3768_v14 = vmul.f32 %v642_v1, %v7344_v33  ;;  %v584_v17 = vld [vmem:[%s7095_s4 + $0x40] sm:$0xff] }
 0x242   :  { %762 = vperm.xlu1 %3238, %v584_v17  }
 0x29a   :  { %v3722_v26 = vpop.permute.xlu1 %662 }
 0x29b   :  { %v681_v23 = vadd.f32 %v3722_v26, %v645_v9  ;;  %v683_v38 = vadd.f32 %v3722_v26, %v647_v20  ;;  %v680_v0 = vadd.f32 %v3722_v26, %v644_v24  ;;  %v682_v8 = vadd.f32 %v3722_v26, %v646_v3 }
 0x29c   :  { %v3761_v7 = vadd.f32 %v1979_v18, %v3722_v26  ;;  %v1997_v63 = vadd.f32 %v1981_v30, %v3722_v26  ;;  %v1994_v30 = vadd.f32 %v3713_v25, %v3722_v26 }
 0x29d   :  { %v697_v31 = vmax.f32 %v681_v23, 0.0  ;;  %v699_v47 = vmax.f32 %v683_v38, 0.0  ;;  %v696_v19 = vmax.f32 %v680_v0, 0.0  ;;  %v698_v39 = vmax.f32 %v682_v8, 0.0 }
 0x2a0   :  { %v668_v29 = vpop.permute.xlu0 %667 }
 0x2a1   :  { %v685_v16 = vadd.f32 %v668_v29, %v649_v51  ;;  %v687_v4 = vadd.f32 %v668_v29, %v651_v62  ;;  %v684_v45 = vadd.f32 %v668_v29, %v648_v12  ;;  %v686_v34 = vadd.f32 %v668_v29, %v650_v59 }
 0x2a2   :  { %v1999_v57 = vadd.f32 %v1983_v6, %v668_v29  ;;  %v2001_v36 = vadd.f32 %v1985_v13, %v668_v29  ;;  %v2011_v62 = vmax.f32 %v3761_v7, 0.0  ;;  %v1998_v12 = vadd.f32 %v1982_v5, %v668_v29 }
 0x2a3   :  { %v701_v49 = vmax.f32 %v685_v16, 0.0  ;;  %v703_v48 = vmax.f32 %v687_v4, 0.0  ;;  %v700_v52 = vmax.f32 %v684_v45, 0.0  ;;  %v702_v53 = vmax.f32 %v686_v34, 0.0 }
 0x2a4   :  { %v3776_v54 = vpop.permute.xlu0 %672  ;;  %v1996_v59 = vadd.f32 %v3716_v42, %v3722_v26  ;;  %v2015_v13 = vmax.f32 %v1999_v57, 0.0  ;;  %v2017_v22 = vmax.f32 %v2001_v36, 0.0  ;;  %v2000_v2 = vadd.f32 %v3728_v32, %v668_v29  ;;  %v586_v26 = vld [vmem:[%s7095_s4 + $0x50] sm:$0xff]  ;;  %v587_v32 = vld [vmem:[%s7095_s4 + $0x58] sm:$0xff] }
 0x2a5   :  { %v713_v55 = vpack.c.bf16 %v701_v49, %v697_v31  ;;  %v715_v1 = vpack.c.bf16 %v703_v48, %v699_v47  ;;  %v712_v9 = vpack.c.bf16 %v700_v52, %v696_v19  ;;  %v714_v20 = vpack.c.bf16 %v702_v53, %v698_v39  ;;  %772 = vperm.xlu1 %3238, %v586_v26   ;;  %v607_v26 = vld [vmem:[%s7095_s4 + $0xf8] sm:$0xff] }
 0x2a6   :  { %v689_v24 = vadd.f32 %v3776_v54, %v653_v11  ;;  %v691_v3 = vadd.f32 %v3776_v54, %v655_v15  ;;  %v688_v18 = vadd.f32 %v3776_v54, %v652_v10  ;;  %v690_v51 = vadd.f32 %v3776_v54, %v654_v28  ;;  %777 = vperm.xlu0 %3237, %v587_v32   ;;  %v3978_v32 = vld [vmem:[%s7094_s3 + $0x50] sm:$0xff]  }
 0x2a7   :  { %1008 = vmatprep.subr.bf16.mxu0 %v713_v55  ;;  %1201 = vmatprep.subr.bf16.mxu1 %v715_v1  ;;  %v2027_v4 = vpack.c.bf16 %v2015_v13, %v2011_v62  ;;  %v2014_v45 = vmax.f32 %v1998_v12, 0.0  ;;  %v2016_v34 = vmax.f32 %v2000_v2, 0.0  ;;  %v2010_v39 = vmax.f32 %v1994_v30, 0.0  ;;  %v589_v55 = vld [vmem:[%s7095_s4 + $0x68] sm:$0xff]  ;;  %v3859_v30 = vld [vmem:[%s7094_s3 + $0x18] sm:$0xff]   ;;  %v594_v12 = vld [vmem:[%s7095_s4 + $0x90] sm:$0xff] }
 0x2a8   :  { %v678_v6 = vpop.permute.xlu1 %677  ;;  %1009 = vmatpush1.bf16.msra.mxu0 %v712_v9  ;;  %1202 = vmatpush1.bf16.msra.mxu1 %v714_v20  ;;  %v705_v11 = vmax.f32 %v689_v24, 0.0  ;;  %v707_v38 = vmax.f32 %v691_v3, 0.0  ;;  %v704_v0 = vmax.f32 %v688_v18, 0.0  ;;  %v706_v8 = vmax.f32 %v690_v51, 0.0  ;;  %v3825_v20 = vld [vmem:[%s7094_s3 + $0x8] sm:$0xff]   ;;  %v590_v24 = vld [vmem:[%s7095_s4 + $0x70] sm:$0xff] }
 0x2a9   :  { %v693_v15 = vadd.f32 %v678_v6, %v657_v21  ;;  %v695_v10 = vadd.f32 %v678_v6, %v659_v43  ;;  %v692_v28 = vadd.f32 %v678_v6, %v656_v41  ;;  %v694_v23 = vadd.f32 %v678_v6, %v658_v40  ;;  %v591_v3 = vld [vmem:[%s7095_s4 + $0x78] sm:$0xff]  ;;  %v3842_v18 = vld [vmem:[%s7094_s3 + $0x10] sm:$0xff]   ;;  %v592_v51 = vld [vmem:[%s7095_s4 + $0x80] sm:$0xff] }
 0x2aa   :  { %v2007_v25 = vadd.f32 %v1991_v61, %v678_v6  ;;  %v2013_v21 = vmax.f32 %v1997_v63, 0.0  ;;  %v2003_v43 = vadd.f32 %v3740_v35, %v3776_v54  ;;  %v2005_v41 = vadd.f32 %v3744_v60, %v3776_v54  ;;  %v3803_v35 = vld [vmem:[%s7094_s3] sm:$0xff]   ;;  %787 = vperm.xlu0 %3237, %v589_v55   ;;  %v593_v62 = vld [vmem:[%s7095_s4 + $0x88] sm:$0xff]  ;;  %v598_v2 = vld [vmem:[%s7095_s4 + $0xb0] sm:$0xff] }
 0x2ab   :  { %v709_v5 = vmax.f32 %v693_v15, 0.0  ;;  %v711_v7 = vmax.f32 %v695_v10, 0.0  ;;  %v708_v46 = vmax.f32 %v692_v28, 0.0  ;;  %v710_v42 = vmax.f32 %v694_v23, 0.0  ;;  %v597_v13 = vld [vmem:[%s7095_s4 + $0xa8] sm:$0xff]  ;;  %v599_v15 = vld [vmem:[%s7095_s4 + $0xb8] sm:$0xff] }
 0x2ac   :  { %v2009_v40 = vadd.f32 %v1993_v44, %v678_v6  ;;  %v2006_v31 = vadd.f32 %v3765_v58, %v678_v6  ;;  %v2029_v47 = vpack.c.bf16 %v2017_v22, %v2013_v21  ;;  %v2023_v60 = vmax.f32 %v2007_v25, 0.0  ;;  %v3893_v22 = vld [vmem:[%s7094_s3 + $0x28] sm:$0xff]   ;;  %v3910_v10 = vld [vmem:[%s7094_s3 + $0x30] sm:$0xff]   ;;  %v600_v28 = vld [vmem:[%s7095_s4 + $0xc0] sm:$0xff] }
 0x2ad   :  { %v717_v61 = vpack.c.bf16 %v709_v5, %v705_v11  ;;  %v719_v29 = vpack.c.bf16 %v711_v7, %v707_v38  ;;  %v716_v33 = vpack.c.bf16 %v708_v46, %v704_v0  ;;  %v718_v16 = vpack.c.bf16 %v710_v42, %v706_v8  ;;  %v596_v11 = vld [vmem:[%s7095_s4 + $0xa0] sm:$0xff]  ;;  %v601_v23 = vld [vmem:[%s7095_s4 + $0xc8] sm:$0xff]  ;;  %v3927_v38 = vld [vmem:[%s7094_s3 + $0x38] sm:$0xff]  }
 0x2ae   :  { %v2025_v44 = vmax.f32 %v2009_v40, 0.0  ;;  %v2008_v19 = vadd.f32 %v3768_v14, %v678_v6  ;;  %v2012_v49 = vmax.f32 %v1996_v59, 0.0  ;;  %v2002_v48 = vadd.f32 %v3747_v37, %v3776_v54  ;;  %797 = vperm.xlu0 %3237, %v591_v3   ;;  %v595_v59 = vld [vmem:[%s7095_s4 + $0x98] sm:$0xff]  ;;  %v3876_v6 = vld [vmem:[%s7094_s3 + $0x20] sm:$0xff]   ;;  %v602_v0 = vld [vmem:[%s7095_s4 + $0xd0] sm:$0xff] }
 0x2af   :  { %1010 = vmatprep.subr.bf16.mxu0 %v717_v61  ;;  %1203 = vmatprep.subr.bf16.mxu1 %v719_v29  ;;  %v2004_v58 = vadd.f32 %v3750_v27, %v3776_v54  ;;  %v2019_v52 = vmax.f32 %v2003_v43, 0.0  ;;  %v2021_v53 = vmax.f32 %v2005_v41, 0.0  ;;  %v2026_v17 = vpack.c.bf16 %v2014_v45, %v2010_v39  ;;  %v588_v54 = vld [vmem:[%s7095_s4 + $0x60] sm:$0xff]  ;;  %v603_v8 = vld [vmem:[%s7095_s4 + $0xd8] sm:$0xff]  ;;  %v605_v7 = vld [vmem:[%s7095_s4 + $0xe8] sm:$0xff]  ;;  %v4107_v29 = vpop.permute.xlu1 %727 }
 0x2b0   :  { %1011 = vmatpush1.bf16.msra.mxu0 %v716_v33  ;;  %1204 = vmatpush1.bf16.msra.mxu1 %v718_v16  ;;  %v2028_v50 = vpack.c.bf16 %v2016_v34, %v2012_v49  ;;  %v2022_v57 = vmax.f32 %v2006_v31, 0.0  ;;  %v2024_v63 = vmax.f32 %v2008_v19, 0.0  ;;  %v2018_v37 = vmax.f32 %v2002_v48, 0.0  ;;  %v3944_v25 = vld [vmem:[%s7094_s3 + $0x40] sm:$0xff]   ;;  %v3961_v46 = vld [vmem:[%s7094_s3 + $0x48] sm:$0xff]   ;;  %v606_v42 = vld [vmem:[%s7095_s4 + $0xf0] sm:$0xff]  ;;  %v4109_v33 = vpop.permute.xlu0 %722 }
 0x2b1   :  { %2034 = vmatprep.subr.bf16.mxu0 %v2027_v4  ;;  %2227 = vmatprep.subr.bf16.mxu1 %v2029_v47  ;;  %v2031_v14 = vpack.c.bf16 %v2023_v60, %v2019_v52  ;;  %v2033_v36 = vpack.c.bf16 %v2025_v44, %v2021_v53  ;;  %v2020_v27 = vmax.f32 %v2004_v58, 0.0  ;;  %v604_v5 = vld [vmem:[%s7095_s4 + $0xe0] sm:$0xff]  ;;  %v3989_v21 = vld [vmem:[%s7094_s3 + $0x58] sm:$0xff]   ;;  %v4011_v41 = vld [vmem:[%s7094_s3 + $0x68] sm:$0xff]  }
 0x2b2   :  { %v2030_v1 = vpack.c.bf16 %v2022_v57, %v2018_v37  ;;  %782 = vperm.xlu1 %3238, %v588_v54   ;;  %807 = vperm.xlu0 %3237, %v593_v62   ;;  %v4000_v43 = vld [vmem:[%s7094_s3 + $0x60] sm:$0xff]   ;;  %v4022_v40 = vld [vmem:[%s7094_s3 + $0x70] sm:$0xff]   ;;  %v4033_v61 = vld [vmem:[%s7094_s3 + $0x78] sm:$0xff]  }
 0x2b3   :  { %3035 = vmatmul.mubr.msk.bf16.vlgmr.msra.gmra.mrb[16].mxu0 %vm83_vm0, %v3803_v35  ;;  %3051 = vmatmul.mubr.msk.bf16.vlgmr.msra.gmra.mrb[16].mxu1 %vm83_vm0, %v3803_v35  ;;  %v2032_v9 = vpack.c.bf16 %v2024_v63, %v2020_v27 }
 0x2b4   :  { %2035 = vmatpush1.bf16.msra.mxu0 %v2026_v17  ;;  %2228 = vmatpush1.bf16.msra.mxu1 %v2028_v50  ;;  %v4155_v27 = vpop.permute.xlu0 %737 }
 0x2b5   :  { %2036 = vmatprep.subr.bf16.mxu0 %v2031_v14  ;;  %2229 = vmatprep.subr.bf16.mxu1 %v2033_v36  ;;  %v4147_v14 = vpop.permute.xlu1 %732 }
 0x2b6   :  { %1050 = vmatprep.mubr.bf16.mxu0 %v7342_v56  ;;  %1243 = vmatprep.mubr.bf16.mxu1 %v7342_v56 }
 0x2b7   :  { %792 = vperm.xlu1 %3238, %v590_v24   ;;  %817 = vperm.xlu0 %3237, %v595_v59  }
 0x2b8   :  { %2037 = vmatpush1.bf16.msra.mxu0 %v2030_v1  ;;  %2230 = vmatpush1.bf16.msra.mxu1 %v2032_v9 }
 0x2bb   :  { %3036 = vmatmul.mubr.msk.bf16.gmra.mrb[20].mxu0 %vm83_vm0, %v3825_v20  ;;  %3052 = vmatmul.mubr.msk.bf16.gmra.mrb[20].mxu1 %vm83_vm0, %v3825_v20 }
 0x2bc   :  { %1060 = vmatprep.mubr.bf16.mxu0 %v7342_v56  ;;  %1253 = vmatprep.mubr.bf16.mxu1 %v7342_v56 }
 0x2bd   :  { %802 = vperm.xlu1 %3238, %v592_v51   ;;  %827 = vperm.xlu0 %3237, %v597_v13  }
 0x2c1   :  { %812 = vperm.xlu1 %3238, %v594_v12   ;;  %837 = vperm.xlu0 %3237, %v599_v15  }
 0x2c3   :  { %3037 = vmatmul.mubr.msk.bf16.gmra.mrb[24].mxu0 %vm83_vm0, %v3842_v18  ;;  %3053 = vmatmul.mubr.msk.bf16.gmra.mrb[24].mxu1 %vm83_vm0, %v3842_v18 }
 0x2c4   :  { %1070 = vmatprep.mubr.bf16.mxu0 %v7342_v56  ;;  %1263 = vmatprep.mubr.bf16.mxu1 %v7342_v56 }
 0x2c5   :  { %822 = vperm.xlu1 %3238, %v596_v11   ;;  %847 = vperm.xlu0 %3237, %v601_v23  }
 0x2c9   :  { %832 = vperm.xlu1 %3238, %v598_v2   ;;  %857 = vperm.xlu0 %3237, %v603_v8  }
 0x2cb   :  { %3038 = vmatmul.mubr.msk.bf16.gmra.mrb[28].mxu0 %vm83_vm0, %v3859_v30  ;;  %3054 = vmatmul.mubr.msk.bf16.gmra.mrb[28].mxu1 %vm83_vm0, %v3859_v30 }
 0x2cc   :  { %1080 = vmatprep.mubr.bf16.mxu0 %v7342_v56  ;;  %1273 = vmatprep.mubr.bf16.mxu1 %v7342_v56 }
 0x2cd   :  { %842 = vperm.xlu1 %3238, %v600_v28   ;;  %867 = vperm.xlu0 %3237, %v605_v7  }
 0x2d1   :  { %852 = vperm.xlu1 %3238, %v602_v0   ;;  %877 = vperm.xlu0 %3237, %v607_v26  }
 0x2d3   :  { %3039 = vmatmul.mubr.msk.bf16.gmra.mrb[32].mxu0 %vm83_vm0, %v3876_v6  ;;  %3055 = vmatmul.mubr.msk.bf16.gmra.mrb[32].mxu1 %vm83_vm0, %v3876_v6 }
 0x2d4   :  { %1090 = vmatprep.mubr.bf16.mxu0 %v7342_v56  ;;  %1283 = vmatprep.mubr.bf16.mxu1 %v7342_v56 }
 0x2d5   :  { %862 = vperm.xlu1 %3238, %v604_v5  }
 0x2d9   :  { %872 = vperm.xlu1 %3238, %v606_v42  }
 0x2db   :  { %3040 = vmatmul.mubr.msk.bf16.gmra.mrb[36].mxu0 %vm83_vm0, %v3893_v22  ;;  %3056 = vmatmul.mubr.msk.bf16.gmra.mrb[36].mxu1 %vm83_vm0, %v3893_v22 }
 0x2dc   :  { %1100 = vmatprep.mubr.bf16.mxu0 %v7342_v56  ;;  %1293 = vmatprep.mubr.bf16.mxu1 %v7342_v56 }
 0x2e3   :  { %3041 = vmatmul.mubr.msk.bf16.gmra.mrb[40].mxu0 %vm83_vm0, %v3910_v10  ;;  %3057 = vmatmul.mubr.msk.bf16.gmra.mrb[40].mxu1 %vm83_vm0, %v3910_v10 }
 0x2e4   :  { %1110 = vmatprep.mubr.bf16.mxu0 %v7342_v56  ;;  %1303 = vmatprep.mubr.bf16.mxu1 %v7342_v56 }
 0x2eb   :  { %3042 = vmatmul.mubr.msk.bf16.gmra.mrb[44].mxu0 %vm83_vm0, %v3927_v38  ;;  %3058 = vmatmul.mubr.msk.bf16.gmra.mrb[44].mxu1 %vm83_vm0, %v3927_v38 }
 0x2ec   :  { %1120 = vmatprep.mubr.bf16.mxu0 %v7342_v56  ;;  %1313 = vmatprep.mubr.bf16.mxu1 %v7342_v56 }
 0x2f3   :  { %3043 = vmatmul.mubr.msk.bf16.gmra.mrb[48].mxu0 %vm83_vm0, %v3944_v25  ;;  %3059 = vmatmul.mubr.msk.bf16.gmra.mrb[48].mxu1 %vm83_vm0, %v3944_v25 }
 0x2f4   :  { %1130 = vmatprep.mubr.bf16.mxu0 %v7342_v56  ;;  %1323 = vmatprep.mubr.bf16.mxu1 %v7342_v56 }
 0x2fb   :  { %3044 = vmatmul.mubr.msk.bf16.gmra.mrb[52].mxu0 %vm83_vm0, %v3961_v46  ;;  %3060 = vmatmul.mubr.msk.bf16.gmra.mrb[52].mxu1 %vm83_vm0, %v3961_v46 }
 0x2fc   :  { %1140 = vmatprep.mubr.bf16.mxu0 %v7342_v56  ;;  %1333 = vmatprep.mubr.bf16.mxu1 %v7342_v56 }
 0x303   :  { %3045 = vmatmul.mubr.msk.bf16.gmra.mrb[56].mxu0 %vm83_vm0, %v3978_v32  ;;  %3061 = vmatmul.mubr.msk.bf16.gmra.mrb[56].mxu1 %vm83_vm0, %v3978_v32 }
 0x304   :  { %1150 = vmatprep.mubr.bf16.mxu0 %v7342_v56  ;;  %1343 = vmatprep.mubr.bf16.mxu1 %v7342_v56 }
 0x30b   :  { %3046 = vmatmul.mubr.msk.bf16.gmra.mrb[60].mxu0 %vm83_vm0, %v3989_v21  ;;  %3062 = vmatmul.mubr.msk.bf16.gmra.mrb[60].mxu1 %vm83_vm0, %v3989_v21 }
 0x30c   :  { %1160 = vmatprep.mubr.bf16.mxu0 %v7342_v56  ;;  %1353 = vmatprep.mubr.bf16.mxu1 %v7342_v56 }
 0x313   :  { %3047 = vmatmul.mubr.msk.bf16.gmra.mrb[64].mxu0 %vm83_vm0, %v4000_v43  ;;  %3063 = vmatmul.mubr.msk.bf16.gmra.mrb[64].mxu1 %vm83_vm0, %v4000_v43 }
 0x314   :  { %1170 = vmatprep.mubr.bf16.mxu0 %v7342_v56  ;;  %1363 = vmatprep.mubr.bf16.mxu1 %v7342_v56 }
 0x31b   :  { %3048 = vmatmul.mubr.msk.bf16.gmra.mrb[68].mxu0 %vm83_vm0, %v4011_v41  ;;  %3064 = vmatmul.mubr.msk.bf16.gmra.mrb[68].mxu1 %vm83_vm0, %v4011_v41 }
 0x31c   :  { %1180 = vmatprep.mubr.bf16.mxu0 %v7342_v56  ;;  %1373 = vmatprep.mubr.bf16.mxu1 %v7342_v56 }
 0x323   :  { %3049 = vmatmul.mubr.msk.bf16.gmra.mrb[72].mxu0 %vm83_vm0, %v4022_v40  ;;  %3065 = vmatmul.mubr.msk.bf16.gmra.mrb[72].mxu1 %vm83_vm0, %v4022_v40 }
 0x324   :  { %1190 = vmatprep.mubr.bf16.mxu0 %v7342_v56  ;;  %1383 = vmatprep.mubr.bf16.mxu1 %v7342_v56 }
 0x32b   :  { %3050 = vmatmul.mubr.msk.bf16.gmra.mrb[76].mxu0 %vm83_vm0, %v4033_v61  ;;  %3066 = vmatmul.mubr.msk.bf16.gmra.mrb[76].mxu1 %vm83_vm0, %v4033_v61 }
 0x32c   :  { %2066 = vmatprep.mubr.bf16.mxu0 %v7342_v56  ;;  %2259 = vmatprep.mubr.bf16.mxu1 %v7342_v56 }
 0x333   :  { %3067 = vmatmul.mubr.msk.bf16.vlgmr.msra.gmra.mrb[80].mxu0 %vm83_vm0, %v3803_v35  ;;  %3083 = vmatmul.mubr.msk.bf16.vlgmr.msra.gmra.mrb[80].mxu1 %vm83_vm0, %v3803_v35 }
 0x334   :  { %2076 = vmatprep.mubr.bf16.mxu0 %v7342_v56  ;;  %2269 = vmatprep.mubr.bf16.mxu1 %v7342_v56 }
 0x33b   :  { %3068 = vmatmul.mubr.msk.bf16.gmra.mrb[84].mxu0 %vm83_vm0, %v3825_v20  ;;  %3084 = vmatmul.mubr.msk.bf16.gmra.mrb[84].mxu1 %vm83_vm0, %v3825_v20 }
 0x33c   :  { %2086 = vmatprep.mubr.bf16.mxu0 %v7342_v56  ;;  %2279 = vmatprep.mubr.bf16.mxu1 %v7342_v56 }
 0x343   :  { %3069 = vmatmul.mubr.msk.bf16.gmra.mrb[88].mxu0 %vm83_vm0, %v3842_v18  ;;  %3085 = vmatmul.mubr.msk.bf16.gmra.mrb[88].mxu1 %vm83_vm0, %v3842_v18 }
 0x344   :  { %2096 = vmatprep.mubr.bf16.mxu0 %v7342_v56  ;;  %2289 = vmatprep.mubr.bf16.mxu1 %v7342_v56 }
 0x34b   :  { %3070 = vmatmul.mubr.msk.bf16.gmra.mrb[92].mxu0 %vm83_vm0, %v3859_v30  ;;  %3086 = vmatmul.mubr.msk.bf16.gmra.mrb[92].mxu1 %vm83_vm0, %v3859_v30 }
 0x34c   :  { %2106 = vmatprep.mubr.bf16.mxu0 %v7342_v56  ;;  %2299 = vmatprep.mubr.bf16.mxu1 %v7342_v56 }
 0x353   :  { %3071 = vmatmul.mubr.msk.bf16.gmra.mrb[96].mxu0 %vm83_vm0, %v3876_v6  ;;  %3087 = vmatmul.mubr.msk.bf16.gmra.mrb[96].mxu1 %vm83_vm0, %v3876_v6 }
 0x354   :  { %2116 = vmatprep.mubr.bf16.mxu0 %v7342_v56  ;;  %2309 = vmatprep.mubr.bf16.mxu1 %v7342_v56 }
 0x35b   :  { %3072 = vmatmul.mubr.msk.bf16.gmra.mrb[100].mxu0 %vm83_vm0, %v3893_v22  ;;  %3088 = vmatmul.mubr.msk.bf16.gmra.mrb[100].mxu1 %vm83_vm0, %v3893_v22 }
 0x35c   :  { %2126 = vmatprep.mubr.bf16.mxu0 %v7342_v56  ;;  %2319 = vmatprep.mubr.bf16.mxu1 %v7342_v56 }
 0x363   :  { %3073 = vmatmul.mubr.msk.bf16.gmra.mrb[104].mxu0 %vm83_vm0, %v3910_v10  ;;  %3089 = vmatmul.mubr.msk.bf16.gmra.mrb[104].mxu1 %vm83_vm0, %v3910_v10 }
 0x364   :  { %2136 = vmatprep.mubr.bf16.mxu0 %v7342_v56  ;;  %2329 = vmatprep.mubr.bf16.mxu1 %v7342_v56 }
 0x36b   :  { %3074 = vmatmul.mubr.msk.bf16.gmra.mrb[108].mxu0 %vm83_vm0, %v3927_v38  ;;  %3090 = vmatmul.mubr.msk.bf16.gmra.mrb[108].mxu1 %vm83_vm0, %v3927_v38 }
 0x36c   :  { %2146 = vmatprep.mubr.bf16.mxu0 %v7342_v56  ;;  %2339 = vmatprep.mubr.bf16.mxu1 %v7342_v56 }
 0x373   :  { %3075 = vmatmul.mubr.msk.bf16.gmra.mrb[112].mxu0 %vm83_vm0, %v3944_v25  ;;  %3091 = vmatmul.mubr.msk.bf16.gmra.mrb[112].mxu1 %vm83_vm0, %v3944_v25 }
 0x374   :  { %2156 = vmatprep.mubr.bf16.mxu0 %v7342_v56  ;;  %2349 = vmatprep.mubr.bf16.mxu1 %v7342_v56 }
 0x37b   :  { %3076 = vmatmul.mubr.msk.bf16.gmra.mrb[116].mxu0 %vm83_vm0, %v3961_v46  ;;  %3092 = vmatmul.mubr.msk.bf16.gmra.mrb[116].mxu1 %vm83_vm0, %v3961_v46 }
 0x37c   :  { %2166 = vmatprep.mubr.bf16.mxu0 %v7342_v56  ;;  %2359 = vmatprep.mubr.bf16.mxu1 %v7342_v56 }
 0x383   :  { %3077 = vmatmul.mubr.msk.bf16.gmra.mrb[120].mxu0 %vm83_vm0, %v3978_v32  ;;  %3093 = vmatmul.mubr.msk.bf16.gmra.mrb[120].mxu1 %vm83_vm0, %v3978_v32 }
 0x384   :  { %2176 = vmatprep.mubr.bf16.mxu0 %v7342_v56  ;;  %2369 = vmatprep.mubr.bf16.mxu1 %v7342_v56 }
 0x386   :  { %v1042_v16 = vpop.f32.mrb[16].mxu0  ;;  %v1235_v4 = vpop.f32.mrb[16].mxu1 }
 0x387   :  { %v1044_v45 = vpop.f32.mrb[17].mxu0  ;;  %v1237_v34 = vpop.f32.mrb[17].mxu1  ;;  %v4118_v39 = vadd.f32 %v1042_v16, %v4109_v33  ;;  %v4121_v49 = vadd.f32 %v1235_v4, %v4109_v33 }
 0x388   :  { %v1046_v31 = vpop.f32.mrb[18].mxu0  ;;  %v1239_v47 = vpop.f32.mrb[18].mxu1  ;;  %v4130_v52 = vadd.f32 %v1044_v45, %v4109_v33  ;;  %v4133_v53 = vadd.f32 %v1237_v34, %v4109_v33 }
 0x389   :  { %v4112_v35 = vadd.f32 %v1046_v31, %v4107_v29  ;;  %v4115_v60 = vadd.f32 %v1239_v47, %v4107_v29  ;;  %v1048_v44 = vpop.f32.mrb[19].mxu0  ;;  %v1241_v19 = vpop.f32.mrb[19].mxu1  ;;  %v1394_v36 = vmul.f32 %v4118_v39, %v4118_v39  ;;  %v1396_v37 = vmul.f32 %v4121_v49, %v4121_v49 }
 0x38a   :  { %v4124_v48 = vadd.f32 %v1048_v44, %v4107_v29  ;;  %v4127_v58 = vadd.f32 %v1241_v19, %v4107_v29  ;;  %7347 = vst [vmem:[#allocation5_spill] sm:$0xff] %v4130_v52  ;;  %7348 = vst [vmem:[#allocation6_spill] sm:$0xff] %v4133_v53  ;;  %v1395_v1 = vmul.f32 %v4130_v52, %v4130_v52  ;;  %v4203_v16 = vpop.permute.xlu1 %742  ;;  %v4208_v45 = vpop.permute.xlu0 %747 }
 0x38b   :  { %v1398_v17 = vmul.f32 %v4112_v35, %v4112_v35  ;;  %v1400_v50 = vmul.f32 %v4115_v60, %v4115_v60  ;;  %3078 = vmatmul.mubr.msk.bf16.gmra.mrb[124].mxu0 %vm83_vm0, %v3989_v21  ;;  %3094 = vmatmul.mubr.msk.bf16.gmra.mrb[124].mxu1 %vm83_vm0, %v3989_v21  ;;  %v1397_v9 = vmul.f32 %v4133_v53, %v4133_v53 }
 0x38c   :  { %7345 = vst [vmem:[#allocation3_spill] sm:$0xff] %v4124_v48  ;;  %7346 = vst [vmem:[#allocation4_spill] sm:$0xff] %v4127_v58  ;;  %v1399_v57 = vmul.f32 %v4124_v48, %v4124_v48  ;;  %v1401_v63 = vmul.f32 %v4127_v58, %v4127_v58  ;;  %2186 = vmatprep.mubr.bf16.mxu0 %v7342_v56  ;;  %2379 = vmatprep.mubr.bf16.mxu1 %v7342_v56 }
 0x38d   :  { %v1522_v24 = vadd.f32 %v1398_v17, %v1394_v36  ;;  %v1596_v18 = vadd.f32 %v1400_v50, %v1396_v37 }
 0x38e   :  { %v1052_v54 = vpop.f32.mrb[20].mxu0  ;;  %v1245_v55 = vpop.f32.mrb[20].mxu1  ;;  %v1559_v12 = vadd.f32 %v1399_v57, %v1395_v1  ;;  %v1633_v6 = vadd.f32 %v1401_v63, %v1397_v9 }
 0x38f   :  { %v4162_v20 = vadd.f32 %v1052_v54, %v4147_v14  ;;  %v4165_v3 = vadd.f32 %v1245_v55, %v4147_v14  ;;  %v1054_v51 = vpop.f32.mrb[21].mxu0  ;;  %v1247_v62 = vpop.f32.mrb[21].mxu1 }
 0x390   :  { %v4168_v30 = vadd.f32 %v1054_v51, %v4147_v14  ;;  %v4171_v59 = vadd.f32 %v1247_v62, %v4147_v14  ;;  %v1056_v11 = vpop.f32.mrb[22].mxu0  ;;  %v1249_v13 = vpop.f32.mrb[22].mxu1 }
 0x391   :  { %v1402_v22 = vmul.f32 %v4162_v20, %v4162_v20  ;;  %v1404_v2 = vmul.f32 %v4165_v3, %v4165_v3  ;;  %v1058_v15 = vpop.f32.mrb[23].mxu0  ;;  %v1251_v10 = vpop.f32.mrb[23].mxu1  ;;  %v4178_v28 = vadd.f32 %v1056_v11, %v4155_v27  ;;  %v4181_v23 = vadd.f32 %v1249_v13, %v4155_v27 }
 0x392   :  { %7349 = vst [vmem:[#allocation7_spill] sm:$0xff] %v4168_v30  ;;  %7350 = vst [vmem:[#allocation8_spill] sm:$0xff] %v4171_v59  ;;  %v1403_v38 = vmul.f32 %v4168_v30, %v4168_v30  ;;  %v1405_v0 = vmul.f32 %v4171_v59, %v4171_v59  ;;  %v4188_v8 = vadd.f32 %v1058_v15, %v4155_v27 }
 0x393   :  { %v4191_v25 = vadd.f32 %v1251_v10, %v4155_v27  ;;  %v1523_v5 = vadd.f32 %v1522_v24, %v1402_v22  ;;  %v1597_v7 = vadd.f32 %v1596_v18, %v1404_v2  ;;  %3079 = vmatmul.mubr.msk.bf16.gmra.mrb[128].mxu0 %vm83_vm0, %v4000_v43  ;;  %3095 = vmatmul.mubr.msk.bf16.gmra.mrb[128].mxu1 %vm83_vm0, %v4000_v43 }
 0x394   :  { %7351 = vst [vmem:[#allocation9_spill] sm:$0xff] %v4188_v8  ;;  %v1406_v46 = vmul.f32 %v4178_v28, %v4178_v28  ;;  %v1560_v42 = vadd.f32 %v1559_v12, %v1403_v38  ;;  %v1634_v26 = vadd.f32 %v1633_v6, %v1405_v0  ;;  %v1407_v32 = vmul.f32 %v4188_v8, %v4188_v8 }
 0x395   :  { %7352 = vst [vmem:[#allocation10_spill] sm:$0xff] %v4191_v25  ;;  %v1409_v21 = vmul.f32 %v4191_v25, %v4191_v25  ;;  %2196 = vmatprep.mubr.bf16.mxu0 %v7342_v56  ;;  %v1408_v4 = vmul.f32 %v4181_v23, %v4181_v23  ;;  %2389 = vmatprep.mubr.bf16.mxu1 %v7342_v56 }
 0x396   :  { %v1062_v43 = vpop.f32.mrb[24].mxu0  ;;  %v1255_v34 = vpop.f32.mrb[24].mxu1  ;;  %v1561_v31 = vadd.f32 %v1560_v42, %v1407_v32  ;;  %v1524_v44 = vadd.f32 %v1523_v5, %v1406_v46 }
 0x397   :  { %v4212_v47 = vadd.f32 %v1062_v43, %v4203_v16  ;;  %v4215_v19 = vadd.f32 %v1255_v34, %v4203_v16  ;;  %v1064_v17 = vpop.f32.mrb[25].mxu0  ;;  %v1257_v50 = vpop.f32.mrb[25].mxu1  ;;  %v1635_v57 = vadd.f32 %v1634_v26, %v1409_v21  ;;  %v1598_v63 = vadd.f32 %v1597_v7, %v1408_v4 }
 0x398   :  { %v4218_v36 = vadd.f32 %v1064_v17, %v4203_v16  ;;  %v4221_v37 = vadd.f32 %v1257_v50, %v4203_v16  ;;  %v1066_v54 = vpop.f32.mrb[26].mxu0  ;;  %v1259_v55 = vpop.f32.mrb[26].mxu1 }
 0x399   :  { %v1410_v1 = vmul.f32 %v4212_v47, %v4212_v47  ;;  %v1412_v9 = vmul.f32 %v4215_v19, %v4215_v19  ;;  %v1068_v24 = vpop.f32.mrb[27].mxu0  ;;  %v1261_v18 = vpop.f32.mrb[27].mxu1  ;;  %v4228_v51 = vadd.f32 %v1066_v54, %v4208_v45  ;;  %v4231_v62 = vadd.f32 %v1259_v55, %v4208_v45 }
 0x39a   :  { %7353 = vst [vmem:[#allocation11_spill] sm:$0xff] %v4218_v36  ;;  %7354 = vst [vmem:[#allocation12_spill] sm:$0xff] %v4221_v37  ;;  %v1411_v12 = vmul.f32 %v4218_v36, %v4218_v36  ;;  %v1413_v6 = vmul.f32 %v4221_v37, %v4221_v37  ;;  %v4238_v11 = vadd.f32 %v1068_v24, %v4208_v45  ;;  %v4253_v7 = vpop.permute.xlu1 %752  ;;  %v4258_v42 = vpop.permute.xlu0 %757 }
 0x39b   :  { %v4241_v13 = vadd.f32 %v1261_v18, %v4208_v45  ;;  %v1525_v22 = vadd.f32 %v1524_v44, %v1410_v1  ;;  %v1599_v2 = vadd.f32 %v1598_v63, %v1412_v9  ;;  %3080 = vmatmul.mubr.msk.bf16.gmra.mrb[132].mxu0 %vm83_vm0, %v4011_v41  ;;  %3096 = vmatmul.mubr.msk.bf16.gmra.mrb[132].mxu1 %vm83_vm0, %v4011_v41 }
 0x39c   :  { %7355 = vst [vmem:[#allocation13_spill] sm:$0xff] %v4238_v11  ;;  %v1414_v15 = vmul.f32 %v4228_v51, %v4228_v51  ;;  %v1562_v10 = vadd.f32 %v1561_v31, %v1411_v12  ;;  %v1636_v38 = vadd.f32 %v1635_v57, %v1413_v6  ;;  %v1415_v0 = vmul.f32 %v4238_v11, %v4238_v11 }
 0x39d   :  { %7356 = vst [vmem:[#allocation14_spill] sm:$0xff] %v4241_v13  ;;  %v1417_v5 = vmul.f32 %v4241_v13, %v4241_v13  ;;  %2206 = vmatprep.mubr.bf16.mxu0 %v7342_v56  ;;  %v1416_v46 = vmul.f32 %v4231_v62, %v4231_v62  ;;  %2399 = vmatprep.mubr.bf16.mxu1 %v7342_v56 }
 0x39e   :  { %v1072_v41 = vpop.f32.mrb[28].mxu0  ;;  %v1265_v26 = vpop.f32.mrb[28].mxu1  ;;  %v1563_v32 = vadd.f32 %v1562_v10, %v1415_v0  ;;  %v1526_v4 = vadd.f32 %v1525_v22, %v1414_v15 }
 0x39f   :  { %v4262_v21 = vadd.f32 %v1072_v41, %v4253_v7  ;;  %v4265_v43 = vadd.f32 %v1265_v26, %v4253_v7  ;;  %v1074_v34 = vpop.f32.mrb[29].mxu0  ;;  %v1267_v31 = vpop.f32.mrb[29].mxu1  ;;  %v1637_v44 = vadd.f32 %v1636_v38, %v1417_v5  ;;  %v1600_v17 = vadd.f32 %v1599_v2, %v1416_v46 }
 0x3a0   :  { %v4268_v50 = vadd.f32 %v1074_v34, %v4253_v7  ;;  %v4271_v57 = vadd.f32 %v1267_v31, %v4253_v7  ;;  %v1076_v63 = vpop.f32.mrb[30].mxu0  ;;  %v1269_v54 = vpop.f32.mrb[30].mxu1 }
 0x3a1   :  { %v1418_v55 = vmul.f32 %v4262_v21, %v4262_v21  ;;  %v1420_v1 = vmul.f32 %v4265_v43, %v4265_v43  ;;  %v1078_v9 = vpop.f32.mrb[31].mxu0  ;;  %v1271_v24 = vpop.f32.mrb[31].mxu1  ;;  %v4278_v18 = vadd.f32 %v1076_v63, %v4258_v42  ;;  %v4281_v12 = vadd.f32 %v1269_v54, %v4258_v42 }
 0x3a2   :  { %7357 = vst [vmem:[#allocation15_spill] sm:$0xff] %v4268_v50  ;;  %7358 = vst [vmem:[#allocation16_spill] sm:$0xff] %v4271_v57  ;;  %v1419_v6 = vmul.f32 %v4268_v50, %v4268_v50  ;;  %v1421_v22 = vmul.f32 %v4271_v57, %v4271_v57  ;;  %v4288_v2 = vadd.f32 %v1078_v9, %v4258_v42  ;;  %v4303_v34 = vpop.permute.xlu1 %762  ;;  %v4308_v31 = vpop.permute.xlu0 %767 }
 0x3a3   :  { %v4291_v15 = vadd.f32 %v1271_v24, %v4258_v42  ;;  %v1527_v10 = vadd.f32 %v1526_v4, %v1418_v55  ;;  %v1601_v38 = vadd.f32 %v1600_v17, %v1420_v1  ;;  %3081 = vmatmul.mubr.msk.bf16.gmra.mrb[136].mxu0 %vm83_vm0, %v4022_v40  ;;  %3097 = vmatmul.mubr.msk.bf16.gmra.mrb[136].mxu1 %vm83_vm0, %v4022_v40 }
 0x3a4   :  { %7359 = vst [vmem:[#allocation17_spill] sm:$0xff] %v4288_v2  ;;  %v1422_v0 = vmul.f32 %v4278_v18, %v4278_v18  ;;  %v1564_v5 = vadd.f32 %v1563_v32, %v1419_v6  ;;  %v1638_v46 = vadd.f32 %v1637_v44, %v1421_v22  ;;  %v1423_v41 = vmul.f32 %v4288_v2, %v4288_v2 }
 0x3a5   :  { %7360 = vst [vmem:[#allocation18_spill] sm:$0xff] %v4291_v15  ;;  %v1425_v26 = vmul.f32 %v4291_v15, %v4291_v15  ;;  %2216 = vmatprep.mubr.bf16.mxu0 %v7342_v56  ;;  %v1424_v4 = vmul.f32 %v4281_v12, %v4281_v12  ;;  %2409 = vmatprep.mubr.bf16.mxu1 %v7342_v56 }
 0x3a6   :  { %v1082_v40 = vpop.f32.mrb[32].mxu0  ;;  %v1275_v32 = vpop.f32.mrb[32].mxu1  ;;  %v1565_v44 = vadd.f32 %v1564_v5, %v1423_v41  ;;  %v1528_v63 = vadd.f32 %v1527_v10, %v1422_v0 }
 0x3a7   :  { %v4312_v17 = vadd.f32 %v1082_v40, %v4303_v34  ;;  %v4315_v54 = vadd.f32 %v1275_v32, %v4303_v34  ;;  %v1084_v55 = vpop.f32.mrb[33].mxu0  ;;  %v1277_v1 = vpop.f32.mrb[33].mxu1  ;;  %v1639_v9 = vadd.f32 %v1638_v46, %v1425_v26  ;;  %v1602_v24 = vadd.f32 %v1601_v38, %v1424_v4 }
 0x3a8   :  { %v4318_v6 = vadd.f32 %v1084_v55, %v4303_v34  ;;  %v4321_v22 = vadd.f32 %v1277_v1, %v4303_v34  ;;  %v1086_v56 = vpop.f32.mrb[34].mxu0  ;;  %v1279_v15 = vpop.f32.mrb[34].mxu1 }
 0x3a9   :  { %v1426_v5 = vmul.f32 %v4312_v17, %v4312_v17  ;;  %v1428_v10 = vmul.f32 %v4315_v54, %v4315_v54  ;;  %v1088_v0 = vpop.f32.mrb[35].mxu0  ;;  %v1281_v41 = vpop.f32.mrb[35].mxu1  ;;  %v4328_v40 = vadd.f32 %v1086_v56, %v4308_v31  ;;  %v4331_v38 = vadd.f32 %v1279_v15, %v4308_v31 }
 0x3aa   :  { %7361 = vst [vmem:[#allocation19_spill] sm:$0xff] %v4318_v6  ;;  %7362 = vst [vmem:[#allocation20_spill] sm:$0xff] %v4321_v22  ;;  %v1427_v46 = vmul.f32 %v4318_v6, %v4318_v6  ;;  %v1429_v26 = vmul.f32 %v4321_v22, %v4321_v22  ;;  %v4338_v4 = vadd.f32 %v1088_v0, %v4308_v31  ;;  %v4353_v22 = vpop.permute.xlu1 %772 }
 0x3ab   :  { %v4341_v32 = vadd.f32 %v1281_v41, %v4308_v31  ;;  %v1529_v55 = vadd.f32 %v1528_v63, %v1426_v5  ;;  %v1603_v1 = vadd.f32 %v1602_v24, %v1428_v10  ;;  %3082 = vmatmul.mubr.msk.bf16.gmra.mrb[140].mxu0 %vm83_vm0, %v4033_v61  ;;  %3098 = vmatmul.mubr.msk.bf16.gmra.mrb[140].mxu1 %vm83_vm0, %v4033_v61  ;;  %v4357_v24 = vpop.permute.xlu0 %777 }
 0x3ac   :  { %7363 = vst [vmem:[#allocation21_spill] sm:$0xff] %v4338_v4  ;;  %v1430_v15 = vmul.f32 %v4328_v40, %v4328_v40  ;;  %v1566_v56 = vadd.f32 %v1565_v44, %v1427_v46  ;;  %v1640_v57 = vadd.f32 %v1639_v9, %v1429_v26  ;;  %v1431_v0 = vmul.f32 %v4338_v4, %v4338_v4 }
 0x3ad   :  { %7364 = vst [vmem:[#allocation22_spill] sm:$0xff] %v4341_v32  ;;  %v1433_v41 = vmul.f32 %v4341_v32, %v4341_v32  ;;  %7365 = vst [vmem:[#allocation23_spill] sm:$0xff] %v4353_v22  ;;  %v1432_v63 = vmul.f32 %v4331_v38, %v4331_v38 }
 0x3ae   :  { %7366 = vst [vmem:[#allocation24_spill] sm:$0xff] %v4357_v24  ;;  %v1092_v5 = vpop.f32.mrb[36].mxu0  ;;  %v1285_v61 = vpop.f32.mrb[36].mxu1  ;;  %v1567_v10 = vadd.f32 %v1566_v56, %v1431_v0  ;;  %v1530_v44 = vadd.f32 %v1529_v55, %v1430_v15 }
 0x3af   :  { %v4360_v13 = vadd.f32 %v1092_v5, %v4353_v22  ;;  %v4363_v9 = vadd.f32 %v1285_v61, %v4353_v22  ;;  %v1094_v46 = vpop.f32.mrb[37].mxu0  ;;  %v1287_v26 = vpop.f32.mrb[37].mxu1  ;;  %v1641_v32 = vadd.f32 %v1640_v57, %v1433_v41  ;;  %v1604_v37 = vadd.f32 %v1603_v1, %v1432_v63 }
 0x3b0   :  { %v4366_v25 = vadd.f32 %v1094_v46, %v4353_v22  ;;  %v4369_v59 = vadd.f32 %v1287_v26, %v4353_v22  ;;  %v1096_v58 = vpop.f32.mrb[38].mxu0  ;;  %v1289_v53 = vpop.f32.mrb[38].mxu1 }
 0x3b1   :  { %v1434_v56 = vmul.f32 %v4360_v13, %v4360_v13  ;;  %v1436_v55 = vmul.f32 %v4363_v9, %v4363_v9  ;;  %v1098_v15 = vpop.f32.mrb[39].mxu0  ;;  %v1291_v0 = vpop.f32.mrb[39].mxu1  ;;  %v4376_v5 = vadd.f32 %v1096_v58, %v4357_v24  ;;  %v4379_v57 = vadd.f32 %v1289_v53, %v4357_v24 }
 0x3b2   :  { %7367 = vst [vmem:[#allocation25_spill] sm:$0xff] %v4366_v25  ;;  %7368 = vst [vmem:[#allocation26_spill] sm:$0xff] %v4369_v59  ;;  %v1435_v1 = vmul.f32 %v4366_v25, %v4366_v25  ;;  %v1437_v41 = vmul.f32 %v4369_v59, %v4369_v59  ;;  %v4386_v63 = vadd.f32 %v1098_v15, %v4357_v24  ;;  %v4399_v59 = vpop.permute.xlu1 %782 }
 0x3b3   :  { %v4389_v61 = vadd.f32 %v1291_v0, %v4357_v24  ;;  %v1531_v46 = vadd.f32 %v1530_v44, %v1434_v56  ;;  %v1605_v26 = vadd.f32 %v1604_v37, %v1436_v55  ;;  %v1438_v58 = vmul.f32 %v4376_v5, %v4376_v5  ;;  %7371 = vst [vmem:[#allocation29_spill] sm:$0xff] %v4399_v59  ;;  %v4401_v0 = vpop.permute.xlu0 %787 }
 0x3b4   :  { %7369 = vst [vmem:[#allocation27_spill] sm:$0xff] %v4386_v63  ;;  %v1440_v53 = vmul.f32 %v4379_v57, %v4379_v57  ;;  %v1568_v22 = vadd.f32 %v1567_v10, %v1435_v1  ;;  %v1642_v4 = vadd.f32 %v1641_v32, %v1437_v41  ;;  %v1439_v25 = vmul.f32 %v4386_v63, %v4386_v63 }
 0x3b5   :  { %7370 = vst [vmem:[#allocation28_spill] sm:$0xff] %v4389_v61  ;;  %v1441_v15 = vmul.f32 %v4389_v61, %v4389_v61  ;;  %7372 = vst [vmem:[#allocation30_spill] sm:$0xff] %v4401_v0  ;;  %v1532_v55 = vadd.f32 %v1531_v46, %v1438_v58 }
 0x3b6   :  { %v1102_v44 = vpop.f32.mrb[40].mxu0  ;;  %v1295_v37 = vpop.f32.mrb[40].mxu1  ;;  %v1606_v32 = vadd.f32 %v1605_v26, %v1440_v53  ;;  %v1569_v41 = vadd.f32 %v1568_v22, %v1439_v25 }
 0x3b7   :  { %v4404_v56 = vadd.f32 %v1102_v44, %v4399_v59  ;;  %v4407_v24 = vadd.f32 %v1295_v37, %v4399_v59  ;;  %v1104_v10 = vpop.f32.mrb[41].mxu0  ;;  %v1297_v1 = vpop.f32.mrb[41].mxu1  ;;  %v1643_v63 = vadd.f32 %v1642_v4, %v1441_v15 }
 0x3b8   :  { %v4410_v61 = vadd.f32 %v1104_v10, %v4399_v59  ;;  %v4413_v6 = vadd.f32 %v1297_v1, %v4399_v59  ;;  %v1106_v2 = vpop.f32.mrb[42].mxu0  ;;  %v1299_v50 = vpop.f32.mrb[42].mxu1 }
 0x3b9   :  { %7373 = vst [vmem:[#allocation31_spill] sm:$0xff] %v4407_v24  ;;  %v1442_v44 = vmul.f32 %v4404_v56, %v4404_v56  ;;  %v1444_v46 = vmul.f32 %v4407_v24, %v4407_v24  ;;  %v1108_v58 = vpop.f32.mrb[43].mxu0  ;;  %v1301_v26 = vpop.f32.mrb[43].mxu1  ;;  %v4420_v53 = vadd.f32 %v1106_v2, %v4401_v0  ;;  %v4423_v25 = vadd.f32 %v1299_v50, %v4401_v0 }
 0x3ba   :  { %7374 = vst [vmem:[#allocation32_spill] sm:$0xff] %v4410_v61  ;;  %7375 = vst [vmem:[#allocation33_spill] sm:$0xff] %v4413_v6  ;;  %v1443_v22 = vmul.f32 %v4410_v61, %v4410_v61  ;;  %v1445_v4 = vmul.f32 %v4413_v6, %v4413_v6  ;;  %v4430_v15 = vadd.f32 %v1108_v58, %v4401_v0  ;;  %v4443_v6 = vpop.permute.xlu1 %792 }
 0x3bb   :  { %7376 = vst [vmem:[#allocation34_spill] sm:$0xff] %v4420_v53  ;;  %7377 = vst [vmem:[#allocation35_spill] sm:$0xff] %v4423_v25  ;;  %v4433_v37 = vadd.f32 %v1301_v26, %v4401_v0  ;;  %v1533_v10 = vadd.f32 %v1532_v55, %v1442_v44  ;;  %v1607_v1 = vadd.f32 %v1606_v32, %v1444_v46  ;;  %v4445_v26 = vpop.permute.xlu0 %797 }
 0x3bc   :  { %7378 = vst [vmem:[#allocation36_spill] sm:$0xff] %v4430_v15  ;;  %v1446_v2 = vmul.f32 %v4420_v53, %v4420_v53  ;;  %v1448_v50 = vmul.f32 %v4423_v25, %v4423_v25  ;;  %v1570_v59 = vadd.f32 %v1569_v41, %v1443_v22  ;;  %v1644_v11 = vadd.f32 %v1643_v63, %v1445_v4 }
 0x3bd   :  { %7379 = vst [vmem:[#allocation37_spill] sm:$0xff] %v4433_v37  ;;  %v1447_v61 = vmul.f32 %v4430_v15, %v4430_v15  ;;  %v1449_v58 = vmul.f32 %v4433_v37, %v4433_v37  ;;  %7380 = vst [vmem:[#allocation38_spill] sm:$0xff] %v4443_v6 }
 0x3be   :  { %7381 = vst [vmem:[#allocation39_spill] sm:$0xff] %v4445_v26  ;;  %v1112_v55 = vpop.f32.mrb[44].mxu0  ;;  %v1305_v32 = vpop.f32.mrb[44].mxu1  ;;  %v1534_v46 = vadd.f32 %v1533_v10, %v1446_v2  ;;  %v1608_v63 = vadd.f32 %v1607_v1, %v1448_v50 }
 0x3bf   :  { %v4448_v44 = vadd.f32 %v1112_v55, %v4443_v6  ;;  %v4451_v0 = vadd.f32 %v1305_v32, %v4443_v6  ;;  %v1114_v41 = vpop.f32.mrb[45].mxu0  ;;  %v1307_v22 = vpop.f32.mrb[45].mxu1  ;;  %v1571_v4 = vadd.f32 %v1570_v59, %v1447_v61  ;;  %v1645_v15 = vadd.f32 %v1644_v11, %v1449_v58 }
 0x3c0   :  { %v4454_v37 = vadd.f32 %v1114_v41, %v4443_v6  ;;  %v4457_v36 = vadd.f32 %v1307_v22, %v4443_v6  ;;  %v1116_v8 = vpop.f32.mrb[46].mxu0  ;;  %v1309_v30 = vpop.f32.mrb[46].mxu1 }
 0x3c1   :  { %7382 = vst [vmem:[#allocation40_spill] sm:$0xff] %v4448_v44  ;;  %7383 = vst [vmem:[#allocation41_spill] sm:$0xff] %v4451_v0  ;;  %v1450_v55 = vmul.f32 %v4448_v44, %v4448_v44  ;;  %v1452_v10 = vmul.f32 %v4451_v0, %v4451_v0  ;;  %v1118_v2 = vpop.f32.mrb[47].mxu0  ;;  %v1311_v1 = vpop.f32.mrb[47].mxu1  ;;  %v4464_v50 = vadd.f32 %v1116_v8, %v4445_v26 }
 0x3c2   :  { %7384 = vst [vmem:[#allocation42_spill] sm:$0xff] %v4454_v37  ;;  %7385 = vst [vmem:[#allocation43_spill] sm:$0xff] %v4457_v36  ;;  %v4467_v59 = vadd.f32 %v1309_v30, %v4445_v26  ;;  %v1451_v11 = vmul.f32 %v4454_v37, %v4454_v37  ;;  %v1453_v61 = vmul.f32 %v4457_v36, %v4457_v36  ;;  %v4487_v36 = vpop.permute.xlu1 %802 }
 0x3c3   :  { %7386 = vst [vmem:[#allocation44_spill] sm:$0xff] %v4464_v50  ;;  %v4474_v58 = vadd.f32 %v1118_v2, %v4445_v26  ;;  %v4477_v32 = vadd.f32 %v1311_v1, %v4445_v26  ;;  %v1535_v41 = vadd.f32 %v1534_v46, %v1450_v55  ;;  %v1609_v22 = vadd.f32 %v1608_v63, %v1452_v10  ;;  %v4489_v1 = vpop.permute.xlu0 %807 }
 0x3c4   :  { %7387 = vst [vmem:[#allocation45_spill] sm:$0xff] %v4467_v59  ;;  %v1454_v8 = vmul.f32 %v4464_v50, %v4464_v50  ;;  %v1456_v30 = vmul.f32 %v4467_v59, %v4467_v59  ;;  %v1572_v6 = vadd.f32 %v1571_v4, %v1451_v11  ;;  %v1646_v48 = vadd.f32 %v1645_v15, %v1453_v61 }
 0x3c5   :  { %7388 = vst [vmem:[#allocation46_spill] sm:$0xff] %v4474_v58  ;;  %7389 = vst [vmem:[#allocation47_spill] sm:$0xff] %v4477_v32  ;;  %v1455_v37 = vmul.f32 %v4474_v58, %v4474_v58  ;;  %v1457_v2 = vmul.f32 %v4477_v32, %v4477_v32 }
 0x3c6   :  { %7390 = vst [vmem:[#allocation48_spill] sm:$0xff] %v4487_v36  ;;  %7391 = vst [vmem:[#allocation49_spill] sm:$0xff] %v4489_v1  ;;  %v1122_v46 = vpop.f32.mrb[48].mxu0  ;;  %v1315_v63 = vpop.f32.mrb[48].mxu1  ;;  %v1536_v10 = vadd.f32 %v1535_v41, %v1454_v8  ;;  %v1610_v15 = vadd.f32 %v1609_v22, %v1456_v30 }
 0x3c7   :  { %v4492_v55 = vadd.f32 %v1122_v46, %v4487_v36  ;;  %v4495_v26 = vadd.f32 %v1315_v63, %v4487_v36  ;;  %v1124_v4 = vpop.f32.mrb[49].mxu0  ;;  %v1317_v11 = vpop.f32.mrb[49].mxu1  ;;  %v1573_v61 = vadd.f32 %v1572_v6, %v1455_v37  ;;  %v1647_v58 = vadd.f32 %v1646_v48, %v1457_v2 }
 0x3c8   :  { %v4498_v32 = vadd.f32 %v1124_v4, %v4487_v36  ;;  %v4501_v52 = vadd.f32 %v1317_v11, %v4487_v36  ;;  %v1126_v59 = vpop.f32.mrb[50].mxu0  ;;  %v1319_v50 = vpop.f32.mrb[50].mxu1 }
 0x3c9   :  { %7392 = vst [vmem:[#allocation50_spill] sm:$0xff] %v4492_v55  ;;  %7393 = vst [vmem:[#allocation51_spill] sm:$0xff] %v4495_v26  ;;  %v1458_v46 = vmul.f32 %v4492_v55, %v4492_v55  ;;  %v1460_v41 = vmul.f32 %v4495_v26, %v4495_v26  ;;  %v1128_v8 = vpop.f32.mrb[51].mxu0  ;;  %v1321_v22 = vpop.f32.mrb[51].mxu1  ;;  %v4508_v30 = vadd.f32 %v1126_v59, %v4489_v1 }
 0x3ca   :  { %7394 = vst [vmem:[#allocation52_spill] sm:$0xff] %v4498_v32  ;;  %7395 = vst [vmem:[#allocation53_spill] sm:$0xff] %v4501_v52  ;;  %v4511_v48 = vadd.f32 %v1319_v50, %v4489_v1  ;;  %v1459_v6 = vmul.f32 %v4498_v32, %v4498_v32  ;;  %v1461_v37 = vmul.f32 %v4501_v52, %v4501_v52  ;;  %v4531_v52 = vpop.permute.xlu1 %812 }
 0x3cb   :  { %7396 = vst [vmem:[#allocation54_spill] sm:$0xff] %v4508_v30  ;;  %v4518_v2 = vadd.f32 %v1128_v8, %v4489_v1  ;;  %v4521_v63 = vadd.f32 %v1321_v22, %v4489_v1  ;;  %v1537_v4 = vadd.f32 %v1536_v10, %v1458_v46  ;;  %v1611_v11 = vadd.f32 %v1610_v15, %v1460_v41  ;;  %v4533_v22 = vpop.permute.xlu0 %817 }
 0x3cc   :  { %7397 = vst [vmem:[#allocation55_spill] sm:$0xff] %v4511_v48  ;;  %v1462_v59 = vmul.f32 %v4508_v30, %v4508_v30  ;;  %v1464_v50 = vmul.f32 %v4511_v48, %v4511_v48  ;;  %v1574_v36 = vadd.f32 %v1573_v61, %v1459_v6  ;;  %v1648_v26 = vadd.f32 %v1647_v58, %v1461_v37 }
 0x3cd   :  { %7398 = vst [vmem:[#allocation56_spill] sm:$0xff] %v4518_v2  ;;  %7399 = vst [vmem:[#allocation57_spill] sm:$0xff] %v4521_v63  ;;  %v1463_v32 = vmul.f32 %v4518_v2, %v4518_v2  ;;  %v1465_v8 = vmul.f32 %v4521_v63, %v4521_v63 }
 0x3ce   :  { %7400 = vst [vmem:[#allocation58_spill] sm:$0xff] %v4531_v52  ;;  %7401 = vst [vmem:[#allocation59_spill] sm:$0xff] %v4533_v22  ;;  %v1132_v10 = vpop.f32.mrb[52].mxu0  ;;  %v1325_v15 = vpop.f32.mrb[52].mxu1  ;;  %v1538_v41 = vadd.f32 %v1537_v4, %v1462_v59  ;;  %v1612_v58 = vadd.f32 %v1611_v11, %v1464_v50 }
 0x3cf   :  { %v4536_v46 = vadd.f32 %v1132_v10, %v4531_v52  ;;  %v4539_v1 = vadd.f32 %v1325_v15, %v4531_v52  ;;  %v1134_v61 = vpop.f32.mrb[53].mxu0  ;;  %v1327_v6 = vpop.f32.mrb[53].mxu1  ;;  %v1575_v37 = vadd.f32 %v1574_v36, %v1463_v32  ;;  %v1649_v2 = vadd.f32 %v1648_v26, %v1465_v8 }
 0x3d0   :  { %v4542_v63 = vadd.f32 %v1134_v61, %v4531_v52  ;;  %v4545_v48 = vadd.f32 %v1327_v6, %v4531_v52  ;;  %v1136_v30 = vpop.f32.mrb[54].mxu0  ;;  %v1329_v55 = vpop.f32.mrb[54].mxu1 }
 0x3d1   :  { %7402 = vst [vmem:[#allocation60_spill] sm:$0xff] %v4536_v46  ;;  %7403 = vst [vmem:[#allocation61_spill] sm:$0xff] %v4539_v1  ;;  %v1466_v10 = vmul.f32 %v4536_v46, %v4536_v46  ;;  %v1468_v4 = vmul.f32 %v4539_v1, %v4539_v1  ;;  %v1138_v59 = vpop.f32.mrb[55].mxu0  ;;  %v1331_v11 = vpop.f32.mrb[55].mxu1  ;;  %v4552_v50 = vadd.f32 %v1136_v30, %v4533_v22 }
 0x3d2   :  { %7404 = vst [vmem:[#allocation62_spill] sm:$0xff] %v4542_v63  ;;  %7405 = vst [vmem:[#allocation63_spill] sm:$0xff] %v4545_v48  ;;  %v4555_v36 = vadd.f32 %v1329_v55, %v4533_v22  ;;  %v1467_v26 = vmul.f32 %v4542_v63, %v4542_v63  ;;  %v1469_v32 = vmul.f32 %v4545_v48, %v4545_v48  ;;  %v4575_v48 = vpop.permute.xlu1 %822 }
 0x3d3   :  { %7406 = vst [vmem:[#allocation64_spill] sm:$0xff] %v4552_v50  ;;  %v4562_v8 = vadd.f32 %v1138_v59, %v4533_v22  ;;  %v4565_v15 = vadd.f32 %v1331_v11, %v4533_v22  ;;  %v1539_v61 = vadd.f32 %v1538_v41, %v1466_v10  ;;  %v1613_v6 = vadd.f32 %v1612_v58, %v1468_v4  ;;  %v4577_v11 = vpop.permute.xlu0 %827 }
 0x3d4   :  { %7407 = vst [vmem:[#allocation65_spill] sm:$0xff] %v4555_v36  ;;  %v1470_v30 = vmul.f32 %v4552_v50, %v4552_v50  ;;  %v1472_v55 = vmul.f32 %v4555_v36, %v4555_v36  ;;  %v1576_v52 = vadd.f32 %v1575_v37, %v1467_v26  ;;  %v1650_v1 = vadd.f32 %v1649_v2, %v1469_v32 }
 0x3d5   :  { %7408 = vst [vmem:[#allocation66_spill] sm:$0xff] %v4562_v8  ;;  %7409 = vst [vmem:[#allocation67_spill] sm:$0xff] %v4565_v15  ;;  %v1471_v63 = vmul.f32 %v4562_v8, %v4562_v8  ;;  %v1473_v59 = vmul.f32 %v4565_v15, %v4565_v15 }
 0x3d6   :  { %7410 = vst [vmem:[#allocation68_spill] sm:$0xff] %v4575_v48  ;;  %7411 = vst [vmem:[#allocation69_spill] sm:$0xff] %v4577_v11  ;;  %v1142_v41 = vpop.f32.mrb[56].mxu0  ;;  %v1335_v58 = vpop.f32.mrb[56].mxu1  ;;  %v1540_v4 = vadd.f32 %v1539_v61, %v1470_v30  ;;  %v1614_v2 = vadd.f32 %v1613_v6, %v1472_v55 }
 0x3d7   :  { %v4580_v10 = vadd.f32 %v1142_v41, %v4575_v48  ;;  %v4583_v22 = vadd.f32 %v1335_v58, %v4575_v48  ;;  %v1144_v37 = vpop.f32.mrb[57].mxu0  ;;  %v1337_v26 = vpop.f32.mrb[57].mxu1  ;;  %v1577_v32 = vadd.f32 %v1576_v52, %v1471_v63  ;;  %v1651_v8 = vadd.f32 %v1650_v1, %v1473_v59 }
 0x3d8   :  { %v4586_v15 = vadd.f32 %v1144_v37, %v4575_v48  ;;  %v4589_v36 = vadd.f32 %v1337_v26, %v4575_v48  ;;  %v1146_v50 = vpop.f32.mrb[58].mxu0  ;;  %v1339_v46 = vpop.f32.mrb[58].mxu1 }
 0x3d9   :  { %7412 = vst [vmem:[#allocation70_spill] sm:$0xff] %v4580_v10  ;;  %7413 = vst [vmem:[#allocation71_spill] sm:$0xff] %v4583_v22  ;;  %v1474_v41 = vmul.f32 %v4580_v10, %v4580_v10  ;;  %v1476_v61 = vmul.f32 %v4583_v22, %v4583_v22  ;;  %v1148_v30 = vpop.f32.mrb[59].mxu0  ;;  %v1341_v6 = vpop.f32.mrb[59].mxu1  ;;  %v4596_v55 = vadd.f32 %v1146_v50, %v4577_v11 }
 0x3da   :  { %7414 = vst [vmem:[#allocation72_spill] sm:$0xff] %v4586_v15  ;;  %7415 = vst [vmem:[#allocation73_spill] sm:$0xff] %v4589_v36  ;;  %v4599_v52 = vadd.f32 %v1339_v46, %v4577_v11  ;;  %v1475_v1 = vmul.f32 %v4586_v15, %v4586_v15  ;;  %v1477_v63 = vmul.f32 %v4589_v36, %v4589_v36  ;;  %v4619_v36 = vpop.permute.xlu1 %832 }
 0x3db   :  { %7416 = vst [vmem:[#allocation74_spill] sm:$0xff] %v4596_v55  ;;  %v4606_v59 = vadd.f32 %v1148_v30, %v4577_v11  ;;  %v4609_v58 = vadd.f32 %v1341_v6, %v4577_v11  ;;  %v1541_v37 = vadd.f32 %v1540_v4, %v1474_v41  ;;  %v1615_v26 = vadd.f32 %v1614_v2, %v1476_v61  ;;  %v4621_v6 = vpop.permute.xlu0 %837 }
 0x3dc   :  { %7417 = vst [vmem:[#allocation75_spill] sm:$0xff] %v4599_v52  ;;  %v1478_v50 = vmul.f32 %v4596_v55, %v4596_v55  ;;  %v1480_v46 = vmul.f32 %v4599_v52, %v4599_v52  ;;  %v1578_v48 = vadd.f32 %v1577_v32, %v1475_v1  ;;  %v1652_v22 = vadd.f32 %v1651_v8, %v1477_v63 }
 0x3dd   :  { %7418 = vst [vmem:[#allocation76_spill] sm:$0xff] %v4606_v59  ;;  %7419 = vst [vmem:[#allocation77_spill] sm:$0xff] %v4609_v58  ;;  %v1479_v15 = vmul.f32 %v4606_v59, %v4606_v59  ;;  %v1481_v30 = vmul.f32 %v4609_v58, %v4609_v58 }
 0x3de   :  { %7420 = vst [vmem:[#allocation78_spill] sm:$0xff] %v4619_v36  ;;  %7421 = vst [vmem:[#allocation79_spill] sm:$0xff] %v4621_v6  ;;  %v1152_v4 = vpop.f32.mrb[60].mxu0  ;;  %v1345_v2 = vpop.f32.mrb[60].mxu1  ;;  %v1542_v61 = vadd.f32 %v1541_v37, %v1478_v50  ;;  %v1616_v8 = vadd.f32 %v1615_v26, %v1480_v46 }
 0x3df   :  { %v4624_v41 = vadd.f32 %v1152_v4, %v4619_v36  ;;  %v4627_v11 = vadd.f32 %v1345_v2, %v4619_v36  ;;  %v1154_v32 = vpop.f32.mrb[61].mxu0  ;;  %v1347_v1 = vpop.f32.mrb[61].mxu1  ;;  %v1579_v63 = vadd.f32 %v1578_v48, %v1479_v15  ;;  %v1653_v59 = vadd.f32 %v1652_v22, %v1481_v30 }
 0x3e0   :  { %v4630_v58 = vadd.f32 %v1154_v32, %v4619_v36  ;;  %v4633_v52 = vadd.f32 %v1347_v1, %v4619_v36  ;;  %v1156_v55 = vpop.f32.mrb[62].mxu0  ;;  %v1349_v10 = vpop.f32.mrb[62].mxu1 }
 0x3e1   :  { %7422 = vst [vmem:[#allocation80_spill] sm:$0xff] %v4624_v41  ;;  %7423 = vst [vmem:[#allocation81_spill] sm:$0xff] %v4627_v11  ;;  %v1482_v4 = vmul.f32 %v4624_v41, %v4624_v41  ;;  %v1484_v37 = vmul.f32 %v4627_v11, %v4627_v11  ;;  %v1158_v50 = vpop.f32.mrb[63].mxu0  ;;  %v1351_v26 = vpop.f32.mrb[63].mxu1  ;;  %v4640_v46 = vadd.f32 %v1156_v55, %v4621_v6 }
 0x3e2   :  { %7424 = vst [vmem:[#allocation82_spill] sm:$0xff] %v4630_v58  ;;  %7425 = vst [vmem:[#allocation83_spill] sm:$0xff] %v4633_v52  ;;  %v4643_v48 = vadd.f32 %v1349_v10, %v4621_v6  ;;  %v1483_v22 = vmul.f32 %v4630_v58, %v4630_v58  ;;  %v1485_v15 = vmul.f32 %v4633_v52, %v4633_v52  ;;  %v4663_v52 = vpop.permute.xlu1 %842 }
 0x3e3   :  { %7426 = vst [vmem:[#allocation84_spill] sm:$0xff] %v4640_v46  ;;  %v4650_v30 = vadd.f32 %v1158_v50, %v4621_v6  ;;  %v4653_v2 = vadd.f32 %v1351_v26, %v4621_v6  ;;  %v1543_v32 = vadd.f32 %v1542_v61, %v1482_v4  ;;  %v1617_v1 = vadd.f32 %v1616_v8, %v1484_v37  ;;  %v4665_v26 = vpop.permute.xlu0 %847 }
 0x3e4   :  { %7427 = vst [vmem:[#allocation85_spill] sm:$0xff] %v4643_v48  ;;  %v1486_v55 = vmul.f32 %v4640_v46, %v4640_v46  ;;  %v1488_v10 = vmul.f32 %v4643_v48, %v4643_v48  ;;  %v1580_v36 = vadd.f32 %v1579_v63, %v1483_v22  ;;  %v1654_v11 = vadd.f32 %v1653_v59, %v1485_v15 }
 0x3e5   :  { %7428 = vst [vmem:[#allocation86_spill] sm:$0xff] %v4650_v30  ;;  %7429 = vst [vmem:[#allocation87_spill] sm:$0xff] %v4653_v2  ;;  %v1487_v58 = vmul.f32 %v4650_v30, %v4650_v30  ;;  %v1489_v50 = vmul.f32 %v4653_v2, %v4653_v2 }
 0x3e6   :  { %7430 = vst [vmem:[#allocation88_spill] sm:$0xff] %v4663_v52  ;;  %7431 = vst [vmem:[#allocation89_spill] sm:$0xff] %v4665_v26  ;;  %v1162_v61 = vpop.f32.mrb[64].mxu0  ;;  %v1355_v8 = vpop.f32.mrb[64].mxu1  ;;  %v1544_v37 = vadd.f32 %v1543_v32, %v1486_v55  ;;  %v1618_v59 = vadd.f32 %v1617_v1, %v1488_v10 }
 0x3e7   :  { %v4668_v4 = vadd.f32 %v1162_v61, %v4663_v52  ;;  %v4671_v6 = vadd.f32 %v1355_v8, %v4663_v52  ;;  %v1164_v63 = vpop.f32.mrb[65].mxu0  ;;  %v1357_v22 = vpop.f32.mrb[65].mxu1  ;;  %v1581_v15 = vadd.f32 %v1580_v36, %v1487_v58  ;;  %v1655_v30 = vadd.f32 %v1654_v11, %v1489_v50 }
 0x3e8   :  { %v4674_v2 = vadd.f32 %v1164_v63, %v4663_v52  ;;  %v4677_v48 = vadd.f32 %v1357_v22, %v4663_v52  ;;  %v1166_v46 = vpop.f32.mrb[66].mxu0  ;;  %v1359_v41 = vpop.f32.mrb[66].mxu1 }
 0x3e9   :  { %7432 = vst [vmem:[#allocation90_spill] sm:$0xff] %v4668_v4  ;;  %7433 = vst [vmem:[#allocation91_spill] sm:$0xff] %v4671_v6  ;;  %v1490_v61 = vmul.f32 %v4668_v4, %v4668_v4  ;;  %v1492_v32 = vmul.f32 %v4671_v6, %v4671_v6  ;;  %v1168_v55 = vpop.f32.mrb[67].mxu0  ;;  %v1361_v1 = vpop.f32.mrb[67].mxu1  ;;  %v4684_v10 = vadd.f32 %v1166_v46, %v4665_v26 }
 0x3ea   :  { %7434 = vst [vmem:[#allocation92_spill] sm:$0xff] %v4674_v2  ;;  %7435 = vst [vmem:[#allocation93_spill] sm:$0xff] %v4677_v48  ;;  %v4687_v36 = vadd.f32 %v1359_v41, %v4665_v26  ;;  %v1491_v11 = vmul.f32 %v4674_v2, %v4674_v2  ;;  %v1493_v58 = vmul.f32 %v4677_v48, %v4677_v48  ;;  %v4707_v48 = vpop.permute.xlu1 %852 }
 0x3eb   :  { %7436 = vst [vmem:[#allocation94_spill] sm:$0xff] %v4684_v10  ;;  %v4694_v50 = vadd.f32 %v1168_v55, %v4665_v26  ;;  %v4697_v8 = vadd.f32 %v1361_v1, %v4665_v26  ;;  %v1545_v63 = vadd.f32 %v1544_v37, %v1490_v61  ;;  %v1619_v22 = vadd.f32 %v1618_v59, %v1492_v32  ;;  %v4709_v1 = vpop.permute.xlu0 %857 }
 0x3ec   :  { %7437 = vst [vmem:[#allocation95_spill] sm:$0xff] %v4687_v36  ;;  %v1494_v46 = vmul.f32 %v4684_v10, %v4684_v10  ;;  %v1496_v41 = vmul.f32 %v4687_v36, %v4687_v36  ;;  %v1582_v52 = vadd.f32 %v1581_v15, %v1491_v11  ;;  %v1656_v6 = vadd.f32 %v1655_v30, %v1493_v58 }
 0x3ed   :  { %7438 = vst [vmem:[#allocation96_spill] sm:$0xff] %v4694_v50  ;;  %7439 = vst [vmem:[#allocation97_spill] sm:$0xff] %v4697_v8  ;;  %v1495_v2 = vmul.f32 %v4694_v50, %v4694_v50  ;;  %v1497_v55 = vmul.f32 %v4697_v8, %v4697_v8 }
 0x3ee   :  { %7440 = vst [vmem:[#allocation98_spill] sm:$0xff] %v4707_v48  ;;  %7441 = vst [vmem:[#allocation99_spill] sm:$0xff] %v4709_v1  ;;  %v1172_v61 = vpop.f32.mrb[68].mxu0  ;;  %v1365_v32 = vpop.f32.mrb[68].mxu1  ;;  %v1546_v58 = vadd.f32 %v1545_v63, %v1494_v46  ;;  %v1620_v50 = vadd.f32 %v1619_v22, %v1496_v41 }
 0x3ef   :  { %v1583_v37 = vadd.f32 %v1582_v52, %v1495_v2  ;;  %v1657_v59 = vadd.f32 %v1656_v6, %v1497_v55  ;;  %v4712_v26 = vadd.f32 %v1172_v61, %v4707_v48  ;;  %v4715_v15 = vadd.f32 %v1365_v32, %v4707_v48  ;;  %v1174_v30 = vpop.f32.mrb[69].mxu0  ;;  %v1367_v11 = vpop.f32.mrb[69].mxu1 }
 0x3f0   :  { %v4718_v8 = vadd.f32 %v1174_v30, %v4707_v48  ;;  %v4721_v36 = vadd.f32 %v1367_v11, %v4707_v48  ;;  %v1176_v52 = vpop.f32.mrb[70].mxu0  ;;  %v1369_v6 = vpop.f32.mrb[70].mxu1 }
 0x3f1   :  { %7442 = vst [vmem:[#allocation100_spill] sm:$0xff] %v4712_v26  ;;  %7443 = vst [vmem:[#allocation101_spill] sm:$0xff] %v4715_v15  ;;  %v1498_v2 = vmul.f32 %v4712_v26, %v4712_v26  ;;  %v1500_v55 = vmul.f32 %v4715_v15, %v4715_v15  ;;  %v1178_v61 = vpop.f32.mrb[71].mxu0  ;;  %v1371_v32 = vpop.f32.mrb[71].mxu1  ;;  %v4728_v10 = vadd.f32 %v1176_v52, %v4709_v1 }
 0x3f2   :  { %7444 = vst [vmem:[#allocation102_spill] sm:$0xff] %v4718_v8  ;;  %7445 = vst [vmem:[#allocation103_spill] sm:$0xff] %v4721_v36  ;;  %v4731_v63 = vadd.f32 %v1369_v6, %v4709_v1  ;;  %v1499_v22 = vmul.f32 %v4718_v8, %v4718_v8  ;;  %v1501_v46 = vmul.f32 %v4721_v36, %v4721_v36  ;;  %v4751_v36 = vpop.permute.xlu1 %862 }
 0x3f3   :  { %7446 = vst [vmem:[#allocation104_spill] sm:$0xff] %v4728_v10  ;;  %v4738_v41 = vadd.f32 %v1178_v61, %v4709_v1  ;;  %v4741_v30 = vadd.f32 %v1371_v32, %v4709_v1  ;;  %v1547_v11 = vadd.f32 %v1546_v58, %v1498_v2  ;;  %v1621_v48 = vadd.f32 %v1620_v50, %v1500_v55  ;;  %v4753_v32 = vpop.permute.xlu0 %867 }
 0x3f4   :  { %7447 = vst [vmem:[#allocation105_spill] sm:$0xff] %v4731_v63  ;;  %v1502_v52 = vmul.f32 %v4728_v10, %v4728_v10  ;;  %v1504_v6 = vmul.f32 %v4731_v63, %v4731_v63  ;;  %v1584_v15 = vadd.f32 %v1583_v37, %v1499_v22  ;;  %v1658_v26 = vadd.f32 %v1657_v59, %v1501_v46 }
 0x3f5   :  { %7448 = vst [vmem:[#allocation106_spill] sm:$0xff] %v4738_v41  ;;  %7449 = vst [vmem:[#allocation107_spill] sm:$0xff] %v4741_v30  ;;  %v1503_v8 = vmul.f32 %v4738_v41, %v4738_v41  ;;  %v1505_v61 = vmul.f32 %v4741_v30, %v4741_v30 }
 0x3f6   :  { %7450 = vst [vmem:[#allocation108_spill] sm:$0xff] %v4751_v36  ;;  %7451 = vst [vmem:[#allocation109_spill] sm:$0xff] %v4753_v32  ;;  %v1182_v2 = vpop.f32.mrb[72].mxu0  ;;  %v1375_v55 = vpop.f32.mrb[72].mxu1  ;;  %v1548_v46 = vadd.f32 %v1547_v11, %v1502_v52  ;;  %v1622_v41 = vadd.f32 %v1621_v48, %v1504_v6 }
 0x3f7   :  { %v1585_v58 = vadd.f32 %v1584_v15, %v1503_v8  ;;  %v1659_v50 = vadd.f32 %v1658_v26, %v1505_v61  ;;  %v4756_v1 = vadd.f32 %v1182_v2, %v4751_v36  ;;  %v4759_v37 = vadd.f32 %v1375_v55, %v4751_v36  ;;  %v1184_v59 = vpop.f32.mrb[73].mxu0  ;;  %v1377_v22 = vpop.f32.mrb[73].mxu1 }
 0x3f8   :  { %v4762_v30 = vadd.f32 %v1184_v59, %v4751_v36  ;;  %v4765_v63 = vadd.f32 %v1377_v22, %v4751_v36  ;;  %v1186_v8 = vpop.f32.mrb[74].mxu0  ;;  %v1379_v26 = vpop.f32.mrb[74].mxu1 }
 0x3f9   :  { %7452 = vst [vmem:[#allocation110_spill] sm:$0xff] %v4756_v1  ;;  %7453 = vst [vmem:[#allocation111_spill] sm:$0xff] %v4759_v37  ;;  %v1506_v15 = vmul.f32 %v4756_v1, %v4756_v1  ;;  %v1508_v61 = vmul.f32 %v4759_v37, %v4759_v37  ;;  %v1188_v2 = vpop.f32.mrb[75].mxu0  ;;  %v1381_v55 = vpop.f32.mrb[75].mxu1  ;;  %v4772_v10 = vadd.f32 %v1186_v8, %v4753_v32 }
 0x3fa   :  { %7454 = vst [vmem:[#allocation112_spill] sm:$0xff] %v4762_v30  ;;  %7455 = vst [vmem:[#allocation113_spill] sm:$0xff] %v4765_v63  ;;  %v4775_v48 = vadd.f32 %v1379_v26, %v4753_v32  ;;  %v1507_v11 = vmul.f32 %v4762_v30, %v4762_v30  ;;  %v1509_v52 = vmul.f32 %v4765_v63, %v4765_v63  ;;  %v4795_v63 = vpop.permute.xlu1 %872 }
 0x3fb   :  { %7456 = vst [vmem:[#allocation114_spill] sm:$0xff] %v4772_v10  ;;  %v4782_v6 = vadd.f32 %v1188_v2, %v4753_v32  ;;  %v4785_v59 = vadd.f32 %v1381_v55, %v4753_v32  ;;  %v1549_v22 = vadd.f32 %v1548_v46, %v1506_v15  ;;  %v1623_v36 = vadd.f32 %v1622_v41, %v1508_v61  ;;  %v4797_v46 = vpop.permute.xlu0 %877 }
 0x3fc   :  { %7457 = vst [vmem:[#allocation115_spill] sm:$0xff] %v4775_v48  ;;  %v1510_v8 = vmul.f32 %v4772_v10, %v4772_v10  ;;  %v1512_v26 = vmul.f32 %v4775_v48, %v4775_v48  ;;  %v1586_v37 = vadd.f32 %v1585_v58, %v1507_v11  ;;  %v1660_v1 = vadd.f32 %v1659_v50, %v1509_v52 }
 0x3fd   :  { %7458 = vst [vmem:[#allocation116_spill] sm:$0xff] %v4782_v6  ;;  %7459 = vst [vmem:[#allocation117_spill] sm:$0xff] %v4785_v59  ;;  %v1511_v30 = vmul.f32 %v4782_v6, %v4782_v6  ;;  %v1513_v2 = vmul.f32 %v4785_v59, %v4785_v59 }
 0x3fe   :  { %7460 = vst [vmem:[#allocation118_spill] sm:$0xff] %v4795_v63  ;;  %v1550_v55 = vadd.f32 %v1549_v22, %v1510_v8  ;;  %v1624_v32 = vadd.f32 %v1623_v36, %v1512_v26  ;;  %7461 = vst [vmem:[#allocation119_spill] sm:$0xff] %v4797_v46  ;;  %v1192_v61 = vpop.f32.mrb[76].mxu0  ;;  %v1385_v10 = vpop.f32.mrb[76].mxu1 }
 0x3ff   :  { %v1587_v41 = vadd.f32 %v1586_v37, %v1511_v30  ;;  %v1661_v15 = vadd.f32 %v1660_v1, %v1513_v2  ;;  %v4800_v48 = vadd.f32 %v1192_v61, %v4795_v63  ;;  %v4803_v58 = vadd.f32 %v1385_v10, %v4795_v63  ;;  %v1194_v50 = vpop.f32.mrb[77].mxu0  ;;  %v1387_v11 = vpop.f32.mrb[77].mxu1 }
 0x400   :  { %v4806_v52 = vadd.f32 %v1194_v50, %v4795_v63  ;;  %v4809_v22 = vadd.f32 %v1387_v11, %v4795_v63  ;;  %v1196_v36 = vpop.f32.mrb[78].mxu0  ;;  %v1389_v8 = vpop.f32.mrb[78].mxu1 }
 0x401   :  { %7462 = vst [vmem:[#allocation120_spill] sm:$0xff] %v4800_v48  ;;  %7463 = vst [vmem:[#allocation121_spill] sm:$0xff] %v4803_v58  ;;  %v1514_v1 = vmul.f32 %v4800_v48, %v4800_v48  ;;  %v1516_v30 = vmul.f32 %v4803_v58, %v4803_v58  ;;  %v4816_v37 = vadd.f32 %v1196_v36, %v4797_v46  ;;  %v1198_v26 = vpop.f32.mrb[79].mxu0  ;;  %v1391_v2 = vpop.f32.mrb[79].mxu1 }
 0x402   :  { %7464 = vst [vmem:[#allocation122_spill] sm:$0xff] %v4806_v52  ;;  %7465 = vst [vmem:[#allocation123_spill] sm:$0xff] %v4809_v22  ;;  %v4819_v10 = vadd.f32 %v1389_v8, %v4797_v46  ;;  %v1515_v61 = vmul.f32 %v4806_v52, %v4806_v52  ;;  %v1517_v50 = vmul.f32 %v4809_v22, %v4809_v22 }
 0x403   :  { %7466 = vst [vmem:[#allocation124_spill] sm:$0xff] %v4816_v37  ;;  %v4826_v11 = vadd.f32 %v1198_v26, %v4797_v46  ;;  %v4829_v63 = vadd.f32 %v1391_v2, %v4797_v46  ;;  %v1551_v59 = vadd.f32 %v1550_v55, %v1514_v1  ;;  %v1625_v36 = vadd.f32 %v1624_v32, %v1516_v30 }
 0x404   :  { %7467 = vst [vmem:[#allocation125_spill] sm:$0xff] %v4819_v10  ;;  %v1518_v8 = vmul.f32 %v4816_v37, %v4816_v37  ;;  %v1520_v6 = vmul.f32 %v4819_v10, %v4819_v10  ;;  %v1588_v58 = vadd.f32 %v1587_v41, %v1515_v61  ;;  %v1662_v48 = vadd.f32 %v1661_v15, %v1517_v50 }
 0x405   :  { %7468 = vst [vmem:[#allocation126_spill] sm:$0xff] %v4826_v11  ;;  %7469 = vst [vmem:[#allocation127_spill] sm:$0xff] %v4829_v63  ;;  %v1519_v52 = vmul.f32 %v4826_v11, %v4826_v11  ;;  %v1521_v26 = vmul.f32 %v4829_v63, %v4829_v63 }
 0x406   :  { %v1552_v22 = vadd.f32 %v1551_v59, %v1518_v8  ;;  %v1626_v4 = vadd.f32 %v1625_v36, %v1520_v6  ;;  %v2068_v55 = vpop.f32.mrb[80].mxu0  ;;  %v2261_v32 = vpop.f32.mrb[80].mxu1 }
 0x407   :  { %v1589_v2 = vadd.f32 %v1588_v58, %v1519_v52  ;;  %v1663_v46 = vadd.f32 %v1662_v48, %v1521_v26  ;;  %v2070_v37 = vpop.f32.mrb[81].mxu0  ;;  %v2263_v0 = vpop.f32.mrb[81].mxu1  ;;  %v4840_v6 = vadd.f32 %v2068_v55, %v4109_v33  ;;  %v4843_v58 = vadd.f32 %v2261_v32, %v4109_v33 }
 0x408   :  { %v1553_v1 = vrot.slane %v1552_v22, 4  ;;  %v1627_v30 = vrot.slane %v1626_v4, 4  ;;  %v2072_v41 = vpop.f32.mrb[82].mxu0  ;;  %v2265_v15 = vpop.f32.mrb[82].mxu1  ;;  %v4846_v52 = vadd.f32 %v2070_v37, %v4109_v33  ;;  %v4863_v32 = vadd.f32 %v2263_v0, %v4109_v33 }
 0x409   :  { %v1590_v44 = vrot.slane %v1589_v2, 4  ;;  %v1664_v10 = vrot.slane %v1663_v46, 4  ;;  %v2074_v11 = vpop.f32.mrb[83].mxu0  ;;  %v2267_v25 = vpop.f32.mrb[83].mxu1  ;;  %7470 = vst [vmem:[#allocation128_spill] sm:$0xff] %v4840_v6  ;;  %7471 = vst [vmem:[#allocation129_spill] sm:$0xff] %v4843_v58  ;;  %v2420_v37 = vmul.f32 %v4840_v6, %v4840_v6 }
 0x40a   :  { %v1554_v61 = vadd.f32 %v1553_v1, %v1552_v22  ;;  %v1628_v50 = vadd.f32 %v1627_v30, %v1626_v4  ;;  %7472 = vst [vmem:[#allocation130_spill] sm:$0xff] %v4846_v52  ;;  %v4849_v22 = vadd.f32 %v2072_v41, %v4107_v29  ;;  %v4852_v4 = vadd.f32 %v2265_v15, %v4107_v29 }
 0x40b   :  { %v1591_v53 = vadd.f32 %v1590_v44, %v1589_v2  ;;  %v1665_v63 = vadd.f32 %v1664_v10, %v1663_v46  ;;  %v4855_v10 = vadd.f32 %v2074_v11, %v4107_v29  ;;  %v4858_v26 = vadd.f32 %v2267_v25, %v4107_v29  ;;  %7477 = vst [vmem:[#allocation135_spill] sm:$0xff] %v4863_v32 }
 0x40c   :  { %v1555_v48 = vrot.slane %v1554_v61, 2  ;;  %v1629_v59 = vrot.slane %v1628_v50, 2  ;;  %7473 = vst [vmem:[#allocation131_spill] sm:$0xff] %v4849_v22  ;;  %7474 = vst [vmem:[#allocation132_spill] sm:$0xff] %v4852_v4  ;;  %v2421_v11 = vmul.f32 %v4846_v52, %v4846_v52  ;;  %v2426_v33 = vmul.f32 %v4852_v4, %v4852_v4 }
 0x40d   :  { %v1592_v36 = vrot.slane %v1591_v53, 2  ;;  %v1666_v8 = vrot.slane %v1665_v63, 2  ;;  %7475 = vst [vmem:[#allocation133_spill] sm:$0xff] %v4855_v10  ;;  %7476 = vst [vmem:[#allocation134_spill] sm:$0xff] %v4858_v26  ;;  %v2427_v52 = vmul.f32 %v4858_v26, %v4858_v26  ;;  %v2423_v4 = vmul.f32 %v4863_v32, %v4863_v32 }
 0x40e   :  { %v1556_v44 = vadd.f32 %v1555_v48, %v1554_v61  ;;  %v1630_v46 = vadd.f32 %v1629_v59, %v1628_v50  ;;  %v2078_v1 = vpop.f32.mrb[84].mxu0  ;;  %v2271_v30 = vpop.f32.mrb[84].mxu1  ;;  %v2422_v61 = vmul.f32 %v4843_v58, %v4843_v58  ;;  %v2424_v50 = vmul.f32 %v4849_v22, %v4849_v22 }
 0x40f   :  { %v1593_v2 = vadd.f32 %v1592_v36, %v1591_v53  ;;  %v1667_v55 = vadd.f32 %v1666_v8, %v1665_v63  ;;  %v2080_v29 = vpop.f32.mrb[85].mxu0  ;;  %v2273_v25 = vpop.f32.mrb[85].mxu1  ;;  %v2425_v8 = vmul.f32 %v4855_v10, %v4855_v10 }
 0x410   :  { %v1557_v41 = vrot.slane %v1556_v44, 1  ;;  %v1631_v15 = vrot.slane %v1630_v46, 1  ;;  %v2082_v0 = vpop.f32.mrb[86].mxu0  ;;  %v2275_v48 = vpop.f32.mrb[86].mxu1 }
 0x411   :  { %v1594_v53 = vrot.slane %v1593_v2, 1  ;;  %v1668_v63 = vrot.slane %v1667_v55, 1  ;;  %v2084_v58 = vpop.f32.mrb[87].mxu0  ;;  %v2277_v6 = vpop.f32.mrb[87].mxu1 }
 0x412   :  { %v4873_v59 = vadd.f32 %v1557_v41, %v1556_v44  ;;  %v4875_v36 = vadd.f32 %v1631_v15, %v1630_v46  ;;  %v4888_v44 = vadd.f32 %v2078_v1, %v4147_v14  ;;  %v4892_v46 = vadd.f32 %v2271_v30, %v4147_v14 }
 0x413   :  { %v4881_v24 = vadd.f32 %v1594_v53, %v1593_v2  ;;  %v4883_v22 = vadd.f32 %v1668_v63, %v1667_v55  ;;  %v4895_v41 = vadd.f32 %v2080_v29, %v4147_v14  ;;  %v4898_v15 = vadd.f32 %v2273_v25, %v4147_v14 }
 0x414   :  { %7478 = vst [vmem:[#allocation136_spill] sm:$0xff] %v4888_v44  ;;  %3265 = vrsqrt.f32 %v4873_v59  ;;  %7479 = vst [vmem:[#allocation137_spill] sm:$0xff] %v4892_v46  ;;  %v2548_v2 = vadd.f32 %v2424_v50, %v2420_v37  ;;  %v2622_v55 = vadd.f32 %v2426_v33, %v2422_v61  ;;  %v2585_v1 = vadd.f32 %v2425_v8, %v2421_v11 }
 0x415   :  { %7480 = vst [vmem:[#allocation138_spill] sm:$0xff] %v4895_v41  ;;  %7481 = vst [vmem:[#allocation139_spill] sm:$0xff] %v4898_v15  ;;  %3267 = vrsqrt.f32 %v4875_v36  ;;  %v2659_v63 = vadd.f32 %v2427_v52, %v2423_v4  ;;  %vm1672_vm1 = vcmp.eq.f32.partialorder %v4873_v59, inf  ;;  %v2428_v37 = vmul.f32 %v4888_v44, %v4888_v44 }
 0x416   :  { %3269 = vrsqrt.f32 %v4881_v24  ;;  %v2088_v14 = vpop.f32.mrb[88].mxu0  ;;  %v2281_v25 = vpop.f32.mrb[88].mxu1  ;;  %v2430_v61 = vmul.f32 %v4892_v46, %v4892_v46  ;;  %v2429_v52 = vmul.f32 %v4895_v41, %v4895_v41  ;;  %v2431_v4 = vmul.f32 %v4898_v15, %v4898_v15 }
 0x417   :  { %3271 = vrsqrt.f32 %v4883_v22  ;;  %v2090_v11 = vpop.f32.mrb[89].mxu0  ;;  %v2283_v50 = vpop.f32.mrb[89].mxu1  ;;  %vm1674_vm2 = vcmp.eq.f32.partialorder %v4873_v59, 0.0  ;;  %vm1686_vm3 = vcmp.eq.f32.partialorder %v4875_v36, inf  ;;  %v4919_v33 = vadd.f32 %v2082_v0, %v4155_v27 }
 0x418   :  { %v4922_v8 = vadd.f32 %v2275_v48, %v4155_v27  ;;  %v4925_v29 = vadd.f32 %v2084_v58, %v4155_v27  ;;  %v4928_v30 = vadd.f32 %v2277_v6, %v4155_v27  ;;  %v2092_v26 = vpop.f32.mrb[90].mxu0  ;;  %v2285_v53 = vpop.f32.mrb[90].mxu1  ;;  %vm1688_vm4 = vcmp.eq.f32.partialorder %v4875_v36, 0.0 }
 0x419   :  { %7482 = vst [vmem:[#allocation140_spill] sm:$0xff] %v4919_v33  ;;  %vm1679_vm5 = vcmp.eq.f32.partialorder %v4881_v24, inf  ;;  %v2549_v15 = vadd.f32 %v2548_v2, %v2428_v37  ;;  %v2623_v32 = vadd.f32 %v2622_v55, %v2430_v61  ;;  %v2586_v41 = vadd.f32 %v2585_v1, %v2429_v52  ;;  %v2094_v10 = vpop.f32.mrb[91].mxu0  ;;  %v2287_v46 = vpop.f32.mrb[91].mxu1 }
 0x41a   :  { %7483 = vst [vmem:[#allocation141_spill] sm:$0xff] %v4922_v8  ;;  %7484 = vst [vmem:[#allocation142_spill] sm:$0xff] %v4925_v29  ;;  %v2660_v0 = vadd.f32 %v2659_v63, %v2431_v4  ;;  %vm1681_vm6 = vcmp.eq.f32.partialorder %v4881_v24, 0.0  ;;  %vm1693_vm7 = vcmp.eq.f32.partialorder %v4883_v22, inf  ;;  %v2432_v27 = vmul.f32 %v4919_v33, %v4919_v33 }
 0x41b   :  { %7485 = vst [vmem:[#allocation143_spill] sm:$0xff] %v4928_v30  ;;  %v2434_v6 = vmul.f32 %v4922_v8, %v4922_v8  ;;  %v2433_v58 = vmul.f32 %v4925_v29, %v4925_v29  ;;  %v2435_v48 = vmul.f32 %v4928_v30, %v4928_v30  ;;  %vm1695_vm8 = vcmp.eq.f32.partialorder %v4883_v22, 0.0 }
 0x41c   :  { %v4944_v2 = vadd.f32 %v2088_v14, %v4203_v16  ;;  %v4947_v55 = vadd.f32 %v2281_v25, %v4203_v16  ;;  %v4950_v1 = vadd.f32 %v2090_v11, %v4203_v16  ;;  %v4953_v63 = vadd.f32 %v2283_v50, %v4203_v16 }
 0x41d   :  { %v2550_v37 = vadd.f32 %v2549_v15, %v2432_v27  ;;  %v2624_v61 = vadd.f32 %v2623_v32, %v2434_v6  ;;  %v2587_v52 = vadd.f32 %v2586_v41, %v2433_v58  ;;  %v2661_v4 = vadd.f32 %v2660_v0, %v2435_v48 }
 0x41e   :  { %7486 = vst [vmem:[#allocation144_spill] sm:$0xff] %v4944_v2  ;;  %7487 = vst [vmem:[#allocation145_spill] sm:$0xff] %v4947_v55  ;;  %v3266_v29 = vpop.eup %3265  ;;  %v2436_v30 = vmul.f32 %v4944_v2, %v4944_v2  ;;  %v2438_v14 = vmul.f32 %v4947_v55, %v4947_v55  ;;  %v2437_v25 = vmul.f32 %v4950_v1, %v4950_v1  ;;  %v2098_v50 = vpop.f32.mrb[92].mxu0 }
 0x41f   :  { %7488 = vst [vmem:[#allocation146_spill] sm:$0xff] %v4950_v1  ;;  %7489 = vst [vmem:[#allocation147_spill] sm:$0xff] %v4953_v63  ;;  %v2439_v11 = vmul.f32 %v4953_v63, %v4953_v63  ;;  %v3268_v8 = vpop.eup %3267  ;;  %v1671_v16 = vmul.f32 %v3266_v29, %v4873_v59  ;;  %v4965_v32 = vadd.f32 %v2092_v26, %v4208_v45  ;;  %v2291_v0 = vpop.f32.mrb[92].mxu1 }
 0x420   :  { %v4968_v41 = vadd.f32 %v2285_v53, %v4208_v45  ;;  %v4971_v15 = vadd.f32 %v2094_v10, %v4208_v45  ;;  %v3270_v27 = vpop.eup %3269  ;;  %v1685_v6 = vmul.f32 %v3268_v8, %v4875_v36  ;;  %v2551_v58 = vadd.f32 %v2550_v37, %v2436_v30  ;;  %v2100_v1 = vpop.f32.mrb[93].mxu0 }
 0x421   :  { %7490 = vst [vmem:[#allocation148_spill] sm:$0xff] %v4965_v32  ;;  %v2625_v48 = vadd.f32 %v2624_v61, %v2438_v14  ;;  %v2588_v63 = vadd.f32 %v2587_v52, %v2437_v25  ;;  %v2293_v55 = vpop.f32.mrb[93].mxu1  ;;  %v3272_v29 = vpop.eup %3271  ;;  %v1673_v26 = vsel %vm1672_vm1, %v4873_v59, %v1671_v16  ;;  %v1678_v53 = vmul.f32 %v3270_v27, %v4881_v24 }
 0x422   :  { %7491 = vst [vmem:[#allocation149_spill] sm:$0xff] %v4968_v41  ;;  %7492 = vst [vmem:[#allocation150_spill] sm:$0xff] %v4971_v15  ;;  %v2662_v2 = vadd.f32 %v2661_v4, %v2439_v11  ;;  %v2440_v10 = vmul.f32 %v4965_v32, %v4965_v32  ;;  %v2102_v33 = vpop.f32.mrb[94].mxu0  ;;  %v2295_v44 = vpop.f32.mrb[94].mxu1  ;;  %v7493_v8 = vand.u32 2147483648, %v4873_v59  ;;  %v1687_v37 = vsel %vm1686_vm3, %v4875_v36, %v1685_v6  ;;  %v7597_v32 = vld [vmem:[#allocation47_spill] sm:$0xff] }
 0x423   :  { %v1692_v61 = vmul.f32 %v3272_v29, %v4883_v22  ;;  %v2442_v52 = vmul.f32 %v4968_v41, %v4968_v41  ;;  %v2104_v4 = vpop.f32.mrb[95].mxu0  ;;  %v2297_v14 = vpop.f32.mrb[95].mxu1  ;;  %v7494_v25 = vand.u32 2147483648, %v4875_v36  ;;  %v1680_v59 = vsel %vm1679_vm5, %v4881_v24, %v1678_v53 }
 0x424   :  { %v1676_v30 = vsel %vm1674_vm2, %v7493_v8, %v1673_v26  ;;  %v2552_v27 = vadd.f32 %v2551_v58, %v2440_v10  ;;  %v7495_v6 = vand.u32 2147483648, %v4881_v24  ;;  %v2441_v58 = vmul.f32 %v4971_v15, %v4971_v15  ;;  %v7564_v15 = vld [vmem:[#allocation46_spill] sm:$0xff] }
 0x425   :  { %v1690_v11 = vsel %vm1688_vm4, %v7494_v25, %v1687_v37  ;;  %v1698_v16 = vmax.f32 %v1676_v30, 1e-12  ;;  %v1694_v8 = vsel %vm1693_vm7, %v4883_v22, %v1692_v61  ;;  %v2626_v41 = vadd.f32 %v2625_v48, %v2442_v52 }
 0x426   :  { %v1700_v26 = vmax.f32 %v1690_v11, 1e-12  ;;  %v1683_v29 = vsel %vm1681_vm6, %v7495_v6, %v1680_v59  ;;  %v7496_v30 = vand.u32 2147483648, %v4883_v22  ;;  %v5011_v24 = vadd.f32 %v2287_v46, %v4208_v45  ;;  %v2108_v22 = vpop.f32.mrb[96].mxu0  ;;  %v2301_v25 = vpop.f32.mrb[96].mxu1 }
 0x427   :  { %3273 = vrcp.f32 %v1698_v16  ;;  %v1699_v36 = vmax.f32 %v1683_v29, 1e-12  ;;  %v5014_v10 = vadd.f32 %v2098_v50, %v4253_v7  ;;  %v2589_v48 = vadd.f32 %v2588_v63, %v2441_v58  ;;  %v2110_v50 = vpop.f32.mrb[97].mxu0  ;;  %v2303_v63 = vpop.f32.mrb[97].mxu1 }
 0x428   :  { %v1697_v37 = vsel %vm1695_vm8, %v7496_v30, %v1694_v8  ;;  %3275 = vrcp.f32 %v1700_v26  ;;  %7497 = vst [vmem:[#allocation151_spill] sm:$0xff] %v5011_v24  ;;  %v5017_v61 = vadd.f32 %v2291_v0, %v4253_v7  ;;  %v5020_v52 = vadd.f32 %v2100_v1, %v4253_v7  ;;  %v2112_v26 = vpop.f32.mrb[98].mxu0  ;;  %v2305_v6 = vpop.f32.mrb[98].mxu1 }
 0x429   :  { %v1701_v53 = vmax.f32 %v1697_v37, 1e-12  ;;  %7498 = vst [vmem:[#allocation152_spill] sm:$0xff] %v5014_v10  ;;  %3277 = vrcp.f32 %v1699_v36  ;;  %v2443_v11 = vmul.f32 %v5011_v24, %v5011_v24  ;;  %v2444_v45 = vmul.f32 %v5014_v10, %v5014_v10  ;;  %v5044_v36 = vpop.f32.mrb[99].mxu0  ;;  %v5046_v30 = vpop.f32.mrb[99].mxu1 }
 0x42a   :  { %7499 = vst [vmem:[#allocation153_spill] sm:$0xff] %v5017_v61  ;;  %7500 = vst [vmem:[#allocation154_spill] sm:$0xff] %v5020_v52  ;;  %v5027_v46 = vadd.f32 %v2293_v55, %v4253_v7  ;;  %v2446_v0 = vmul.f32 %v5017_v61, %v5017_v61  ;;  %v2445_v1 = vmul.f32 %v5020_v52, %v5020_v52 }
 0x42b   :  { %3279 = vrcp.f32 %v1701_v53  ;;  %v5034_v16 = vadd.f32 %v2102_v33, %v4258_v42  ;;  %v5037_v59 = vadd.f32 %v2295_v44, %v4258_v42  ;;  %v2663_v29 = vadd.f32 %v2662_v2, %v2443_v11 }
 0x42c   :  { %7501 = vst [vmem:[#allocation155_spill] sm:$0xff] %v5027_v46  ;;  %v2553_v8 = vadd.f32 %v2552_v27, %v2444_v45  ;;  %v2447_v7 = vmul.f32 %v5027_v46, %v5027_v46  ;;  %v5042_v55 = vadd.f32 %v2104_v4, %v4258_v42  ;;  %v2627_v37 = vadd.f32 %v2626_v41, %v2446_v0 }
 0x42d   :  { %7502 = vst [vmem:[#allocation156_spill] sm:$0xff] %v5034_v16  ;;  %7503 = vst [vmem:[#allocation157_spill] sm:$0xff] %v5037_v59  ;;  %v2590_v33 = vadd.f32 %v2589_v48, %v2445_v1  ;;  %v2448_v44 = vmul.f32 %v5034_v16, %v5034_v16  ;;  %v2450_v58 = vmul.f32 %v5037_v59, %v5037_v59 }
 0x42e   :  { %7504 = vst [vmem:[#allocation158_spill] sm:$0xff] %v5042_v55  ;;  %v5052_v2 = vadd.f32 %v2663_v29, %v2447_v7  ;;  %v2449_v27 = vmul.f32 %v5042_v55, %v5042_v55  ;;  %v5057_v4 = vadd.f32 %v2297_v14, %v4258_v42  ;;  %v5060_v53 = vadd.f32 %v2108_v22, %v4303_v34  ;;  %v5101_v7 = vpop.f32.mrb[100].mxu0 }
 0x42f   :  { %v5062_v11 = vadd.f32 %v2553_v8, %v2448_v44  ;;  %v5064_v41 = vadd.f32 %v2627_v37, %v2450_v58  ;;  %v5067_v48 = vadd.f32 %v2301_v25, %v4303_v34  ;;  %v5070_v45 = vadd.f32 %v2110_v50, %v4303_v34 }
 0x430   :  { %7505 = vst [vmem:[#allocation159_spill] sm:$0xff] %v5057_v4  ;;  %7506 = vst [vmem:[#allocation160_spill] sm:$0xff] %v5060_v53  ;;  %v5072_v0 = vadd.f32 %v2590_v33, %v2449_v27  ;;  %v5076_v1 = vmul.f32 %v5057_v4, %v5057_v4  ;;  %v5080_v42 = vmul.f32 %v5060_v53, %v5060_v53 }
 0x431   :  { %7507 = vst [vmem:[#allocation161_spill] sm:$0xff] %v5067_v48  ;;  %7508 = vst [vmem:[#allocation162_spill] sm:$0xff] %v5070_v45  ;;  %v5083_v14 = vadd.f32 %v2303_v63, %v4303_v34  ;;  %v5085_v22 = vpop.eup %3273  ;;  %v5089_v25 = vmul.f32 %v5067_v48, %v5067_v48  ;;  %v5093_v50 = vmul.f32 %v5070_v45, %v5070_v45  ;;  %v5103_v34 = vpop.f32.mrb[100].mxu1  ;;  %v7568_v48 = vld [vmem:[#allocation66_spill] sm:$0xff] }
 0x432   :  { %v5096_v29 = vadd.f32 %v2112_v26, %v4308_v31  ;;  %v5099_v8 = vadd.f32 %v2305_v6, %v4308_v31  ;;  %v5105_v63 = vpop.eup %3275  ;;  %v1703_v37 = vmul.f32 %v5085_v22, %v4118_v39  ;;  %v1710_v33 = vmul.f32 %v5085_v22, %v4112_v35  ;;  %v5115_v6 = vpop.f32.mrb[101].mxu0 }
 0x433   :  { %7509 = vst [vmem:[#allocation163_spill] sm:$0xff] %v5083_v14  ;;  %v1714_v44 = vmul.f32 %v5085_v22, %v4162_v20  ;;  %v1718_v26 = vmul.f32 %v5085_v22, %v4178_v28  ;;  %v5117_v58 = vpop.f32.mrb[101].mxu1  ;;  %v5119_v27 = vpop.eup %3277  ;;  %v1707_v4 = vmul.f32 %v5105_v63, %v4121_v49  ;;  %v1712_v39 = vmul.f32 %v5105_v63, %v4115_v60 }
 0x434   :  { %v1716_v35 = vmul.f32 %v5105_v63, %v4165_v3  ;;  %v1720_v20 = vmul.f32 %v5105_v63, %v4181_v23  ;;  %v5129_v46 = vpop.f32.mrb[102].mxu0  ;;  %v5131_v28 = vpop.f32.mrb[102].mxu1  ;;  %v1722_v45 = vmul.f32 %v5085_v22, %v4212_v47  ;;  %v1724_v49 = vmul.f32 %v5105_v63, %v4215_v19  ;;  %1834 = vst [vmem:[%s7096_s5] sm:$0xff] %v1703_v37 }
 0x435   :  { %v5133_v24 = vpop.eup %3279  ;;  %v1726_v60 = vmul.f32 %v5085_v22, %v4228_v51  ;;  %v1728_v3 = vmul.f32 %v5105_v63, %v4231_v62  ;;  %1838 = vst [vmem:[%s7096_s5 + $0x20] sm:$0xff] %v1710_v33  ;;  %1842 = vst [vmem:[%s7096_s5 + $0x40] sm:$0xff] %v1714_v44  ;;  %v5155_v23 = vpop.f32.mrb[103].mxu0  ;;  %v1730_v19 = vmul.f32 %v5085_v22, %v4262_v21 }
 0x436   :  { %1846 = vst [vmem:[%s7096_s5 + $0x60] sm:$0xff] %v1718_v26  ;;  %v5157_v47 = vpop.f32.mrb[103].mxu1  ;;  %v1732_v51 = vmul.f32 %v5105_v63, %v4265_v43  ;;  %v1734_v62 = vmul.f32 %v5085_v22, %v4278_v18  ;;  %v1736_v37 = vmul.f32 %v5105_v63, %v4281_v12  ;;  %1836 = vst [vmem:[%s7096_s5 + $0x10] sm:$0xff] %v1707_v4  ;;  %v7514_v26 = vld [vmem:[#allocation41_spill] sm:$0xff] }
 0x437   :  { %1840 = vst [vmem:[%s7096_s5 + $0x30] sm:$0xff] %v1712_v39  ;;  %1844 = vst [vmem:[%s7096_s5 + $0x50] sm:$0xff] %v1716_v35  ;;  %v1738_v21 = vmul.f32 %v5085_v22, %v4312_v17  ;;  %v1740_v43 = vmul.f32 %v5105_v63, %v4315_v54  ;;  %v1742_v18 = vmul.f32 %v5085_v22, %v4328_v40  ;;  %v7515_v35 = vld [vmem:[#allocation44_spill] sm:$0xff] }
 0x438   :  { %1848 = vst [vmem:[%s7096_s5 + $0x70] sm:$0xff] %v1720_v20  ;;  %v1744_v12 = vmul.f32 %v5105_v63, %v4331_v38  ;;  %1850 = vst [vmem:[%s7096_s5 + $0x80] sm:$0xff] %v1722_v45  ;;  %v1746_v17 = vmul.f32 %v5085_v22, %v4360_v13  ;;  %v1748_v54 = vmul.f32 %v5105_v63, %v4363_v9  ;;  %v7510_v9 = vld [vmem:[#allocation31_spill] sm:$0xff] }
 0x439   :  { %1852 = vst [vmem:[%s7096_s5 + $0x90] sm:$0xff] %v1724_v49  ;;  %1854 = vst [vmem:[%s7096_s5 + $0xa0] sm:$0xff] %v1726_v60  ;;  %v1750_v40 = vmul.f32 %v5085_v22, %v4376_v5  ;;  %v1752_v38 = vmul.f32 %v5105_v63, %v4379_v57  ;;  %v1754_v13 = vmul.f32 %v5085_v22, %v4404_v56  ;;  %v7511_v57 = vld [vmem:[#allocation34_spill] sm:$0xff]  ;;  %v7512_v45 = vld [vmem:[#allocation35_spill] sm:$0xff] }
 0x43a   :  { %1856 = vst [vmem:[%s7096_s5 + $0xb0] sm:$0xff] %v1728_v3  ;;  %1858 = vst [vmem:[%s7096_s5 + $0xc0] sm:$0xff] %v1730_v19  ;;  %v1756_v5 = vmul.f32 %v5105_v63, %v7510_v9  ;;  %v1758_v4 = vmul.f32 %v5085_v22, %v7511_v57  ;;  %v1760_v33 = vmul.f32 %v5105_v63, %v7512_v45  ;;  %v7513_v56 = vld [vmem:[#allocation40_spill] sm:$0xff]  ;;  %v7516_v49 = vld [vmem:[#allocation45_spill] sm:$0xff]  ;;  %v5259_v3 = vpop.f32.mrb[104].mxu0  ;;  %v5261_v19 = vpop.f32.mrb[104].mxu1 }
 0x43b   :  { %1860 = vst [vmem:[%s7096_s5 + $0xd0] sm:$0xff] %v1732_v51  ;;  %1862 = vst [vmem:[%s7096_s5 + $0xe0] sm:$0xff] %v1734_v62  ;;  %v1762_v44 = vmul.f32 %v5085_v22, %v7513_v56  ;;  %v1764_v39 = vmul.f32 %v5105_v63, %v7514_v26  ;;  %v1766_v20 = vmul.f32 %v5085_v22, %v7515_v35  ;;  %v7517_v51 = vld [vmem:[#allocation50_spill] sm:$0xff]  ;;  %v7523_v45 = vld [vmem:[#allocation64_spill] sm:$0xff] }
 0x43c   :  { %1864 = vst [vmem:[%s7096_s5 + $0xf0] sm:$0xff] %v1736_v37  ;;  %1866 = vst [vmem:[%s7096_s5 + $0x100] sm:$0xff] %v1738_v21  ;;  %v1768_v60 = vmul.f32 %v5105_v63, %v7516_v49  ;;  %v1770_v62 = vmul.f32 %v5085_v22, %v7517_v51  ;;  %v7518_v37 = vld [vmem:[#allocation51_spill] sm:$0xff]  ;;  %v7524_v56 = vld [vmem:[#allocation65_spill] sm:$0xff] }
 0x43d   :  { %1868 = vst [vmem:[%s7096_s5 + $0x110] sm:$0xff] %v1740_v43  ;;  %1870 = vst [vmem:[%s7096_s5 + $0x120] sm:$0xff] %v1742_v18  ;;  %v1772_v21 = vmul.f32 %v5105_v63, %v7518_v37  ;;  %v7519_v43 = vld [vmem:[#allocation54_spill] sm:$0xff] }
 0x43e   :  { %1872 = vst [vmem:[%s7096_s5 + $0x130] sm:$0xff] %v1744_v12  ;;  %1874 = vst [vmem:[%s7096_s5 + $0x140] sm:$0xff] %v1746_v17  ;;  %v1774_v18 = vmul.f32 %v5085_v22, %v7519_v43  ;;  %v7520_v12 = vld [vmem:[#allocation55_spill] sm:$0xff]  ;;  %v7525_v35 = vld [vmem:[#allocation70_spill] sm:$0xff] }
 0x43f   :  { %1876 = vst [vmem:[%s7096_s5 + $0x150] sm:$0xff] %v1748_v54  ;;  %1878 = vst [vmem:[%s7096_s5 + $0x160] sm:$0xff] %v1750_v40  ;;  %v1776_v17 = vmul.f32 %v5105_v63, %v7520_v12  ;;  %v5283_v54 = vpop.f32.mrb[105].mxu0  ;;  %v5285_v40 = vpop.f32.mrb[105].mxu1  ;;  %v1786_v49 = vmul.f32 %v5085_v22, %v7525_v35  ;;  %v7527_v37 = vld [vmem:[#allocation74_spill] sm:$0xff]  ;;  %v7528_v43 = vld [vmem:[#allocation75_spill] sm:$0xff] }
 0x440   :  { %1880 = vst [vmem:[%s7096_s5 + $0x170] sm:$0xff] %v1752_v38  ;;  %1882 = vst [vmem:[%s7096_s5 + $0x180] sm:$0xff] %v1754_v13  ;;  %v7521_v38 = vld [vmem:[#allocation60_spill] sm:$0xff]  ;;  %v7522_v13 = vld [vmem:[#allocation61_spill] sm:$0xff]  ;;  %v5309_v26 = vpop.f32.mrb[106].mxu1 }
 0x441   :  { %1884 = vst [vmem:[%s7096_s5 + $0x190] sm:$0xff] %v1756_v5  ;;  %1886 = vst [vmem:[%s7096_s5 + $0x1a0] sm:$0xff] %v1758_v4  ;;  %v1778_v9 = vmul.f32 %v5085_v22, %v7521_v38  ;;  %v1780_v57 = vmul.f32 %v5105_v63, %v7522_v13  ;;  %v1782_v5 = vmul.f32 %v5085_v22, %v7523_v45  ;;  %v5333_v12 = vpop.f32.mrb[107].mxu1  ;;  %v7529_v38 = vld [vmem:[#allocation80_spill] sm:$0xff]  ;;  %v7532_v35 = vld [vmem:[#allocation85_spill] sm:$0xff] }
 0x442   :  { %1888 = vst [vmem:[%s7096_s5 + $0x1b0] sm:$0xff] %v1760_v33  ;;  %v1784_v4 = vmul.f32 %v5105_v63, %v7524_v56  ;;  %1890 = vst [vmem:[%s7096_s5 + $0x1c0] sm:$0xff] %v1762_v44  ;;  %v5307_v33 = vpop.f32.mrb[106].mxu0  ;;  %v7526_v44 = vld [vmem:[#allocation71_spill] sm:$0xff]  ;;  %v1794_v13 = vmul.f32 %v5085_v22, %v7529_v38  ;;  %v7531_v56 = vld [vmem:[#allocation84_spill] sm:$0xff] }
 0x443   :  { %1892 = vst [vmem:[%s7096_s5 + $0x1d0] sm:$0xff] %v1764_v39  ;;  %1894 = vst [vmem:[%s7096_s5 + $0x1e0] sm:$0xff] %v1766_v20  ;;  %v1788_v51 = vmul.f32 %v5105_v63, %v7526_v44  ;;  %v1790_v39 = vmul.f32 %v5085_v22, %v7527_v37  ;;  %v1792_v20 = vmul.f32 %v5105_v63, %v7528_v43  ;;  %v7534_v37 = vld [vmem:[#allocation91_spill] sm:$0xff]  ;;  %v7535_v38 = vld [vmem:[#allocation94_spill] sm:$0xff] }
 0x444   :  { %1896 = vst [vmem:[%s7096_s5 + $0x1f0] sm:$0xff] %v1768_v60  ;;  %1898 = vst [vmem:[%s7096_s5 + $0x200] sm:$0xff] %v1770_v62  ;;  %v5331_v60 = vpop.f32.mrb[107].mxu0  ;;  %v7530_v62 = vld [vmem:[#allocation81_spill] sm:$0xff]  ;;  %v1804_v43 = vmul.f32 %v5105_v63, %v7534_v37 }
 0x445   :  { %1900 = vst [vmem:[%s7096_s5 + $0x210] sm:$0xff] %v1772_v21  ;;  %1902 = vst [vmem:[%s7096_s5 + $0x220] sm:$0xff] %v1774_v18  ;;  %v1796_v45 = vmul.f32 %v5105_v63, %v7530_v62  ;;  %v1798_v21 = vmul.f32 %v5085_v22, %v7531_v56  ;;  %v1800_v18 = vmul.f32 %v5105_v63, %v7532_v35  ;;  %v7536_v62 = vld [vmem:[#allocation95_spill] sm:$0xff]  ;;  %v7538_v56 = vld [vmem:[#allocation101_spill] sm:$0xff] }
 0x446   :  { %1904 = vst [vmem:[%s7096_s5 + $0x230] sm:$0xff] %v1776_v17  ;;  %1906 = vst [vmem:[%s7096_s5 + $0x240] sm:$0xff] %v1778_v9  ;;  %v7533_v17 = vld [vmem:[#allocation90_spill] sm:$0xff]  ;;  %v1806_v9 = vmul.f32 %v5085_v22, %v7535_v38  ;;  %v1812_v35 = vmul.f32 %v5105_v63, %v7538_v56  ;;  %v7540_v37 = vld [vmem:[#allocation105_spill] sm:$0xff] }
 0x447   :  { %1908 = vst [vmem:[%s7096_s5 + $0x250] sm:$0xff] %v1780_v57  ;;  %1910 = vst [vmem:[%s7096_s5 + $0x260] sm:$0xff] %v1782_v5  ;;  %v1802_v44 = vmul.f32 %v5085_v22, %v7533_v17  ;;  %v1808_v57 = vmul.f32 %v5105_v63, %v7536_v62  ;;  %v7537_v5 = vld [vmem:[#allocation100_spill] sm:$0xff]  ;;  %v7542_v38 = vld [vmem:[#allocation111_spill] sm:$0xff] }
 0x448   :  { %1912 = vst [vmem:[%s7096_s5 + $0x270] sm:$0xff] %v1784_v4  ;;  %1914 = vst [vmem:[%s7096_s5 + $0x280] sm:$0xff] %v1786_v49  ;;  %v1810_v4 = vmul.f32 %v5085_v22, %v7537_v5  ;;  %v7539_v17 = vld [vmem:[#allocation104_spill] sm:$0xff]  ;;  %v1820_v62 = vmul.f32 %v5105_v63, %v7542_v38  ;;  %v7543_v5 = vld [vmem:[#allocation114_spill] sm:$0xff] }
 0x449   :  { %1916 = vst [vmem:[%s7096_s5 + $0x290] sm:$0xff] %v1788_v51  ;;  %1918 = vst [vmem:[%s7096_s5 + $0x2a0] sm:$0xff] %v1790_v39  ;;  %v1814_v49 = vmul.f32 %v5085_v22, %v7539_v17  ;;  %v1816_v51 = vmul.f32 %v5105_v63, %v7540_v37  ;;  %v7541_v39 = vld [vmem:[#allocation110_spill] sm:$0xff]  ;;  %v7544_v56 = vld [vmem:[#allocation115_spill] sm:$0xff] }
 0x44a   :  { %1920 = vst [vmem:[%s7096_s5 + $0x2b0] sm:$0xff] %v1792_v20  ;;  %1922 = vst [vmem:[%s7096_s5 + $0x2c0] sm:$0xff] %v1794_v13  ;;  %v1818_v20 = vmul.f32 %v5085_v22, %v7541_v39  ;;  %v1822_v13 = vmul.f32 %v5085_v22, %v7543_v5  ;;  %v7546_v17 = vld [vmem:[#allocation121_spill] sm:$0xff]  ;;  %v7547_v39 = vld [vmem:[#allocation124_spill] sm:$0xff] }
 0x44b   :  { %1924 = vst [vmem:[%s7096_s5 + $0x2d0] sm:$0xff] %v1796_v45  ;;  %1926 = vst [vmem:[%s7096_s5 + $0x2e0] sm:$0xff] %v1798_v21  ;;  %v1824_v45 = vmul.f32 %v5105_v63, %v7544_v56  ;;  %v7545_v21 = vld [vmem:[#allocation120_spill] sm:$0xff]  ;;  %v1828_v37 = vmul.f32 %v5105_v63, %v7546_v17  ;;  %v7548_v38 = vld [vmem:[#allocation125_spill] sm:$0xff] }
 0x44c   :  { %1928 = vst [vmem:[%s7096_s5 + $0x2f0] sm:$0xff] %v1800_v18  ;;  %1930 = vst [vmem:[%s7096_s5 + $0x300] sm:$0xff] %v1802_v44  ;;  %v1826_v18 = vmul.f32 %v5085_v22, %v7545_v21  ;;  %v1830_v44 = vmul.f32 %v5085_v22, %v7547_v39  ;;  %v5435_v22 = vpop.f32.mrb[108].mxu0  ;;  %v7554_v21 = vld [vmem:[#allocation13_spill] sm:$0xff]  ;;  %v7555_v39 = vld [vmem:[#allocation15_spill] sm:$0xff] }
 0x44d   :  { %1932 = vst [vmem:[%s7096_s5 + $0x310] sm:$0xff] %v1804_v43  ;;  %1934 = vst [vmem:[%s7096_s5 + $0x320] sm:$0xff] %v1806_v9  ;;  %v1832_v43 = vmul.f32 %v5105_v63, %v7548_v38  ;;  %v5437_v9 = vpop.f32.mrb[108].mxu1  ;;  %v7549_v63 = vld [vmem:[#allocation5_spill] sm:$0xff]  ;;  %v5459_v5 = vpop.f32.mrb[109].mxu0  ;;  %v1727_v17 = vmul.f32 %v5119_v27, %v7554_v21  ;;  %v7560_v21 = vld [vmem:[#allocation27_spill] sm:$0xff] }
 0x44e   :  { %1936 = vst [vmem:[%s7096_s5 + $0x330] sm:$0xff] %v1808_v57  ;;  %1938 = vst [vmem:[%s7096_s5 + $0x340] sm:$0xff] %v1810_v4  ;;  %v1705_v57 = vmul.f32 %v5119_v27, %v7549_v63  ;;  %v7550_v4 = vld [vmem:[#allocation3_spill] sm:$0xff]  ;;  %v5461_v56 = vpop.f32.mrb[109].mxu1  ;;  %v7556_v38 = vld [vmem:[#allocation17_spill] sm:$0xff]  ;;  %v5483_v63 = vpop.f32.mrb[110].mxu0  ;;  %v1751_v52 = vmul.f32 %v5119_v27, %v7560_v21 }
 0x44f   :  { %1940 = vst [vmem:[%s7096_s5 + $0x350] sm:$0xff] %v1812_v35  ;;  %1942 = vst [vmem:[%s7096_s5 + $0x360] sm:$0xff] %v1814_v49  ;;  %v1711_v35 = vmul.f32 %v5119_v27, %v7550_v4  ;;  %v7551_v49 = vld [vmem:[#allocation7_spill] sm:$0xff]  ;;  %v5485_v4 = vpop.f32.mrb[110].mxu1  ;;  %v7563_v21 = vld [vmem:[#allocation42_spill] sm:$0xff] }
 0x450   :  { %1944 = vst [vmem:[%s7096_s5 + $0x370] sm:$0xff] %v1816_v51  ;;  %1946 = vst [vmem:[%s7096_s5 + $0x380] sm:$0xff] %v1818_v20  ;;  %v1715_v51 = vmul.f32 %v5119_v27, %v7551_v49  ;;  %v7552_v20 = vld [vmem:[#allocation9_spill] sm:$0xff] }
 0x451   :  { %1948 = vst [vmem:[%s7096_s5 + $0x390] sm:$0xff] %v1820_v62  ;;  %1950 = vst [vmem:[%s7096_s5 + $0x3a0] sm:$0xff] %v1822_v13  ;;  %v1719_v62 = vmul.f32 %v5119_v27, %v7552_v20  ;;  %v7553_v13 = vld [vmem:[#allocation11_spill] sm:$0xff] }
 0x452   :  { %1952 = vst [vmem:[%s7096_s5 + $0x3b0] sm:$0xff] %v1824_v45  ;;  %1954 = vst [vmem:[%s7096_s5 + $0x3c0] sm:$0xff] %v1826_v18  ;;  %v1723_v45 = vmul.f32 %v5119_v27, %v7553_v13  ;;  %v1731_v18 = vmul.f32 %v5119_v27, %v7555_v39  ;;  %v7559_v13 = vld [vmem:[#allocation25_spill] sm:$0xff]  ;;  %v5507_v39 = vpop.f32.mrb[111].mxu0 }
 0x453   :  { %1956 = vst [vmem:[%s7096_s5 + $0x3d0] sm:$0xff] %v1828_v37  ;;  %1958 = vst [vmem:[%s7096_s5 + $0x3e0] sm:$0xff] %v1830_v44  ;;  %v1735_v37 = vmul.f32 %v5119_v27, %v7556_v38  ;;  %v7557_v44 = vld [vmem:[#allocation19_spill] sm:$0xff]  ;;  %v1747_v55 = vmul.f32 %v5119_v27, %v7559_v13  ;;  %v5509_v38 = vpop.f32.mrb[111].mxu1 }
 0x454   :  { %1960 = vst [vmem:[%s7096_s5 + $0x3f0] sm:$0xff] %v1832_v43  ;;  %v1739_v49 = vmul.f32 %v5119_v27, %v7557_v44  ;;  %v7558_v43 = vld [vmem:[#allocation21_spill] sm:$0xff]  ;;  %1835 = vst [vmem:[%s7096_s5 + $0x8] sm:$0xff] %v1705_v57  ;;  %v7561_v44 = vld [vmem:[#allocation32_spill] sm:$0xff] }
 0x455   :  { %v1743_v20 = vmul.f32 %v5119_v27, %v7558_v43  ;;  %1839 = vst [vmem:[%s7096_s5 + $0x28] sm:$0xff] %v1711_v35  ;;  %1843 = vst [vmem:[%s7096_s5 + $0x48] sm:$0xff] %v1715_v51  ;;  %v1755_v43 = vmul.f32 %v5119_v27, %v7561_v44  ;;  %v7562_v57 = vld [vmem:[#allocation36_spill] sm:$0xff]  ;;  %v1763_v35 = vmul.f32 %v5119_v27, %v7563_v21  ;;  %v7567_v21 = vld [vmem:[#allocation62_spill] sm:$0xff] }
 0x456   :  { %1847 = vst [vmem:[%s7096_s5 + $0x68] sm:$0xff] %v1719_v62  ;;  %v1759_v13 = vmul.f32 %v5119_v27, %v7562_v57  ;;  %v1767_v51 = vmul.f32 %v5119_v27, %v7564_v15  ;;  %1851 = vst [vmem:[%s7096_s5 + $0x88] sm:$0xff] %v1723_v45  ;;  %v7565_v62 = vld [vmem:[#allocation52_spill] sm:$0xff]  ;;  %v1779_v45 = vmul.f32 %v5119_v27, %v7567_v21  ;;  %v7572_v21 = vld [vmem:[#allocation86_spill] sm:$0xff] }
 0x457   :  { %1855 = vst [vmem:[%s7096_s5 + $0xa8] sm:$0xff] %v1727_v17  ;;  %1859 = vst [vmem:[%s7096_s5 + $0xc8] sm:$0xff] %v1731_v18  ;;  %v1771_v44 = vmul.f32 %v5119_v27, %v7565_v62  ;;  %v7566_v15 = vld [vmem:[#allocation56_spill] sm:$0xff]  ;;  %v1783_v17 = vmul.f32 %v5119_v27, %v7568_v48 }
 0x458   :  { %1863 = vst [vmem:[%s7096_s5 + $0xe8] sm:$0xff] %v1735_v37  ;;  %v1775_v57 = vmul.f32 %v5119_v27, %v7566_v15  ;;  %1867 = vst [vmem:[%s7096_s5 + $0x108] sm:$0xff] %v1739_v49  ;;  %v7569_v18 = vld [vmem:[#allocation72_spill] sm:$0xff]  ;;  %v7571_v15 = vld [vmem:[#allocation82_spill] sm:$0xff] }
 0x459   :  { %1871 = vst [vmem:[%s7096_s5 + $0x128] sm:$0xff] %v1743_v20  ;;  %1875 = vst [vmem:[%s7096_s5 + $0x148] sm:$0xff] %v1747_v55  ;;  %v1787_v37 = vmul.f32 %v5119_v27, %v7569_v18  ;;  %v7570_v48 = vld [vmem:[#allocation76_spill] sm:$0xff]  ;;  %v1795_v49 = vmul.f32 %v5119_v27, %v7571_v15  ;;  %v1799_v20 = vmul.f32 %v5119_v27, %v7572_v21  ;;  %v7575_v15 = vld [vmem:[#allocation102_spill] sm:$0xff] }
 0x45a   :  { %1879 = vst [vmem:[%s7096_s5 + $0x168] sm:$0xff] %v1751_v52  ;;  %v1791_v62 = vmul.f32 %v5119_v27, %v7570_v48  ;;  %1883 = vst [vmem:[%s7096_s5 + $0x188] sm:$0xff] %v1755_v43  ;;  %v7573_v52 = vld [vmem:[#allocation92_spill] sm:$0xff]  ;;  %v1811_v43 = vmul.f32 %v5119_v27, %v7575_v15  ;;  %v7576_v21 = vld [vmem:[#allocation106_spill] sm:$0xff] }
 0x45b   :  { %1887 = vst [vmem:[%s7096_s5 + $0x1a8] sm:$0xff] %v1759_v13  ;;  %1891 = vst [vmem:[%s7096_s5 + $0x1c8] sm:$0xff] %v1763_v35  ;;  %v1803_v55 = vmul.f32 %v5119_v27, %v7573_v52  ;;  %v7574_v18 = vld [vmem:[#allocation96_spill] sm:$0xff]  ;;  %v1815_v13 = vmul.f32 %v5119_v27, %v7576_v21  ;;  %v7579_v15 = vld [vmem:[#allocation122_spill] sm:$0xff] }
 0x45c   :  { %1895 = vst [vmem:[%s7096_s5 + $0x1e8] sm:$0xff] %v1767_v51  ;;  %v1807_v48 = vmul.f32 %v5119_v27, %v7574_v18  ;;  %1899 = vst [vmem:[%s7096_s5 + $0x208] sm:$0xff] %v1771_v44  ;;  %v7577_v35 = vld [vmem:[#allocation112_spill] sm:$0xff]  ;;  %v1827_v44 = vmul.f32 %v5119_v27, %v7579_v15  ;;  %v7580_v21 = vld [vmem:[#allocation126_spill] sm:$0xff] }
 0x45d   :  { %1903 = vst [vmem:[%s7096_s5 + $0x228] sm:$0xff] %v1775_v57  ;;  %1907 = vst [vmem:[%s7096_s5 + $0x248] sm:$0xff] %v1779_v45  ;;  %v1819_v51 = vmul.f32 %v5119_v27, %v7577_v35  ;;  %v7578_v52 = vld [vmem:[#allocation116_spill] sm:$0xff]  ;;  %v1831_v57 = vmul.f32 %v5119_v27, %v7580_v21  ;;  %v5611_v45 = vpop.f32.mrb[112].mxu0  ;;  %v7584_v35 = vld [vmem:[#allocation10_spill] sm:$0xff] }
 0x45e   :  { %1911 = vst [vmem:[%s7096_s5 + $0x268] sm:$0xff] %v1783_v17  ;;  %v1823_v18 = vmul.f32 %v5119_v27, %v7578_v52  ;;  %1915 = vst [vmem:[%s7096_s5 + $0x288] sm:$0xff] %v1787_v37  ;;  %v5613_v17 = vpop.f32.mrb[112].mxu1  ;;  %v7581_v27 = vld [vmem:[#allocation6_spill] sm:$0xff]  ;;  %v5635_v52 = vpop.f32.mrb[113].mxu0 }
 0x45f   :  { %1919 = vst [vmem:[%s7096_s5 + $0x2a8] sm:$0xff] %v1791_v62  ;;  %1923 = vst [vmem:[%s7096_s5 + $0x2c8] sm:$0xff] %v1795_v49  ;;  %v1709_v37 = vmul.f32 %v5133_v24, %v7581_v27  ;;  %v7582_v62 = vld [vmem:[#allocation4_spill] sm:$0xff]  ;;  %v5637_v15 = vpop.f32.mrb[113].mxu1  ;;  %v7586_v21 = vld [vmem:[#allocation14_spill] sm:$0xff] }
 0x460   :  { %1927 = vst [vmem:[%s7096_s5 + $0x2e8] sm:$0xff] %v1799_v20  ;;  %1931 = vst [vmem:[%s7096_s5 + $0x308] sm:$0xff] %v1803_v55  ;;  %v1713_v49 = vmul.f32 %v5133_v24, %v7582_v62  ;;  %v7583_v20 = vld [vmem:[#allocation8_spill] sm:$0xff]  ;;  %v1729_v27 = vmul.f32 %v5133_v24, %v7586_v21  ;;  %v5661_v59 = vpop.f32.mrb[114].mxu1 }
 0x461   :  { %1935 = vst [vmem:[%s7096_s5 + $0x328] sm:$0xff] %v1807_v48  ;;  %1939 = vst [vmem:[%s7096_s5 + $0x348] sm:$0xff] %v1811_v43  ;;  %v1717_v55 = vmul.f32 %v5133_v24, %v7583_v20  ;;  %v1721_v48 = vmul.f32 %v5133_v24, %v7584_v35  ;;  %v7585_v43 = vld [vmem:[#allocation12_spill] sm:$0xff]  ;;  %v7588_v20 = vld [vmem:[#allocation18_spill] sm:$0xff]  ;;  %v5659_v35 = vpop.f32.mrb[114].mxu0 }
 0x462   :  { %1943 = vst [vmem:[%s7096_s5 + $0x368] sm:$0xff] %v1815_v13  ;;  %1947 = vst [vmem:[%s7096_s5 + $0x388] sm:$0xff] %v1819_v51  ;;  %v1725_v13 = vmul.f32 %v5133_v24, %v7585_v43  ;;  %v7587_v62 = vld [vmem:[#allocation16_spill] sm:$0xff]  ;;  %v7591_v43 = vld [vmem:[#allocation26_spill] sm:$0xff] }
 0x463   :  { %1951 = vst [vmem:[%s7096_s5 + $0x3a8] sm:$0xff] %v1823_v18  ;;  %1955 = vst [vmem:[%s7096_s5 + $0x3c8] sm:$0xff] %v1827_v44  ;;  %v1733_v51 = vmul.f32 %v5133_v24, %v7587_v62  ;;  %v1737_v18 = vmul.f32 %v5133_v24, %v7588_v20  ;;  %v7589_v44 = vld [vmem:[#allocation20_spill] sm:$0xff]  ;;  %v1749_v16 = vmul.f32 %v5133_v24, %v7591_v43  ;;  %v5683_v62 = vpop.f32.mrb[115].mxu0  ;;  %v5685_v20 = vpop.f32.mrb[115].mxu1 }
 0x464   :  { %1959 = vst [vmem:[%s7096_s5 + $0x3e8] sm:$0xff] %v1831_v57  ;;  %v1741_v61 = vmul.f32 %v5133_v24, %v7589_v44  ;;  %v7590_v57 = vld [vmem:[#allocation22_spill] sm:$0xff]  ;;  %v7592_v21 = vld [vmem:[#allocation28_spill] sm:$0xff]  ;;  %1837 = vst [vmem:[%s7096_s5 + $0x18] sm:$0xff] %v1709_v37 }
 0x465   :  { %v1745_v53 = vmul.f32 %v5133_v24, %v7590_v57  ;;  %v1753_v10 = vmul.f32 %v5133_v24, %v7592_v21  ;;  %1841 = vst [vmem:[%s7096_s5 + $0x38] sm:$0xff] %v1713_v49  ;;  %1845 = vst [vmem:[%s7096_s5 + $0x58] sm:$0xff] %v1717_v55  ;;  %v7594_v44 = vld [vmem:[#allocation33_spill] sm:$0xff]  ;;  %v7596_v21 = vld [vmem:[#allocation43_spill] sm:$0xff]  ;;  %v1769_v55 = vmul.f32 %v5133_v24, %v7597_v32 }
 0x466   :  { %1849 = vst [vmem:[%s7096_s5 + $0x78] sm:$0xff] %v1721_v48  ;;  %7593 = vst [vmem:[#allocation31_spill] sm:$0xff] %v5685_v20  ;;  %v1757_v57 = vmul.f32 %v5133_v24, %v7594_v44  ;;  %v7595_v37 = vld [vmem:[#allocation37_spill] sm:$0xff]  ;;  %v1765_v49 = vmul.f32 %v5133_v24, %v7596_v21  ;;  %v7600_v21 = vld [vmem:[#allocation63_spill] sm:$0xff] }
 0x467   :  { %v1761_v43 = vmul.f32 %v5133_v24, %v7595_v37  ;;  %1853 = vst [vmem:[%s7096_s5 + $0x98] sm:$0xff] %v1725_v13  ;;  %1857 = vst [vmem:[%s7096_s5 + $0xb8] sm:$0xff] %v1729_v27  ;;  %v7598_v48 = vld [vmem:[#allocation53_spill] sm:$0xff]  ;;  %v1781_v13 = vmul.f32 %v5133_v24, %v7600_v21  ;;  %v7601_v20 = vld [vmem:[#allocation67_spill] sm:$0xff] }
 0x468   :  { %1861 = vst [vmem:[%s7096_s5 + $0xd8] sm:$0xff] %v1733_v51  ;;  %1865 = vst [vmem:[%s7096_s5 + $0xf8] sm:$0xff] %v1737_v18  ;;  %v1773_v44 = vmul.f32 %v5133_v24, %v7598_v48  ;;  %v7599_v32 = vld [vmem:[#allocation57_spill] sm:$0xff]  ;;  %v1785_v27 = vmul.f32 %v5133_v24, %v7601_v20  ;;  %v7605_v21 = vld [vmem:[#allocation87_spill] sm:$0xff] }
 0x469   :  { %v1777_v37 = vmul.f32 %v5133_v24, %v7599_v32  ;;  %1869 = vst [vmem:[%s7096_s5 + $0x118] sm:$0xff] %v1741_v61  ;;  %1873 = vst [vmem:[%s7096_s5 + $0x138] sm:$0xff] %v1745_v53  ;;  %v7602_v51 = vld [vmem:[#allocation73_spill] sm:$0xff]  ;;  %v7604_v32 = vld [vmem:[#allocation83_spill] sm:$0xff]  ;;  %v1801_v53 = vmul.f32 %v5133_v24, %v7605_v21 }
 0x46a   :  { %1877 = vst [vmem:[%s7096_s5 + $0x158] sm:$0xff] %v1749_v16  ;;  %1881 = vst [vmem:[%s7096_s5 + $0x178] sm:$0xff] %v1753_v10  ;;  %v1789_v18 = vmul.f32 %v5133_v24, %v7602_v51  ;;  %v7603_v20 = vld [vmem:[#allocation77_spill] sm:$0xff]  ;;  %v1797_v61 = vmul.f32 %v5133_v24, %v7604_v32  ;;  %v7608_v32 = vld [vmem:[#allocation103_spill] sm:$0xff] }
 0x46b   :  { %v1793_v48 = vmul.f32 %v5133_v24, %v7603_v20  ;;  %1885 = vst [vmem:[%s7096_s5 + $0x198] sm:$0xff] %v1757_v57  ;;  %1889 = vst [vmem:[%s7096_s5 + $0x1b8] sm:$0xff] %v1761_v43  ;;  %v7606_v10 = vld [vmem:[#allocation93_spill] sm:$0xff]  ;;  %v1813_v57 = vmul.f32 %v5133_v24, %v7608_v32  ;;  %v7609_v21 = vld [vmem:[#allocation107_spill] sm:$0xff] }
 0x46c   :  { %1893 = vst [vmem:[%s7096_s5 + $0x1d8] sm:$0xff] %v1765_v49  ;;  %1897 = vst [vmem:[%s7096_s5 + $0x1f8] sm:$0xff] %v1769_v55  ;;  %v1805_v16 = vmul.f32 %v5133_v24, %v7606_v10  ;;  %v7607_v51 = vld [vmem:[#allocation97_spill] sm:$0xff]  ;;  %v1817_v43 = vmul.f32 %v5133_v24, %v7609_v21  ;;  %v7612_v32 = vld [vmem:[#allocation123_spill] sm:$0xff] }
 0x46d   :  { %v1809_v20 = vmul.f32 %v5133_v24, %v7607_v51  ;;  %1901 = vst [vmem:[%s7096_s5 + $0x218] sm:$0xff] %v1773_v44  ;;  %1905 = vst [vmem:[%s7096_s5 + $0x238] sm:$0xff] %v1777_v37  ;;  %v7610_v49 = vld [vmem:[#allocation113_spill] sm:$0xff]  ;;  %v1829_v44 = vmul.f32 %v5133_v24, %v7612_v32  ;;  %v7613_v21 = vld [vmem:[#allocation127_spill] sm:$0xff] }
 0x46e   :  { %1909 = vst [vmem:[%s7096_s5 + $0x258] sm:$0xff] %v1781_v13  ;;  %1913 = vst [vmem:[%s7096_s5 + $0x278] sm:$0xff] %v1785_v27  ;;  %v1821_v55 = vmul.f32 %v5133_v24, %v7610_v49  ;;  %v7611_v10 = vld [vmem:[#allocation117_spill] sm:$0xff]  ;;  %v1833_v37 = vmul.f32 %v5133_v24, %v7613_v21  ;;  %v5787_v13 = vpop.f32.mrb[116].mxu0  ;;  %v5789_v27 = vpop.f32.mrb[116].mxu1  ;;  %v7619_v21 = vld [vmem:[#allocation24_spill] sm:$0xff] }
 0x46f   :  { %v1825_v51 = vmul.f32 %v5133_v24, %v7611_v10  ;;  %1917 = vst [vmem:[%s7096_s5 + $0x298] sm:$0xff] %v1789_v18  ;;  %1921 = vst [vmem:[%s7096_s5 + $0x2b8] sm:$0xff] %v1793_v48  ;;  %v2665_v24 = vadd.f32 %v5052_v2, %v5076_v1  ;;  %v2555_v18 = vadd.f32 %v5062_v11, %v5080_v42 }
 0x470   :  { %1925 = vst [vmem:[%s7096_s5 + $0x2d8] sm:$0xff] %v1797_v61  ;;  %1929 = vst [vmem:[%s7096_s5 + $0x2f8] sm:$0xff] %v1801_v53  ;;  %v2629_v48 = vadd.f32 %v5064_v41, %v5089_v25  ;;  %v2592_v61 = vadd.f32 %v5072_v0, %v5093_v50  ;;  %v5811_v53 = vpop.f32.mrb[117].mxu0  ;;  %v2455_v2 = vmul.f32 %v5083_v14, %v5083_v14  ;;  %v7616_v50 = vld [vmem:[#allocation23_spill] sm:$0xff] }
 0x471   :  { %1933 = vst [vmem:[%s7096_s5 + $0x318] sm:$0xff] %v1805_v16  ;;  %1937 = vst [vmem:[%s7096_s5 + $0x338] sm:$0xff] %v1809_v20  ;;  %v5813_v16 = vpop.f32.mrb[117].mxu1  ;;  %v2456_v11 = vmul.f32 %v5096_v29, %v5096_v29  ;;  %v2458_v41 = vmul.f32 %v5099_v8, %v5099_v8  ;;  %v5835_v0 = vadd.f32 %v5044_v36, %v4308_v31  ;;  %v5837_v1 = vpop.f32.mrb[118].mxu0 }
 0x472   :  { %1941 = vst [vmem:[%s7096_s5 + $0x358] sm:$0xff] %v1813_v57  ;;  %1945 = vst [vmem:[%s7096_s5 + $0x378] sm:$0xff] %v1817_v43  ;;  %v5839_v42 = vpop.f32.mrb[118].mxu1  ;;  %v5843_v25 = vadd.f32 %v5046_v30, %v4308_v31  ;;  %v5847_v20 = vadd.f32 %v5101_v7, %v7616_v50  ;;  %v5851_v57 = vadd.f32 %v5103_v34, %v7616_v50  ;;  %v5857_v43 = vpop.f32.mrb[119].mxu0 }
 0x473   :  { %1949 = vst [vmem:[%s7096_s5 + $0x398] sm:$0xff] %v1821_v55  ;;  %1953 = vst [vmem:[%s7096_s5 + $0x3b8] sm:$0xff] %v1825_v51  ;;  %v5855_v36 = vadd.f32 %v5115_v6, %v7616_v50  ;;  %v5859_v49 = vpop.f32.mrb[119].mxu1  ;;  %v2666_v55 = vadd.f32 %v2665_v24, %v2455_v2  ;;  %v2556_v10 = vadd.f32 %v2555_v18, %v2456_v11 }
 0x474   :  { %1957 = vst [vmem:[%s7096_s5 + $0x3d8] sm:$0xff] %v1829_v44  ;;  %1961 = vst [vmem:[%s7096_s5 + $0x3f8] sm:$0xff] %v1833_v37  ;;  %v2630_v31 = vadd.f32 %v2629_v48, %v2458_v41  ;;  %v2457_v30 = vmul.f32 %v5835_v0, %v5835_v0  ;;  %v2459_v7 = vmul.f32 %v5843_v25, %v5843_v25 }
 0x475   :  { %7614 = vst [vmem:[#allocation34_spill] sm:$0xff] %v5835_v0  ;;  %7615 = vst [vmem:[#allocation35_spill] sm:$0xff] %v5843_v25  ;;  %v2460_v34 = vmul.f32 %v5847_v20, %v5847_v20  ;;  %v2462_v6 = vmul.f32 %v5851_v57, %v5851_v57  ;;  %v2461_v51 = vmul.f32 %v5855_v36, %v5855_v36 }
 0x476   :  { %7617 = vst [vmem:[#allocation40_spill] sm:$0xff] %v5855_v36  ;;  %v2593_v32 = vadd.f32 %v2592_v61, %v2457_v30  ;;  %v5873_v44 = vadd.f32 %v5117_v58, %v7616_v50  ;;  %v5877_v37 = vadd.f32 %v5129_v46, %v7619_v21  ;;  %v5881_v24 = vadd.f32 %v5131_v28, %v7619_v21  ;;  %v5893_v50 = vpop.f32.mrb[120].mxu0  ;;  %v5895_v28 = vpop.f32.mrb[120].mxu1 }
 0x477   :  { %v2667_v18 = vadd.f32 %v2666_v55, %v2459_v7  ;;  %v2557_v48 = vadd.f32 %v2556_v10, %v2460_v34  ;;  %v2631_v2 = vadd.f32 %v2630_v31, %v2462_v6  ;;  %v5885_v11 = vadd.f32 %v5155_v23, %v7619_v21  ;;  %v7622_v10 = vld [vmem:[#allocation29_spill] sm:$0xff]  ;;  %v5911_v7 = vpop.f32.mrb[121].mxu0  ;;  %v5913_v34 = vpop.f32.mrb[121].mxu1 }
 0x478   :  { %7618 = vst [vmem:[#allocation41_spill] sm:$0xff] %v5873_v44  ;;  %v2594_v61 = vadd.f32 %v2593_v32, %v2461_v51  ;;  %v2463_v58 = vmul.f32 %v5873_v44, %v5873_v44  ;;  %v2464_v41 = vmul.f32 %v5877_v37, %v5877_v37  ;;  %v2466_v46 = vmul.f32 %v5881_v24, %v5881_v24 }
 0x479   :  { %7620 = vst [vmem:[#allocation44_spill] sm:$0xff] %v5885_v11  ;;  %v2465_v55 = vmul.f32 %v5885_v11, %v5885_v11  ;;  %v5901_v23 = vadd.f32 %v5157_v47, %v7619_v21  ;;  %v5905_v31 = vadd.f32 %v5259_v3, %v7622_v10  ;;  %v5909_v30 = vadd.f32 %v5261_v19, %v7622_v10  ;;  %v5919_v47 = vpop.f32.mrb[122].mxu0  ;;  %v5921_v21 = vpop.f32.mrb[122].mxu1 }
 0x47a   :  { %v2668_v6 = vadd.f32 %v2667_v18, %v2463_v58  ;;  %v2558_v51 = vadd.f32 %v2557_v48, %v2464_v41  ;;  %v2632_v32 = vadd.f32 %v2631_v2, %v2466_v46  ;;  %v5917_v44 = vadd.f32 %v5283_v54, %v7622_v10  ;;  %v5929_v48 = vpop.f32.mrb[123].mxu0  ;;  %v5931_v2 = vpop.f32.mrb[123].mxu1 }
 0x47b   :  { %7621 = vst [vmem:[#allocation45_spill] sm:$0xff] %v5901_v23  ;;  %v2595_v3 = vadd.f32 %v2594_v61, %v2465_v55  ;;  %v2467_v19 = vmul.f32 %v5901_v23, %v5901_v23  ;;  %v2468_v25 = vmul.f32 %v5905_v31, %v5905_v31  ;;  %v2470_v18 = vmul.f32 %v5909_v30, %v5909_v30  ;;  %v7625_v61 = vld [vmem:[#allocation30_spill] sm:$0xff] }
 0x47c   :  { %7623 = vst [vmem:[#allocation50_spill] sm:$0xff] %v5917_v44  ;;  %v2469_v54 = vmul.f32 %v5917_v44, %v5917_v44  ;;  %v5937_v58 = vadd.f32 %v5285_v40, %v7622_v10  ;;  %v5941_v41 = vadd.f32 %v5307_v33, %v7625_v61  ;;  %v5945_v46 = vadd.f32 %v5309_v26, %v7625_v61 }
 0x47d   :  { %v2669_v55 = vadd.f32 %v2668_v6, %v2467_v19  ;;  %v2559_v23 = vadd.f32 %v2558_v51, %v2468_v25  ;;  %v2633_v14 = vadd.f32 %v2632_v32, %v2470_v18  ;;  %v5949_v11 = vadd.f32 %v5331_v60, %v7625_v61  ;;  %v7629_v6 = vld [vmem:[#allocation38_spill] sm:$0xff] }
 0x47e   :  { %7624 = vst [vmem:[#allocation51_spill] sm:$0xff] %v5937_v58  ;;  %7626 = vst [vmem:[#allocation54_spill] sm:$0xff] %v5945_v46  ;;  %v2596_v44 = vadd.f32 %v2595_v3, %v2469_v54  ;;  %v2471_v40 = vmul.f32 %v5937_v58, %v5937_v58  ;;  %v2472_v10 = vmul.f32 %v5941_v41, %v5941_v41  ;;  %v5975_v54 = vpop.f32.mrb[124].mxu0  ;;  %v5977_v58 = vpop.f32.mrb[124].mxu1 }
 0x47f   :  { %7627 = vst [vmem:[#allocation55_spill] sm:$0xff] %v5949_v11  ;;  %v2474_v33 = vmul.f32 %v5945_v46, %v5945_v46  ;;  %v2473_v26 = vmul.f32 %v5949_v11, %v5949_v11  ;;  %v5961_v25 = vadd.f32 %v5333_v12, %v7625_v61  ;;  %v5965_v60 = vadd.f32 %v5435_v22, %v7629_v6 }
 0x480   :  { %v5969_v51 = vadd.f32 %v5437_v9, %v7629_v6  ;;  %v2670_v32 = vadd.f32 %v2669_v55, %v2471_v40  ;;  %v2560_v3 = vadd.f32 %v2559_v23, %v2472_v10  ;;  %v5973_v18 = vadd.f32 %v5459_v5, %v7629_v6  ;;  %v5985_v23 = vpop.f32.mrb[125].mxu0 }
 0x481   :  { %7628 = vst [vmem:[#allocation60_spill] sm:$0xff] %v5961_v25  ;;  %v2634_v19 = vadd.f32 %v2633_v14, %v2474_v33  ;;  %v2597_v12 = vadd.f32 %v2596_v44, %v2473_v26  ;;  %v2475_v22 = vmul.f32 %v5961_v25, %v5961_v25  ;;  %v2476_v61 = vmul.f32 %v5965_v60, %v5965_v60  ;;  %v5987_v14 = vpop.f32.mrb[125].mxu1  ;;  %v7633_v44 = vld [vmem:[#allocation39_spill] sm:$0xff]  ;;  %v6003_v33 = vpop.f32.mrb[126].mxu0 }
 0x482   :  { %7630 = vst [vmem:[#allocation61_spill] sm:$0xff] %v5969_v51  ;;  %7631 = vst [vmem:[#allocation64_spill] sm:$0xff] %v5973_v18  ;;  %v2478_v9 = vmul.f32 %v5969_v51, %v5969_v51  ;;  %v2477_v5 = vmul.f32 %v5973_v18, %v5973_v18  ;;  %v5993_v55 = vadd.f32 %v5461_v56, %v7629_v6  ;;  %v6005_v26 = vpop.f32.mrb[126].mxu1  ;;  %v6011_v56 = vpop.f32.mrb[127].mxu0 }
 0x483   :  { %v5997_v40 = vadd.f32 %v5483_v63, %v7633_v44  ;;  %v6001_v10 = vadd.f32 %v5485_v4, %v7633_v44  ;;  %v2671_v25 = vadd.f32 %v2670_v32, %v2475_v22  ;;  %v2561_v11 = vadd.f32 %v2560_v3, %v2476_v61  ;;  %v6013_v6 = vpop.f32.mrb[127].mxu1 }
 0x484   :  { %7632 = vst [vmem:[#allocation65_spill] sm:$0xff] %v5993_v55  ;;  %v2635_v36 = vadd.f32 %v2634_v19, %v2478_v9  ;;  %v6009_v18 = vadd.f32 %v5507_v39, %v7633_v44  ;;  %v2598_v63 = vadd.f32 %v2597_v12, %v2477_v5  ;;  %v2479_v4 = vmul.f32 %v5993_v55, %v5993_v55  ;;  %v7637_v19 = vld [vmem:[#allocation48_spill] sm:$0xff] }
 0x485   :  { %7634 = vst [vmem:[#allocation70_spill] sm:$0xff] %v6001_v10  ;;  %v2480_v0 = vmul.f32 %v5997_v40, %v5997_v40  ;;  %v2482_v32 = vmul.f32 %v6001_v10, %v6001_v10  ;;  %v6025_v39 = vadd.f32 %v5509_v38, %v7633_v44  ;;  %v6029_v22 = vadd.f32 %v5611_v45, %v7637_v19 }
 0x486   :  { %7635 = vst [vmem:[#allocation71_spill] sm:$0xff] %v6009_v18  ;;  %v2481_v3 = vmul.f32 %v6009_v18, %v6009_v18  ;;  %v6033_v12 = vadd.f32 %v5613_v17, %v7637_v19  ;;  %v2672_v61 = vadd.f32 %v2671_v25, %v2479_v4  ;;  %v6037_v55 = vadd.f32 %v5635_v52, %v7637_v19  ;;  %v6059_v25 = vpop.f32.mrb[128].mxu0 }
 0x487   :  { %7636 = vst [vmem:[#allocation74_spill] sm:$0xff] %v6025_v39  ;;  %v2562_v9 = vadd.f32 %v2561_v11, %v2480_v0  ;;  %v2636_v5 = vadd.f32 %v2635_v36, %v2482_v32  ;;  %v2483_v38 = vmul.f32 %v6025_v39, %v6025_v39  ;;  %v2484_v44 = vmul.f32 %v6029_v22, %v6029_v22  ;;  %v7641_v36 = vld [vmem:[#allocation49_spill] sm:$0xff] }
 0x488   :  { %7638 = vst [vmem:[#allocation75_spill] sm:$0xff] %v6033_v12  ;;  %7639 = vst [vmem:[#allocation80_spill] sm:$0xff] %v6037_v55  ;;  %v2599_v18 = vadd.f32 %v2598_v63, %v2481_v3  ;;  %v2486_v45 = vmul.f32 %v6033_v12, %v6033_v12  ;;  %v2485_v17 = vmul.f32 %v6037_v55, %v6037_v55  ;;  %v6061_v63 = vpop.f32.mrb[128].mxu1 }
 0x489   :  { %v6049_v0 = vadd.f32 %v5637_v15, %v7637_v19  ;;  %v6053_v52 = vadd.f32 %v5659_v35, %v7641_v36  ;;  %v6057_v11 = vadd.f32 %v5661_v59, %v7641_v36  ;;  %v2673_v4 = vadd.f32 %v2672_v61, %v2483_v38  ;;  %v6067_v15 = vpop.f32.mrb[129].mxu0  ;;  %v6069_v19 = vpop.f32.mrb[129].mxu1  ;;  %v7644_v38 = vld [vmem:[#allocation31_spill] sm:$0xff] }
 0x48a   :  { %v2563_v32 = vadd.f32 %v2562_v9, %v2484_v44  ;;  %v2637_v3 = vadd.f32 %v2636_v5, %v2486_v45  ;;  %v6065_v39 = vadd.f32 %v5683_v62, %v7641_v36  ;;  %v2600_v35 = vadd.f32 %v2599_v18, %v2485_v17  ;;  %v6077_v9 = vpop.f32.mrb[130].mxu0  ;;  %v6079_v5 = vpop.f32.mrb[130].mxu1  ;;  %v7646_v18 = vld [vmem:[#allocation58_spill] sm:$0xff] }
 0x48b   :  { %7640 = vst [vmem:[#allocation81_spill] sm:$0xff] %v6049_v0  ;;  %7642 = vst [vmem:[#allocation84_spill] sm:$0xff] %v6057_v11  ;;  %v2487_v59 = vmul.f32 %v6049_v0, %v6049_v0  ;;  %v2488_v55 = vmul.f32 %v6053_v52, %v6053_v52  ;;  %v2490_v61 = vmul.f32 %v6057_v11, %v6057_v11  ;;  %v6095_v0 = vpop.f32.mrb[131].mxu0  ;;  %v6097_v11 = vpop.f32.mrb[131].mxu1 }
 0x48c   :  { %7643 = vst [vmem:[#allocation85_spill] sm:$0xff] %v6065_v39  ;;  %v2489_v62 = vmul.f32 %v6065_v39, %v6065_v39  ;;  %v6085_v44 = vadd.f32 %v7644_v38, %v7641_v36  ;;  %v6089_v45 = vadd.f32 %v5787_v13, %v7646_v18  ;;  %v6093_v17 = vadd.f32 %v5789_v27, %v7646_v18 }
 0x48d   :  { %v2674_v12 = vadd.f32 %v2673_v4, %v2487_v59  ;;  %v2564_v10 = vadd.f32 %v2563_v32, %v2488_v55  ;;  %v2638_v51 = vadd.f32 %v2637_v3, %v2490_v61  ;;  %v6101_v39 = vadd.f32 %v5811_v53, %v7646_v18  ;;  %v7650_v4 = vld [vmem:[#allocation59_spill] sm:$0xff] }
 0x48e   :  { %7645 = vst [vmem:[#allocation90_spill] sm:$0xff] %v6085_v44  ;;  %7647 = vst [vmem:[#allocation91_spill] sm:$0xff] %v6093_v17  ;;  %v2601_v36 = vadd.f32 %v2600_v35, %v2489_v62  ;;  %v2491_v13 = vmul.f32 %v6085_v44, %v6085_v44  ;;  %v2492_v38 = vmul.f32 %v6089_v45, %v6089_v45  ;;  %v6133_v44 = vpop.f32.mrb[132].mxu0 }
 0x48f   :  { %7648 = vst [vmem:[#allocation94_spill] sm:$0xff] %v6101_v39  ;;  %v2494_v27 = vmul.f32 %v6093_v17, %v6093_v17  ;;  %v2493_v46 = vmul.f32 %v6101_v39, %v6101_v39  ;;  %v6113_v55 = vadd.f32 %v5813_v16, %v7646_v18  ;;  %v6117_v53 = vadd.f32 %v5837_v1, %v7650_v4 }
 0x490   :  { %v6121_v32 = vadd.f32 %v5839_v42, %v7650_v4  ;;  %v2675_v3 = vadd.f32 %v2674_v12, %v2491_v13  ;;  %v2565_v35 = vadd.f32 %v2564_v10, %v2492_v38  ;;  %v6125_v61 = vadd.f32 %v5857_v43, %v7650_v4  ;;  %v6135_v42 = vpop.f32.mrb[132].mxu1 }
 0x491   :  { %7649 = vst [vmem:[#allocation95_spill] sm:$0xff] %v6113_v55  ;;  %v2639_v59 = vadd.f32 %v2638_v51, %v2494_v27  ;;  %v2602_v62 = vadd.f32 %v2601_v36, %v2493_v46  ;;  %v2495_v16 = vmul.f32 %v6113_v55, %v6113_v55  ;;  %v2496_v18 = vmul.f32 %v6117_v53, %v6117_v53  ;;  %v7654_v46 = vld [vmem:[#allocation68_spill] sm:$0xff]  ;;  %v6151_v36 = vpop.f32.mrb[133].mxu0  ;;  %v6153_v13 = vpop.f32.mrb[133].mxu1 }
 0x492   :  { %7651 = vst [vmem:[#allocation100_spill] sm:$0xff] %v6121_v32  ;;  %7652 = vst [vmem:[#allocation101_spill] sm:$0xff] %v6125_v61  ;;  %v2498_v1 = vmul.f32 %v6121_v32, %v6121_v32  ;;  %v2497_v51 = vmul.f32 %v6125_v61, %v6125_v61  ;;  %v6141_v43 = vadd.f32 %v5859_v49, %v7650_v4  ;;  %v6159_v49 = vpop.f32.mrb[134].mxu0  ;;  %v6161_v4 = vpop.f32.mrb[134].mxu1 }
 0x493   :  { %v6145_v10 = vadd.f32 %v5893_v50, %v7654_v46  ;;  %v6149_v12 = vadd.f32 %v5895_v28, %v7654_v46  ;;  %v2676_v38 = vadd.f32 %v2675_v3, %v2495_v16  ;;  %v2566_v27 = vadd.f32 %v2565_v35, %v2496_v18  ;;  %v6169_v35 = vpop.f32.mrb[135].mxu0 }
 0x494   :  { %7653 = vst [vmem:[#allocation104_spill] sm:$0xff] %v6141_v43  ;;  %v2640_v55 = vadd.f32 %v2639_v59, %v2498_v1  ;;  %v6157_v61 = vadd.f32 %v5911_v7, %v7654_v46  ;;  %v2603_v50 = vadd.f32 %v2602_v62, %v2497_v51  ;;  %v2499_v28 = vmul.f32 %v6141_v43, %v6141_v43  ;;  %v6171_v59 = vpop.f32.mrb[135].mxu1  ;;  %v7658_v62 = vld [vmem:[#allocation69_spill] sm:$0xff] }
 0x495   :  { %7655 = vst [vmem:[#allocation105_spill] sm:$0xff] %v6149_v12  ;;  %v2500_v39 = vmul.f32 %v6145_v10, %v6145_v10  ;;  %v2502_v3 = vmul.f32 %v6149_v12, %v6149_v12  ;;  %v6177_v16 = vadd.f32 %v5913_v34, %v7654_v46  ;;  %v6181_v18 = vadd.f32 %v5919_v47, %v7658_v62 }
 0x496   :  { %7656 = vst [vmem:[#allocation110_spill] sm:$0xff] %v6157_v61  ;;  %v2501_v7 = vmul.f32 %v6157_v61, %v6157_v61  ;;  %v6185_v1 = vadd.f32 %v5921_v21, %v7658_v62  ;;  %v2677_v51 = vadd.f32 %v2676_v38, %v2499_v28  ;;  %v6189_v32 = vadd.f32 %v5929_v48, %v7658_v62 }
 0x497   :  { %7657 = vst [vmem:[#allocation111_spill] sm:$0xff] %v6177_v16  ;;  %v2567_v43 = vadd.f32 %v2566_v27, %v2500_v39  ;;  %v2641_v12 = vadd.f32 %v2640_v55, %v2502_v3  ;;  %v2503_v34 = vmul.f32 %v6177_v16, %v6177_v16  ;;  %v2504_v46 = vmul.f32 %v6181_v18, %v6181_v18  ;;  %v7662_v55 = vld [vmem:[#allocation78_spill] sm:$0xff]  ;;  %v6217_v16 = vpop.f32.mrb[136].mxu1 }
 0x498   :  { %7659 = vst [vmem:[#allocation114_spill] sm:$0xff] %v6185_v1  ;;  %7660 = vst [vmem:[#allocation115_spill] sm:$0xff] %v6189_v32  ;;  %v2604_v61 = vadd.f32 %v2603_v50, %v2501_v7  ;;  %v2506_v47 = vmul.f32 %v6185_v1, %v6185_v1  ;;  %v2505_v21 = vmul.f32 %v6189_v32, %v6189_v32  ;;  %v6215_v7 = vpop.f32.mrb[136].mxu0 }
 0x499   :  { %v6201_v39 = vadd.f32 %v5931_v2, %v7658_v62  ;;  %v6205_v48 = vadd.f32 %v5975_v54, %v7662_v55  ;;  %v6209_v38 = vadd.f32 %v5977_v58, %v7662_v55  ;;  %v2678_v27 = vadd.f32 %v2677_v51, %v2503_v34 }
 0x49a   :  { %v2568_v50 = vadd.f32 %v2567_v43, %v2504_v46  ;;  %v2642_v28 = vadd.f32 %v2641_v12, %v2506_v47  ;;  %v6213_v3 = vadd.f32 %v5985_v23, %v7662_v55  ;;  %v2605_v2 = vadd.f32 %v2604_v61, %v2505_v21  ;;  %v6225_v43 = vpop.f32.mrb[137].mxu0  ;;  %v6227_v12 = vpop.f32.mrb[137].mxu1  ;;  %v7666_v61 = vld [vmem:[#allocation79_spill] sm:$0xff] }
 0x49b   :  { %7661 = vst [vmem:[#allocation120_spill] sm:$0xff] %v6201_v39  ;;  %7663 = vst [vmem:[#allocation121_spill] sm:$0xff] %v6209_v38  ;;  %v2507_v54 = vmul.f32 %v6201_v39, %v6201_v39  ;;  %v2508_v62 = vmul.f32 %v6205_v48, %v6205_v48  ;;  %v2510_v58 = vmul.f32 %v6209_v38, %v6209_v38  ;;  %v6243_v47 = vpop.f32.mrb[138].mxu0  ;;  %v6245_v21 = vpop.f32.mrb[138].mxu1 }
 0x49c   :  { %7664 = vst [vmem:[#allocation124_spill] sm:$0xff] %v6213_v3  ;;  %v2509_v23 = vmul.f32 %v6213_v3, %v6213_v3  ;;  %v6233_v51 = vadd.f32 %v5987_v14, %v7662_v55  ;;  %v6237_v34 = vadd.f32 %v6003_v33, %v7666_v61  ;;  %v6241_v46 = vadd.f32 %v6005_v26, %v7666_v61  ;;  %v6251_v14 = vpop.f32.mrb[139].mxu0  ;;  %v6253_v55 = vpop.f32.mrb[139].mxu1 }
 0x49d   :  { %v2679_v39 = vadd.f32 %v2678_v27, %v2507_v54  ;;  %v2569_v32 = vadd.f32 %v2568_v50, %v2508_v62  ;;  %v2643_v38 = vadd.f32 %v2642_v28, %v2510_v58  ;;  %v6249_v3 = vadd.f32 %v6011_v56, %v7666_v61  ;;  %v7670_v28 = vld [vmem:[#allocation88_spill] sm:$0xff] }
 0x49e   :  { %7665 = vst [vmem:[#allocation125_spill] sm:$0xff] %v6233_v51  ;;  %7667 = vst [vmem:[#allocation5_spill] sm:$0xff] %v6241_v46  ;;  %v2606_v33 = vadd.f32 %v2605_v2, %v2509_v23  ;;  %v2511_v26 = vmul.f32 %v6233_v51, %v6233_v51  ;;  %v2512_v1 = vmul.f32 %v6237_v34, %v6237_v34 }
 0x49f   :  { %7668 = vst [vmem:[#allocation3_spill] sm:$0xff] %v6249_v3  ;;  %v2514_v27 = vmul.f32 %v6241_v46, %v6241_v46  ;;  %v2513_v50 = vmul.f32 %v6249_v3, %v6249_v3  ;;  %v6265_v56 = vadd.f32 %v6013_v6, %v7666_v61  ;;  %v6269_v54 = vadd.f32 %v6059_v25, %v7670_v28 }
 0x4a0   :  { %v6273_v2 = vadd.f32 %v6061_v63, %v7670_v28  ;;  %v2680_v62 = vadd.f32 %v2679_v39, %v2511_v26  ;;  %v2570_v58 = vadd.f32 %v2569_v32, %v2512_v1  ;;  %v6277_v51 = vadd.f32 %v6067_v15, %v7670_v28  ;;  %v7674_v1 = vld [vmem:[#allocation89_spill] sm:$0xff] }
 0x4a1   :  { %7669 = vst [vmem:[#allocation7_spill] sm:$0xff] %v6265_v56  ;;  %v2644_v23 = vadd.f32 %v2643_v38, %v2514_v27  ;;  %v2607_v3 = vadd.f32 %v2606_v33, %v2513_v50  ;;  %v2515_v6 = vmul.f32 %v6265_v56, %v6265_v56  ;;  %v2516_v61 = vmul.f32 %v6269_v54, %v6269_v54  ;;  %v6299_v38 = vpop.f32.mrb[140].mxu0  ;;  %v6301_v33 = vpop.f32.mrb[140].mxu1 }
 0x4a2   :  { %7671 = vst [vmem:[#allocation9_spill] sm:$0xff] %v6273_v2  ;;  %7672 = vst [vmem:[#allocation11_spill] sm:$0xff] %v6277_v51  ;;  %v2518_v25 = vmul.f32 %v6273_v2, %v6273_v2  ;;  %v2517_v63 = vmul.f32 %v6277_v51, %v6277_v51  ;;  %v6289_v32 = vadd.f32 %v6069_v19, %v7670_v28  ;;  %v6307_v19 = vpop.f32.mrb[141].mxu0  ;;  %v6309_v28 = vpop.f32.mrb[141].mxu1 }
 0x4a3   :  { %v6293_v15 = vadd.f32 %v6077_v9, %v7674_v1  ;;  %v6297_v39 = vadd.f32 %v6079_v5, %v7674_v1  ;;  %v2681_v26 = vadd.f32 %v2680_v62, %v2515_v6  ;;  %v2571_v27 = vadd.f32 %v2570_v58, %v2516_v61  ;;  %v6317_v58 = vpop.f32.mrb[142].mxu0 }
 0x4a4   :  { %7673 = vst [vmem:[#allocation13_spill] sm:$0xff] %v6289_v32  ;;  %v2645_v50 = vadd.f32 %v2644_v23, %v2518_v25  ;;  %v6305_v56 = vadd.f32 %v6095_v0, %v7674_v1  ;;  %v2608_v9 = vadd.f32 %v2607_v3, %v2517_v63  ;;  %v2519_v5 = vmul.f32 %v6289_v32, %v6289_v32  ;;  %v6319_v23 = vpop.f32.mrb[142].mxu1  ;;  %v7678_v3 = vld [vmem:[#allocation98_spill] sm:$0xff]  ;;  %v6335_v63 = vpop.f32.mrb[143].mxu0 }
 0x4a5   :  { %7675 = vst [vmem:[#allocation15_spill] sm:$0xff] %v6297_v39  ;;  %v2520_v51 = vmul.f32 %v6293_v15, %v6293_v15  ;;  %v2522_v62 = vmul.f32 %v6297_v39, %v6297_v39  ;;  %v6325_v6 = vadd.f32 %v6097_v11, %v7674_v1  ;;  %v6329_v61 = vadd.f32 %v6133_v44, %v7678_v3  ;;  %v6337_v32 = vpop.f32.mrb[143].mxu1 }
 0x4a6   :  { %7676 = vst [vmem:[#allocation17_spill] sm:$0xff] %v6305_v56  ;;  %v2521_v0 = vmul.f32 %v6305_v56, %v6305_v56  ;;  %v6333_v25 = vadd.f32 %v6135_v42, %v7678_v3  ;;  %v2682_v39 = vadd.f32 %v2681_v26, %v2519_v5  ;;  %v6341_v56 = vadd.f32 %v6151_v36, %v7678_v3  ;;  %v7680_v26 = vld [vmem:[#allocation99_spill] sm:$0xff] }
 0x4a7   :  { %7677 = vst [vmem:[#allocation19_spill] sm:$0xff] %v6325_v6  ;;  %v2572_v2 = vadd.f32 %v2571_v27, %v2520_v51  ;;  %v2646_v46 = vadd.f32 %v2645_v50, %v2522_v62  ;;  %v2523_v44 = vmul.f32 %v6325_v6, %v6325_v6  ;;  %v2524_v1 = vmul.f32 %v6329_v61, %v6329_v61 }
 0x4a8   :  { %v2609_v11 = vadd.f32 %v2608_v9, %v2521_v0  ;;  %v2526_v42 = vmul.f32 %v6333_v25, %v6333_v25  ;;  %v2525_v17 = vmul.f32 %v6341_v56, %v6341_v56  ;;  %v6353_v51 = vadd.f32 %v6153_v13, %v7678_v3 }
 0x4a9   :  { %v6357_v36 = vadd.f32 %v6159_v49, %v7680_v26  ;;  %v6361_v27 = vadd.f32 %v6161_v4, %v7680_v26  ;;  %v2683_v50 = vadd.f32 %v2682_v39, %v2523_v44  ;;  %v2573_v9 = vadd.f32 %v2572_v2, %v2524_v1  ;;  %v7682_v2 = vld [vmem:[#allocation108_spill] sm:$0xff] }
 0x4aa   :  { %7679 = vst [vmem:[#allocation21_spill] sm:$0xff] %v6353_v51  ;;  %v2647_v5 = vadd.f32 %v2646_v46, %v2526_v42  ;;  %v6365_v62 = vadd.f32 %v6169_v35, %v7680_v26  ;;  %v2610_v0 = vadd.f32 %v2609_v11, %v2525_v17  ;;  %v2527_v13 = vmul.f32 %v6353_v51, %v6353_v51 }
 0x4ab   :  { %v2528_v3 = vmul.f32 %v6357_v36, %v6357_v36  ;;  %v2530_v49 = vmul.f32 %v6361_v27, %v6361_v27  ;;  %v6377_v46 = vadd.f32 %v6171_v59, %v7680_v26  ;;  %v6381_v35 = vadd.f32 %v6215_v7, %v7682_v2 }
 0x4ac   :  { %v2529_v4 = vmul.f32 %v6365_v62, %v6365_v62  ;;  %v6385_v17 = vadd.f32 %v6217_v16, %v7682_v2  ;;  %v2684_v39 = vadd.f32 %v2683_v50, %v2527_v13  ;;  %v6389_v1 = vadd.f32 %v6225_v43, %v7682_v2 }
 0x4ad   :  { %7681 = vst [vmem:[#allocation25_spill] sm:$0xff] %v6377_v46  ;;  %v2574_v11 = vadd.f32 %v2573_v9, %v2528_v3  ;;  %v2648_v44 = vadd.f32 %v2647_v5, %v2530_v49  ;;  %v2531_v59 = vmul.f32 %v6377_v46, %v6377_v46  ;;  %v2532_v26 = vmul.f32 %v6381_v35, %v6381_v35  ;;  %v7684_v9 = vld [vmem:[#allocation109_spill] sm:$0xff] }
 0x4ae   :  { %v2611_v42 = vadd.f32 %v2610_v0, %v2529_v4  ;;  %v2534_v7 = vmul.f32 %v6385_v17, %v6385_v17  ;;  %v2533_v16 = vmul.f32 %v6389_v1, %v6389_v1  ;;  %v6401_v50 = vadd.f32 %v6227_v12, %v7682_v2 }
 0x4af   :  { %v6405_v43 = vadd.f32 %v6243_v47, %v7684_v9  ;;  %v6409_v5 = vadd.f32 %v6245_v21, %v7684_v9  ;;  %v2685_v0 = vadd.f32 %v2684_v39, %v2531_v59  ;;  %v2575_v13 = vadd.f32 %v2574_v11, %v2532_v26  ;;  %v7687_v11 = vld [vmem:[#allocation118_spill] sm:$0xff] }
 0x4b0   :  { %7683 = vst [vmem:[#allocation27_spill] sm:$0xff] %v6401_v50  ;;  %v2649_v3 = vadd.f32 %v2648_v44, %v2534_v7  ;;  %v6413_v49 = vadd.f32 %v6251_v14, %v7684_v9  ;;  %v2612_v4 = vadd.f32 %v2611_v42, %v2533_v16  ;;  %v2535_v12 = vmul.f32 %v6401_v50, %v6401_v50 }
 0x4b1   :  { %v2536_v2 = vmul.f32 %v6405_v43, %v6405_v43  ;;  %v2538_v47 = vmul.f32 %v6409_v5, %v6409_v5  ;;  %v6425_v39 = vadd.f32 %v6253_v55, %v7684_v9  ;;  %v6429_v14 = vadd.f32 %v6299_v38, %v7687_v11 }
 0x4b2   :  { %7685 = vst [vmem:[#allocation32_spill] sm:$0xff] %v6413_v49  ;;  %v2537_v21 = vmul.f32 %v6413_v49, %v6413_v49  ;;  %v6433_v44 = vadd.f32 %v6301_v33, %v7687_v11  ;;  %v2686_v42 = vadd.f32 %v2685_v0, %v2535_v12  ;;  %v6437_v7 = vadd.f32 %v6307_v19, %v7687_v11 }
 0x4b3   :  { %7686 = vst [vmem:[#allocation36_spill] sm:$0xff] %v6425_v39  ;;  %v2576_v59 = vadd.f32 %v2575_v13, %v2536_v2  ;;  %v2650_v26 = vadd.f32 %v2649_v3, %v2538_v47  ;;  %v2539_v55 = vmul.f32 %v6425_v39, %v6425_v39  ;;  %v2540_v9 = vmul.f32 %v6429_v14, %v6429_v14  ;;  %v7690_v13 = vld [vmem:[#allocation119_spill] sm:$0xff] }
 0x4b4   :  { %7688 = vst [vmem:[#allocation42_spill] sm:$0xff] %v6437_v7  ;;  %v2613_v16 = vadd.f32 %v2612_v4, %v2537_v21  ;;  %v2542_v38 = vmul.f32 %v6433_v44, %v6433_v44  ;;  %v2541_v33 = vmul.f32 %v6437_v7, %v6437_v7  ;;  %v6449_v0 = vadd.f32 %v6309_v28, %v7687_v11 }
 0x4b5   :  { %v6453_v19 = vadd.f32 %v6317_v58, %v7690_v13  ;;  %v6457_v3 = vadd.f32 %v6319_v23, %v7690_v13  ;;  %v2687_v4 = vadd.f32 %v2686_v42, %v2539_v55  ;;  %v2577_v12 = vadd.f32 %v2576_v59, %v2540_v9 }
 0x4b6   :  { %7689 = vst [vmem:[#allocation46_spill] sm:$0xff] %v6449_v0  ;;  %v2651_v2 = vadd.f32 %v2650_v26, %v2542_v38  ;;  %v6461_v47 = vadd.f32 %v6335_v63, %v7690_v13  ;;  %v2614_v21 = vadd.f32 %v2613_v16, %v2541_v33  ;;  %v2543_v28 = vmul.f32 %v6449_v0, %v6449_v0 }
 0x4b7   :  { %v2544_v11 = vmul.f32 %v6453_v19, %v6453_v19  ;;  %v2546_v58 = vmul.f32 %v6457_v3, %v6457_v3  ;;  %v6473_v42 = vadd.f32 %v6337_v32, %v7690_v13 }
 0x4b8   :  { %7691 = vst [vmem:[#allocation52_spill] sm:$0xff] %v6461_v47  ;;  %v2545_v23 = vmul.f32 %v6461_v47, %v6461_v47  ;;  %v2688_v59 = vadd.f32 %v2687_v4, %v2543_v28 }
 0x4b9   :  { %7692 = vst [vmem:[#allocation56_spill] sm:$0xff] %v6473_v42  ;;  %v2578_v63 = vadd.f32 %v2577_v12, %v2544_v11  ;;  %v2652_v26 = vadd.f32 %v2651_v2, %v2546_v58  ;;  %v2547_v55 = vmul.f32 %v6473_v42, %v6473_v42 }
 0x4ba   :  { %v2615_v16 = vadd.f32 %v2614_v21, %v2545_v23 }
 0x4bb   :  { %v2579_v9 = vrot.slane %v2578_v63, 4  ;;  %v2653_v38 = vrot.slane %v2652_v26, 4  ;;  %v2689_v0 = vadd.f32 %v2688_v59, %v2547_v55 }
 0x4bc   :  { %v2616_v33 = vrot.slane %v2615_v16, 4 }
 0x4bd   :  { %v2580_v39 = vadd.f32 %v2579_v9, %v2578_v63  ;;  %v2654_v50 = vadd.f32 %v2653_v38, %v2652_v26  ;;  %v2690_v51 = vrot.slane %v2689_v0, 4 }
 0x4be   :  { %v2617_v46 = vadd.f32 %v2616_v33, %v2615_v16 }
 0x4bf   :  { %v2581_v6 = vrot.slane %v2580_v39, 2  ;;  %v2655_v47 = vrot.slane %v2654_v50, 2  ;;  %v2691_v32 = vadd.f32 %v2690_v51, %v2689_v0 }
 0x4c0   :  { %v2618_v7 = vrot.slane %v2617_v46, 2 }
 0x4c1   :  { %v2582_v13 = vadd.f32 %v2581_v6, %v2580_v39  ;;  %v2656_v4 = vadd.f32 %v2655_v47, %v2654_v50  ;;  %v2692_v2 = vrot.slane %v2691_v32, 2 }
 0x4c2   :  { %v2619_v12 = vadd.f32 %v2618_v7, %v2617_v46 }
 0x4c3   :  { %v2583_v21 = vrot.slane %v2582_v13, 1  ;;  %v2657_v28 = vrot.slane %v2656_v4, 1  ;;  %v2693_v58 = vadd.f32 %v2692_v2, %v2691_v32 }
 0x4c4   :  { %v2620_v11 = vrot.slane %v2619_v12, 1 }
 0x4c5   :  { %v2584_v23 = vadd.f32 %v2583_v21, %v2582_v13  ;;  %v2658_v42 = vadd.f32 %v2657_v28, %v2656_v4  ;;  %v2694_v59 = vrot.slane %v2693_v58, 1 }
 0x4c6   :  { %v2621_v49 = vadd.f32 %v2620_v11, %v2619_v12 }
 0x4c7   :  { %3281 = vrsqrt.f32 %v2584_v23  ;;  %v2695_v63 = vadd.f32 %v2694_v59, %v2693_v58  ;;  %vm2698_vm9 = vcmp.eq.f32.partialorder %v2584_v23, inf  ;;  %v2701_v46 = vand.u32 2147483648, %v2584_v23 }
 0x4c8   :  { %3283 = vrsqrt.f32 %v2658_v42  ;;  %vm2700_vm10 = vcmp.eq.f32.partialorder %v2584_v23, 0.0  ;;  %vm2712_vm11 = vcmp.eq.f32.partialorder %v2658_v42, inf  ;;  %v2715_v55 = vand.u32 2147483648, %v2658_v42 }
 0x4c9   :  { %3285 = vrsqrt.f32 %v2621_v49  ;;  %vm2714_vm12 = vcmp.eq.f32.partialorder %v2658_v42, 0.0  ;;  %vm2705_vm13 = vcmp.eq.f32.partialorder %v2621_v49, inf  ;;  %v2708_v4 = vand.u32 2147483648, %v2621_v49 }
 0x4ca   :  { %3287 = vrsqrt.f32 %v2695_v63  ;;  %vm2719_vm14 = vcmp.eq.f32.partialorder %v2695_v63, inf  ;;  %vm2707_vm15 = vcmp.eq.f32.partialorder %v2621_v49, 0.0  ;;  %v2722_v2 = vand.u32 2147483648, %v2695_v63 }
 0x4cb   :  { %vm2721_vm0 = vcmp.eq.f32.partialorder %v2695_v63, 0.0 }
 0x4d1   :  { %v3282_v26 = vpop.eup %3281 }
 0x4d2   :  { %v3284_v16 = vpop.eup %3283  ;;  %v2697_v51 = vmul.f32 %v3282_v26, %v2584_v23 }
 0x4d3   :  { %v3286_v6 = vpop.eup %3285  ;;  %v2711_v50 = vmul.f32 %v3284_v16, %v2658_v42  ;;  %v7694_v16 = vld [vmem:[#allocation131_spill] sm:$0xff] }
 0x4d4   :  { %v2699_v39 = vsel %vm2698_vm9, %v2584_v23, %v2697_v51  ;;  %v2704_v7 = vmul.f32 %v3286_v6, %v2621_v49  ;;  %v3288_v9 = vpop.eup %3287  ;;  %v7695_v6 = vld [vmem:[#allocation136_spill] sm:$0xff] }
 0x4d5   :  { %v2702_v0 = vsel %vm2700_vm10, %v2701_v46, %v2699_v39  ;;  %v2713_v47 = vsel %vm2712_vm11, %v2658_v42, %v2711_v50  ;;  %v2718_v13 = vmul.f32 %v3288_v9, %v2695_v63  ;;  %v7693_v42 = vld [vmem:[#allocation128_spill] sm:$0xff] }
 0x4d6   :  { %v2724_v38 = vmax.f32 %v2702_v0, 1e-12  ;;  %v2716_v33 = vsel %vm2714_vm12, %v2715_v55, %v2713_v47  ;;  %v2706_v32 = vsel %vm2705_vm13, %v2621_v49, %v2704_v7  ;;  %v7696_v50 = vld [vmem:[#allocation140_spill] sm:$0xff] }
 0x4d7   :  { %v2720_v12 = vsel %vm2719_vm14, %v2695_v63, %v2718_v13  ;;  %v2726_v21 = vmax.f32 %v2716_v33, 1e-12  ;;  %v2709_v28 = vsel %vm2707_vm15, %v2708_v4, %v2706_v32  ;;  %v7697_v39 = vld [vmem:[#allocation144_spill] sm:$0xff] }
 0x4d8   :  { %3289 = vrcp.f32 %v2724_v38  ;;  %v2723_v11 = vsel %vm2721_vm0, %v2722_v2, %v2720_v12  ;;  %v2725_v58 = vmax.f32 %v2709_v28, 1e-12  ;;  %v7698_v0 = vld [vmem:[#allocation148_spill] sm:$0xff] }
 0x4d9   :  { %3291 = vrcp.f32 %v2726_v21  ;;  %v2727_v23 = vmax.f32 %v2723_v11, 1e-12  ;;  %v7699_v63 = vld [vmem:[#allocation152_spill] sm:$0xff]  ;;  %v7704_v11 = vld [vmem:[#allocation137_spill] sm:$0xff] }
 0x4da   :  { %3293 = vrcp.f32 %v2725_v58  ;;  %v7700_v9 = vld [vmem:[#allocation156_spill] sm:$0xff] }
 0x4db   :  { %3295 = vrcp.f32 %v2727_v23  ;;  %v7701_v33 = vld [vmem:[#allocation160_spill] sm:$0xff]  ;;  %v7705_v23 = vld [vmem:[#allocation141_spill] sm:$0xff] }
 0x4e2   :  { %v3290_v59 = vpop.eup %3289 }
 0x4e3   :  { %v2729_v26 = vmul.f32 %v3290_v59, %v7693_v42  ;;  %v2736_v51 = vmul.f32 %v3290_v59, %v7694_v16  ;;  %v2740_v46 = vmul.f32 %v3290_v59, %v7695_v6  ;;  %v2744_v49 = vmul.f32 %v3290_v59, %v7696_v50 }
 0x4e4   :  { %v2748_v7 = vmul.f32 %v3290_v59, %v7697_v39  ;;  %v2752_v47 = vmul.f32 %v3290_v59, %v7698_v0  ;;  %v2756_v55 = vmul.f32 %v3290_v59, %v7699_v63  ;;  %v2760_v38 = vmul.f32 %v3290_v59, %v7700_v9  ;;  %v7712_v9 = vld [vmem:[#allocation61_spill] sm:$0xff] }
 0x4e5   :  { %v2764_v32 = vmul.f32 %v3290_v59, %v7701_v33  ;;  %v2768_v13 = vmul.f32 %v3290_v59, %v5096_v29  ;;  %v2772_v4 = vmul.f32 %v3290_v59, %v5847_v20  ;;  %v2776_v12 = vmul.f32 %v3290_v59, %v5877_v37  ;;  %3099 = vst [vmem:[%s7096_s5 + $0x400] sm:$0xff] %v2729_v26  ;;  %v7706_v26 = vld [vmem:[#allocation145_spill] sm:$0xff]  ;;  %v7713_v33 = vld [vmem:[#allocation70_spill] sm:$0xff] }
 0x4e6   :  { %3103 = vst [vmem:[%s7096_s5 + $0x420] sm:$0xff] %v2736_v51  ;;  %3107 = vst [vmem:[%s7096_s5 + $0x440] sm:$0xff] %v2740_v46  ;;  %v2780_v29 = vmul.f32 %v3290_v59, %v5905_v31  ;;  %v2784_v20 = vmul.f32 %v3290_v59, %v5941_v41  ;;  %v2788_v37 = vmul.f32 %v3290_v59, %v5965_v60  ;;  %v7707_v51 = vld [vmem:[#allocation149_spill] sm:$0xff] }
 0x4e7   :  { %3111 = vst [vmem:[%s7096_s5 + $0x460] sm:$0xff] %v2744_v49  ;;  %v2792_v2 = vmul.f32 %v3290_v59, %v5997_v40  ;;  %3115 = vst [vmem:[%s7096_s5 + $0x480] sm:$0xff] %v2748_v7  ;;  %v2796_v31 = vmul.f32 %v3290_v59, %v6029_v22  ;;  %v2800_v41 = vmul.f32 %v3290_v59, %v6053_v52  ;;  %v6533_v22 = vpop.eup %3291  ;;  %v7708_v46 = vld [vmem:[#allocation153_spill] sm:$0xff] }
 0x4e8   :  { %3119 = vst [vmem:[%s7096_s5 + $0x4a0] sm:$0xff] %v2752_v47  ;;  %3123 = vst [vmem:[%s7096_s5 + $0x4c0] sm:$0xff] %v2756_v55  ;;  %v2804_v60 = vmul.f32 %v3290_v59, %v6089_v45  ;;  %v2808_v40 = vmul.f32 %v3290_v59, %v6117_v53  ;;  %v2812_v52 = vmul.f32 %v3290_v59, %v6145_v10  ;;  %v7709_v49 = vld [vmem:[#allocation157_spill] sm:$0xff] }
 0x4e9   :  { %3127 = vst [vmem:[%s7096_s5 + $0x4e0] sm:$0xff] %v2760_v38  ;;  %3131 = vst [vmem:[%s7096_s5 + $0x500] sm:$0xff] %v2764_v32  ;;  %v2816_v45 = vmul.f32 %v3290_v59, %v6181_v18  ;;  %v2820_v53 = vmul.f32 %v3290_v59, %v6205_v48  ;;  %v2824_v21 = vmul.f32 %v3290_v59, %v6237_v34  ;;  %v7710_v7 = vld [vmem:[#allocation161_spill] sm:$0xff] }
 0x4ea   :  { %3135 = vst [vmem:[%s7096_s5 + $0x520] sm:$0xff] %v2768_v13  ;;  %3139 = vst [vmem:[%s7096_s5 + $0x540] sm:$0xff] %v2772_v4  ;;  %v2828_v10 = vmul.f32 %v3290_v59, %v6269_v54  ;;  %v2832_v18 = vmul.f32 %v3290_v59, %v6293_v15  ;;  %v2836_v48 = vmul.f32 %v3290_v59, %v6329_v61  ;;  %v7715_v4 = vld [vmem:[#allocation84_spill] sm:$0xff] }
 0x4eb   :  { %3143 = vst [vmem:[%s7096_s5 + $0x560] sm:$0xff] %v2776_v12  ;;  %3147 = vst [vmem:[%s7096_s5 + $0x580] sm:$0xff] %v2780_v29  ;;  %v2840_v34 = vmul.f32 %v3290_v59, %v6357_v36  ;;  %v2844_v54 = vmul.f32 %v3290_v59, %v6381_v35  ;;  %v2848_v15 = vmul.f32 %v3290_v59, %v6405_v43  ;;  %v6583_v35 = vpop.eup %3293  ;;  %v7702_v43 = vld [vmem:[#allocation129_spill] sm:$0xff]  ;;  %v7716_v29 = vld [vmem:[#allocation91_spill] sm:$0xff] }
 0x4ec   :  { %3151 = vst [vmem:[%s7096_s5 + $0x5a0] sm:$0xff] %v2784_v20  ;;  %3155 = vst [vmem:[%s7096_s5 + $0x5c0] sm:$0xff] %v2788_v37  ;;  %v2852_v61 = vmul.f32 %v3290_v59, %v6429_v14  ;;  %v2856_v36 = vmul.f32 %v3290_v59, %v6453_v19  ;;  %v2733_v14 = vmul.f32 %v6533_v22, %v7702_v43  ;;  %v7703_v19 = vld [vmem:[#allocation132_spill] sm:$0xff]  ;;  %v6605_v42 = vpop.eup %3295 }
 0x4ed   :  { %3159 = vst [vmem:[%s7096_s5 + $0x5e0] sm:$0xff] %v2792_v2  ;;  %3163 = vst [vmem:[%s7096_s5 + $0x600] sm:$0xff] %v2796_v31  ;;  %v2738_v28 = vmul.f32 %v6533_v22, %v7703_v19  ;;  %v2742_v58 = vmul.f32 %v6533_v22, %v7704_v11  ;;  %v2746_v59 = vmul.f32 %v6533_v22, %v7705_v23  ;;  %v7717_v37 = vld [vmem:[#allocation100_spill] sm:$0xff]  ;;  %v7718_v31 = vld [vmem:[#allocation105_spill] sm:$0xff] }
 0x4ee   :  { %3167 = vst [vmem:[%s7096_s5 + $0x620] sm:$0xff] %v2800_v41  ;;  %3171 = vst [vmem:[%s7096_s5 + $0x640] sm:$0xff] %v2804_v60  ;;  %v2750_v16 = vmul.f32 %v6533_v22, %v7706_v26  ;;  %v2754_v6 = vmul.f32 %v6533_v22, %v7707_v51  ;;  %v2758_v50 = vmul.f32 %v6533_v22, %v7708_v46  ;;  %v7719_v60 = vld [vmem:[#allocation114_spill] sm:$0xff] }
 0x4ef   :  { %3175 = vst [vmem:[%s7096_s5 + $0x660] sm:$0xff] %v2808_v40  ;;  %3179 = vst [vmem:[%s7096_s5 + $0x680] sm:$0xff] %v2812_v52  ;;  %v2762_v39 = vmul.f32 %v6533_v22, %v7709_v49  ;;  %v2766_v0 = vmul.f32 %v6533_v22, %v7710_v7  ;;  %v2770_v47 = vmul.f32 %v6533_v22, %v5099_v8  ;;  %v7720_v52 = vld [vmem:[#allocation121_spill] sm:$0xff] }
 0x4f0   :  { %3183 = vst [vmem:[%s7096_s5 + $0x6a0] sm:$0xff] %v2816_v45  ;;  %3187 = vst [vmem:[%s7096_s5 + $0x6c0] sm:$0xff] %v2820_v53  ;;  %v2774_v63 = vmul.f32 %v6533_v22, %v5851_v57  ;;  %v2778_v55 = vmul.f32 %v6533_v22, %v5881_v24  ;;  %v2782_v8 = vmul.f32 %v6533_v22, %v5909_v30  ;;  %v7711_v57 = vld [vmem:[#allocation54_spill] sm:$0xff]  ;;  %v7714_v30 = vld [vmem:[#allocation75_spill] sm:$0xff] }
 0x4f1   :  { %3191 = vst [vmem:[%s7096_s5 + $0x6e0] sm:$0xff] %v2824_v21  ;;  %3195 = vst [vmem:[%s7096_s5 + $0x700] sm:$0xff] %v2828_v10  ;;  %v2786_v24 = vmul.f32 %v6533_v22, %v7711_v57  ;;  %v2790_v38 = vmul.f32 %v6533_v22, %v7712_v9  ;;  %v2794_v32 = vmul.f32 %v6533_v22, %v7713_v33  ;;  %v7721_v53 = vld [vmem:[#allocation5_spill] sm:$0xff] }
 0x4f2   :  { %3199 = vst [vmem:[%s7096_s5 + $0x720] sm:$0xff] %v2832_v18  ;;  %3203 = vst [vmem:[%s7096_s5 + $0x740] sm:$0xff] %v2836_v48  ;;  %v2798_v13 = vmul.f32 %v6533_v22, %v7714_v30  ;;  %v2802_v12 = vmul.f32 %v6533_v22, %v7715_v4  ;;  %v2806_v20 = vmul.f32 %v6533_v22, %v7716_v29  ;;  %v7722_v10 = vld [vmem:[#allocation9_spill] sm:$0xff]  ;;  %v7723_v48 = vld [vmem:[#allocation15_spill] sm:$0xff] }
 0x4f3   :  { %3207 = vst [vmem:[%s7096_s5 + $0x760] sm:$0xff] %v2840_v34  ;;  %3211 = vst [vmem:[%s7096_s5 + $0x780] sm:$0xff] %v2844_v54  ;;  %v2810_v2 = vmul.f32 %v6533_v22, %v7717_v37  ;;  %v2814_v41 = vmul.f32 %v6533_v22, %v7718_v31  ;;  %v2818_v40 = vmul.f32 %v6533_v22, %v7719_v60 }
 0x4f4   :  { %3215 = vst [vmem:[%s7096_s5 + $0x7a0] sm:$0xff] %v2848_v15  ;;  %3219 = vst [vmem:[%s7096_s5 + $0x7c0] sm:$0xff] %v2852_v61  ;;  %v2822_v45 = vmul.f32 %v6533_v22, %v7720_v52  ;;  %v2826_v21 = vmul.f32 %v6533_v22, %v7721_v53  ;;  %v2830_v18 = vmul.f32 %v6533_v22, %v7722_v10 }
 0x4f5   :  { %3223 = vst [vmem:[%s7096_s5 + $0x7e0] sm:$0xff] %v2856_v36  ;;  %3101 = vst [vmem:[%s7096_s5 + $0x410] sm:$0xff] %v2733_v14  ;;  %v2834_v34 = vmul.f32 %v6533_v22, %v7723_v48  ;;  %v2838_v54 = vmul.f32 %v6533_v22, %v6333_v25  ;;  %v2842_v15 = vmul.f32 %v6533_v22, %v6361_v27  ;;  %v7727_v14 = vld [vmem:[#allocation142_spill] sm:$0xff] }
 0x4f6   :  { %3105 = vst [vmem:[%s7096_s5 + $0x430] sm:$0xff] %v2738_v28  ;;  %3109 = vst [vmem:[%s7096_s5 + $0x450] sm:$0xff] %v2742_v58  ;;  %v2846_v25 = vmul.f32 %v6533_v22, %v6385_v17  ;;  %v2850_v27 = vmul.f32 %v6533_v22, %v6409_v5  ;;  %v2854_v61 = vmul.f32 %v6533_v22, %v6433_v44  ;;  %v7724_v17 = vld [vmem:[#allocation130_spill] sm:$0xff]  ;;  %v7725_v44 = vld [vmem:[#allocation133_spill] sm:$0xff] }
 0x4f7   :  { %3113 = vst [vmem:[%s7096_s5 + $0x470] sm:$0xff] %v2746_v59  ;;  %3117 = vst [vmem:[%s7096_s5 + $0x490] sm:$0xff] %v2750_v16  ;;  %v2858_v36 = vmul.f32 %v6533_v22, %v6457_v3  ;;  %v2731_v5 = vmul.f32 %v6583_v35, %v7724_v17  ;;  %v2737_v3 = vmul.f32 %v6583_v35, %v7725_v44  ;;  %v7726_v22 = vld [vmem:[#allocation138_spill] sm:$0xff]  ;;  %v7755_v44 = vld [vmem:[#allocation139_spill] sm:$0xff] }
 0x4f8   :  { %3121 = vst [vmem:[%s7096_s5 + $0x4b0] sm:$0xff] %v2754_v6  ;;  %3125 = vst [vmem:[%s7096_s5 + $0x4d0] sm:$0xff] %v2758_v50  ;;  %v2741_v43 = vmul.f32 %v6583_v35, %v7726_v22  ;;  %v2745_v19 = vmul.f32 %v6583_v35, %v7727_v14  ;;  %v7728_v28 = vld [vmem:[#allocation146_spill] sm:$0xff]  ;;  %v7756_v22 = vld [vmem:[#allocation143_spill] sm:$0xff] }
 0x4f9   :  { %3129 = vst [vmem:[%s7096_s5 + $0x4f0] sm:$0xff] %v2762_v39  ;;  %3133 = vst [vmem:[%s7096_s5 + $0x510] sm:$0xff] %v2766_v0  ;;  %v2749_v11 = vmul.f32 %v6583_v35, %v7728_v28  ;;  %v7729_v58 = vld [vmem:[#allocation150_spill] sm:$0xff]  ;;  %v7734_v39 = vld [vmem:[#allocation40_spill] sm:$0xff] }
 0x4fa   :  { %3137 = vst [vmem:[%s7096_s5 + $0x530] sm:$0xff] %v2770_v47  ;;  %3141 = vst [vmem:[%s7096_s5 + $0x550] sm:$0xff] %v2774_v63  ;;  %v2753_v23 = vmul.f32 %v6583_v35, %v7729_v58  ;;  %v7730_v59 = vld [vmem:[#allocation154_spill] sm:$0xff]  ;;  %v2773_v7 = vmul.f32 %v6583_v35, %v7734_v39  ;;  %v7735_v0 = vld [vmem:[#allocation44_spill] sm:$0xff] }
 0x4fb   :  { %3145 = vst [vmem:[%s7096_s5 + $0x570] sm:$0xff] %v2778_v55  ;;  %3149 = vst [vmem:[%s7096_s5 + $0x590] sm:$0xff] %v2782_v8  ;;  %v2757_v26 = vmul.f32 %v6583_v35, %v7730_v59  ;;  %v7731_v16 = vld [vmem:[#allocation158_spill] sm:$0xff]  ;;  %v2777_v47 = vmul.f32 %v6583_v35, %v7735_v0  ;;  %v7737_v8 = vld [vmem:[#allocation55_spill] sm:$0xff] }
 0x4fc   :  { %3153 = vst [vmem:[%s7096_s5 + $0x5b0] sm:$0xff] %v2786_v24  ;;  %3157 = vst [vmem:[%s7096_s5 + $0x5d0] sm:$0xff] %v2790_v38  ;;  %v2761_v51 = vmul.f32 %v6583_v35, %v7731_v16  ;;  %v7732_v6 = vld [vmem:[#allocation162_spill] sm:$0xff]  ;;  %v2785_v57 = vmul.f32 %v6583_v35, %v7737_v8  ;;  %v7738_v24 = vld [vmem:[#allocation64_spill] sm:$0xff] }
 0x4fd   :  { %3161 = vst [vmem:[%s7096_s5 + $0x5f0] sm:$0xff] %v2794_v32  ;;  %3165 = vst [vmem:[%s7096_s5 + $0x610] sm:$0xff] %v2798_v13  ;;  %v2765_v46 = vmul.f32 %v6583_v35, %v7732_v6  ;;  %v7733_v50 = vld [vmem:[#allocation34_spill] sm:$0xff]  ;;  %v2789_v9 = vmul.f32 %v6583_v35, %v7738_v24  ;;  %v7739_v38 = vld [vmem:[#allocation71_spill] sm:$0xff] }
 0x4fe   :  { %3169 = vst [vmem:[%s7096_s5 + $0x630] sm:$0xff] %v2802_v12  ;;  %3173 = vst [vmem:[%s7096_s5 + $0x650] sm:$0xff] %v2806_v20  ;;  %v2769_v49 = vmul.f32 %v6583_v35, %v7733_v50  ;;  %v7736_v63 = vld [vmem:[#allocation50_spill] sm:$0xff]  ;;  %v2793_v33 = vmul.f32 %v6583_v35, %v7739_v38  ;;  %v7740_v32 = vld [vmem:[#allocation80_spill] sm:$0xff] }
 0x4ff   :  { %3177 = vst [vmem:[%s7096_s5 + $0x670] sm:$0xff] %v2810_v2  ;;  %3181 = vst [vmem:[%s7096_s5 + $0x690] sm:$0xff] %v2814_v41  ;;  %v2781_v55 = vmul.f32 %v6583_v35, %v7736_v63  ;;  %v2797_v30 = vmul.f32 %v6583_v35, %v7740_v32  ;;  %v7741_v13 = vld [vmem:[#allocation85_spill] sm:$0xff]  ;;  %v7742_v12 = vld [vmem:[#allocation94_spill] sm:$0xff] }
 0x500   :  { %3185 = vst [vmem:[%s7096_s5 + $0x6b0] sm:$0xff] %v2818_v40  ;;  %3189 = vst [vmem:[%s7096_s5 + $0x6d0] sm:$0xff] %v2822_v45  ;;  %v2801_v4 = vmul.f32 %v6583_v35, %v7741_v13  ;;  %v2805_v29 = vmul.f32 %v6583_v35, %v7742_v12  ;;  %v7743_v20 = vld [vmem:[#allocation101_spill] sm:$0xff]  ;;  %v7744_v2 = vld [vmem:[#allocation110_spill] sm:$0xff] }
 0x501   :  { %3193 = vst [vmem:[%s7096_s5 + $0x6f0] sm:$0xff] %v2826_v21  ;;  %3197 = vst [vmem:[%s7096_s5 + $0x710] sm:$0xff] %v2830_v18  ;;  %v2809_v37 = vmul.f32 %v6583_v35, %v7743_v20  ;;  %v2813_v31 = vmul.f32 %v6583_v35, %v7744_v2  ;;  %v7745_v41 = vld [vmem:[#allocation115_spill] sm:$0xff]  ;;  %v7746_v40 = vld [vmem:[#allocation124_spill] sm:$0xff] }
 0x502   :  { %3201 = vst [vmem:[%s7096_s5 + $0x730] sm:$0xff] %v2834_v34  ;;  %3205 = vst [vmem:[%s7096_s5 + $0x750] sm:$0xff] %v2838_v54  ;;  %v2817_v60 = vmul.f32 %v6583_v35, %v7745_v41  ;;  %v2821_v52 = vmul.f32 %v6583_v35, %v7746_v40  ;;  %v7747_v45 = vld [vmem:[#allocation3_spill] sm:$0xff]  ;;  %v7749_v18 = vld [vmem:[#allocation17_spill] sm:$0xff]  ;;  %v2837_v34 = vmul.f32 %v6583_v35, %v6341_v56 }
 0x503   :  { %3209 = vst [vmem:[%s7096_s5 + $0x770] sm:$0xff] %v2842_v15  ;;  %3213 = vst [vmem:[%s7096_s5 + $0x790] sm:$0xff] %v2846_v25  ;;  %v2825_v53 = vmul.f32 %v6583_v35, %v7747_v45  ;;  %v7748_v21 = vld [vmem:[#allocation11_spill] sm:$0xff]  ;;  %v2833_v48 = vmul.f32 %v6583_v35, %v7749_v18  ;;  %v2841_v54 = vmul.f32 %v6583_v35, %v6365_v62  ;;  %v7750_v62 = vld [vmem:[#allocation32_spill] sm:$0xff] }
 0x504   :  { %3217 = vst [vmem:[%s7096_s5 + $0x7b0] sm:$0xff] %v2850_v27  ;;  %3221 = vst [vmem:[%s7096_s5 + $0x7d0] sm:$0xff] %v2854_v61  ;;  %v2829_v10 = vmul.f32 %v6583_v35, %v7748_v21  ;;  %v2845_v56 = vmul.f32 %v6583_v35, %v6389_v1  ;;  %v2849_v15 = vmul.f32 %v6583_v35, %v7750_v62  ;;  %v7751_v25 = vld [vmem:[#allocation42_spill] sm:$0xff]  ;;  %v7752_v61 = vld [vmem:[#allocation52_spill] sm:$0xff] }
 0x505   :  { %3225 = vst [vmem:[%s7096_s5 + $0x7f0] sm:$0xff] %v2858_v36  ;;  %3100 = vst [vmem:[%s7096_s5 + $0x408] sm:$0xff] %v2731_v5  ;;  %v2853_v27 = vmul.f32 %v6583_v35, %v7751_v25  ;;  %v2857_v36 = vmul.f32 %v6583_v35, %v7752_v61  ;;  %v7753_v1 = vld [vmem:[#allocation135_spill] sm:$0xff]  ;;  %v7754_v17 = vld [vmem:[#allocation134_spill] sm:$0xff] }
 0x506   :  { %3104 = vst [vmem:[%s7096_s5 + $0x428] sm:$0xff] %v2737_v3  ;;  %3108 = vst [vmem:[%s7096_s5 + $0x448] sm:$0xff] %v2741_v43  ;;  %v2735_v35 = vmul.f32 %v6605_v42, %v7753_v1  ;;  %v2739_v5 = vmul.f32 %v6605_v42, %v7754_v17  ;;  %v2743_v3 = vmul.f32 %v6605_v42, %v7755_v44  ;;  %v7757_v14 = vld [vmem:[#allocation147_spill] sm:$0xff]  ;;  %v7763_v50 = vld [vmem:[#allocation41_spill] sm:$0xff] }
 0x507   :  { %3112 = vst [vmem:[%s7096_s5 + $0x468] sm:$0xff] %v2745_v19  ;;  %3116 = vst [vmem:[%s7096_s5 + $0x488] sm:$0xff] %v2749_v11  ;;  %v2747_v43 = vmul.f32 %v6605_v42, %v7756_v22  ;;  %v2751_v19 = vmul.f32 %v6605_v42, %v7757_v14  ;;  %v7758_v28 = vld [vmem:[#allocation151_spill] sm:$0xff]  ;;  %v7764_v39 = vld [vmem:[#allocation45_spill] sm:$0xff] }
 0x508   :  { %3120 = vst [vmem:[%s7096_s5 + $0x4a8] sm:$0xff] %v2753_v23  ;;  %3124 = vst [vmem:[%s7096_s5 + $0x4c8] sm:$0xff] %v2757_v26  ;;  %v2755_v11 = vmul.f32 %v6605_v42, %v7758_v28  ;;  %v7759_v58 = vld [vmem:[#allocation155_spill] sm:$0xff]  ;;  %v7766_v63 = vld [vmem:[#allocation60_spill] sm:$0xff] }
 0x509   :  { %3128 = vst [vmem:[%s7096_s5 + $0x4e8] sm:$0xff] %v2761_v51  ;;  %3132 = vst [vmem:[%s7096_s5 + $0x508] sm:$0xff] %v2765_v46  ;;  %v2759_v23 = vmul.f32 %v6605_v42, %v7759_v58  ;;  %v7760_v59 = vld [vmem:[#allocation159_spill] sm:$0xff]  ;;  %v7767_v8 = vld [vmem:[#allocation65_spill] sm:$0xff] }
 0x50a   :  { %3136 = vst [vmem:[%s7096_s5 + $0x528] sm:$0xff] %v2769_v49  ;;  %3140 = vst [vmem:[%s7096_s5 + $0x548] sm:$0xff] %v2773_v7  ;;  %v2763_v26 = vmul.f32 %v6605_v42, %v7760_v59  ;;  %v7761_v16 = vld [vmem:[#allocation163_spill] sm:$0xff]  ;;  %v2775_v49 = vmul.f32 %v6605_v42, %v7763_v50  ;;  %v2779_v7 = vmul.f32 %v6605_v42, %v7764_v39  ;;  %v7768_v24 = vld [vmem:[#allocation74_spill] sm:$0xff] }
 0x50b   :  { %3144 = vst [vmem:[%s7096_s5 + $0x568] sm:$0xff] %v2777_v47  ;;  %3148 = vst [vmem:[%s7096_s5 + $0x588] sm:$0xff] %v2781_v55  ;;  %v2767_v51 = vmul.f32 %v6605_v42, %v7761_v16  ;;  %v7762_v6 = vld [vmem:[#allocation35_spill] sm:$0xff]  ;;  %v2787_v55 = vmul.f32 %v6605_v42, %v7766_v63  ;;  %v7769_v38 = vld [vmem:[#allocation81_spill] sm:$0xff] }
 0x50c   :  { %3152 = vst [vmem:[%s7096_s5 + $0x5a8] sm:$0xff] %v2785_v57  ;;  %3156 = vst [vmem:[%s7096_s5 + $0x5c8] sm:$0xff] %v2789_v9  ;;  %v2771_v46 = vmul.f32 %v6605_v42, %v7762_v6  ;;  %v7765_v0 = vld [vmem:[#allocation51_spill] sm:$0xff]  ;;  %v2791_v57 = vmul.f32 %v6605_v42, %v7767_v8  ;;  %v2795_v9 = vmul.f32 %v6605_v42, %v7768_v24  ;;  %v7770_v32 = vld [vmem:[#allocation90_spill] sm:$0xff] }
 0x50d   :  { %3160 = vst [vmem:[%s7096_s5 + $0x5e8] sm:$0xff] %v2793_v33  ;;  %3164 = vst [vmem:[%s7096_s5 + $0x608] sm:$0xff] %v2797_v30  ;;  %v2783_v47 = vmul.f32 %v6605_v42, %v7765_v0  ;;  %v2799_v33 = vmul.f32 %v6605_v42, %v7769_v38  ;;  %v2803_v30 = vmul.f32 %v6605_v42, %v7770_v32  ;;  %v7771_v13 = vld [vmem:[#allocation95_spill] sm:$0xff]  ;;  %v7772_v12 = vld [vmem:[#allocation104_spill] sm:$0xff] }
 0x50e   :  { %3168 = vst [vmem:[%s7096_s5 + $0x628] sm:$0xff] %v2801_v4  ;;  %3172 = vst [vmem:[%s7096_s5 + $0x648] sm:$0xff] %v2805_v29  ;;  %v2807_v4 = vmul.f32 %v6605_v42, %v7771_v13  ;;  %v2811_v29 = vmul.f32 %v6605_v42, %v7772_v12  ;;  %v7773_v20 = vld [vmem:[#allocation111_spill] sm:$0xff]  ;;  %v7774_v2 = vld [vmem:[#allocation120_spill] sm:$0xff] }
 0x50f   :  { %3176 = vst [vmem:[%s7096_s5 + $0x668] sm:$0xff] %v2809_v37  ;;  %3180 = vst [vmem:[%s7096_s5 + $0x688] sm:$0xff] %v2813_v31  ;;  %v2815_v37 = vmul.f32 %v6605_v42, %v7773_v20  ;;  %v2819_v31 = vmul.f32 %v6605_v42, %v7774_v2  ;;  %v7775_v41 = vld [vmem:[#allocation125_spill] sm:$0xff]  ;;  %v7776_v40 = vld [vmem:[#allocation7_spill] sm:$0xff] }
 0x510   :  { %3184 = vst [vmem:[%s7096_s5 + $0x6a8] sm:$0xff] %v2817_v60  ;;  %3188 = vst [vmem:[%s7096_s5 + $0x6c8] sm:$0xff] %v2821_v52  ;;  %v2823_v60 = vmul.f32 %v6605_v42, %v7775_v41  ;;  %v2827_v52 = vmul.f32 %v6605_v42, %v7776_v40  ;;  %v7777_v45 = vld [vmem:[#allocation13_spill] sm:$0xff]  ;;  %v7778_v21 = vld [vmem:[#allocation19_spill] sm:$0xff] }
 0x511   :  { %3192 = vst [vmem:[%s7096_s5 + $0x6e8] sm:$0xff] %v2825_v53  ;;  %3196 = vst [vmem:[%s7096_s5 + $0x708] sm:$0xff] %v2829_v10  ;;  %v2831_v53 = vmul.f32 %v6605_v42, %v7777_v45  ;;  %v2835_v10 = vmul.f32 %v6605_v42, %v7778_v21  ;;  %v7779_v18 = vld [vmem:[#allocation21_spill] sm:$0xff] }
 0x512   :  { %3200 = vst [vmem:[%s7096_s5 + $0x728] sm:$0xff] %v2833_v48  ;;  %3204 = vst [vmem:[%s7096_s5 + $0x748] sm:$0xff] %v2837_v34  ;;  %v2839_v48 = vmul.f32 %v6605_v42, %v7779_v18  ;;  %v7780_v34 = vld [vmem:[#allocation25_spill] sm:$0xff] }
 0x513   :  { %3208 = vst [vmem:[%s7096_s5 + $0x768] sm:$0xff] %v2841_v54  ;;  %3212 = vst [vmem:[%s7096_s5 + $0x788] sm:$0xff] %v2845_v56  ;;  %v2843_v54 = vmul.f32 %v6605_v42, %v7780_v34  ;;  %v7781_v56 = vld [vmem:[#allocation27_spill] sm:$0xff] }
 0x514   :  { %3216 = vst [vmem:[%s7096_s5 + $0x7a8] sm:$0xff] %v2849_v15  ;;  %3220 = vst [vmem:[%s7096_s5 + $0x7c8] sm:$0xff] %v2853_v27  ;;  %v2847_v62 = vmul.f32 %v6605_v42, %v7781_v56  ;;  %v7782_v15 = vld [vmem:[#allocation36_spill] sm:$0xff]  ;;  %v7783_v27 = vld [vmem:[#allocation46_spill] sm:$0xff] }
 0x515   :  { %3224 = vst [vmem:[%s7096_s5 + $0x7e8] sm:$0xff] %v2857_v36  ;;  %3102 = vst [vmem:[%s7096_s5 + $0x418] sm:$0xff] %v2735_v35  ;;  %v2851_v25 = vmul.f32 %v6605_v42, %v7782_v15  ;;  %v2855_v61 = vmul.f32 %v6605_v42, %v7783_v27  ;;  %v7784_v36 = vld [vmem:[#allocation56_spill] sm:$0xff] }
 0x516   :  { %3106 = vst [vmem:[%s7096_s5 + $0x438] sm:$0xff] %v2739_v5  ;;  %3110 = vst [vmem:[%s7096_s5 + $0x458] sm:$0xff] %v2743_v3  ;;  %v2859_v1 = vmul.f32 %v6605_v42, %v7784_v36 }
 0x517   :  { %3114 = vst [vmem:[%s7096_s5 + $0x478] sm:$0xff] %v2747_v43  ;;  %3118 = vst [vmem:[%s7096_s5 + $0x498] sm:$0xff] %v2751_v19 }
 0x518   :  { %3122 = vst [vmem:[%s7096_s5 + $0x4b8] sm:$0xff] %v2755_v11  ;;  %3126 = vst [vmem:[%s7096_s5 + $0x4d8] sm:$0xff] %v2759_v23 }
 0x519   :  { %3130 = vst [vmem:[%s7096_s5 + $0x4f8] sm:$0xff] %v2763_v26  ;;  %3134 = vst [vmem:[%s7096_s5 + $0x518] sm:$0xff] %v2767_v51 }
 0x51a   :  { %3138 = vst [vmem:[%s7096_s5 + $0x538] sm:$0xff] %v2771_v46  ;;  %3142 = vst [vmem:[%s7096_s5 + $0x558] sm:$0xff] %v2775_v49 }
 0x51b   :  { %3146 = vst [vmem:[%s7096_s5 + $0x578] sm:$0xff] %v2779_v7  ;;  %3150 = vst [vmem:[%s7096_s5 + $0x598] sm:$0xff] %v2783_v47 }
 0x51c   :  { %3154 = vst [vmem:[%s7096_s5 + $0x5b8] sm:$0xff] %v2787_v55  ;;  %3158 = vst [vmem:[%s7096_s5 + $0x5d8] sm:$0xff] %v2791_v57 }
 0x51d   :  { %3162 = vst [vmem:[%s7096_s5 + $0x5f8] sm:$0xff] %v2795_v9  ;;  %3166 = vst [vmem:[%s7096_s5 + $0x618] sm:$0xff] %v2799_v33 }
 0x51e   :  { %3170 = vst [vmem:[%s7096_s5 + $0x638] sm:$0xff] %v2803_v30  ;;  %3174 = vst [vmem:[%s7096_s5 + $0x658] sm:$0xff] %v2807_v4 }
 0x51f   :  { %3178 = vst [vmem:[%s7096_s5 + $0x678] sm:$0xff] %v2811_v29  ;;  %3182 = vst [vmem:[%s7096_s5 + $0x698] sm:$0xff] %v2815_v37 }
 0x520   :  { %3186 = vst [vmem:[%s7096_s5 + $0x6b8] sm:$0xff] %v2819_v31  ;;  %3190 = vst [vmem:[%s7096_s5 + $0x6d8] sm:$0xff] %v2823_v60 }
 0x521   :  { %3194 = vst [vmem:[%s7096_s5 + $0x6f8] sm:$0xff] %v2827_v52  ;;  %3198 = vst [vmem:[%s7096_s5 + $0x718] sm:$0xff] %v2831_v53 }
 0x522   :  { %3202 = vst [vmem:[%s7096_s5 + $0x738] sm:$0xff] %v2835_v10  ;;  %3206 = vst [vmem:[%s7096_s5 + $0x758] sm:$0xff] %v2839_v48 }
 0x523   :  { %3210 = vst [vmem:[%s7096_s5 + $0x778] sm:$0xff] %v2843_v54  ;;  %3214 = vst [vmem:[%s7096_s5 + $0x798] sm:$0xff] %v2847_v62 }
 0x524   :  { %3218 = vst [vmem:[%s7096_s5 + $0x7b8] sm:$0xff] %v2851_v25  ;;  %3222 = vst [vmem:[%s7096_s5 + $0x7d8] sm:$0xff] %v2855_v61 }
 0x525   :  { %3226 = vst [vmem:[%s7096_s5 + $0x7f8] sm:$0xff] %v2859_v1 }

</bundles_post_ra>
